<compile_context>
chip_gen: v5e
topology: v5e:2x2
jax: 0.10.0
libtpu: 0.0.40
codegen_flags: <defaults>
</compile_context>

<pallas_src>
import functools

import jax
import jax.numpy as jnp
from jax import lax
from jax.experimental import pallas as pl
from jax.experimental.pallas import tpu as pltpu

EPS = 1e-5          # torch.nn.InstanceNorm2d default eps
NEG_SLOPE = 0.2     # LeakyReLU slope


def _instance_norm_lanes(z, inv_n):
    """z: (C, L) f32. Per-channel (row) normalization over all L pixels (lanes).
    Single-pass E[x] / E[x^2] reduction (biased variance, like torch).
    Note: cancellation-prone only for inputs with huge mean/std ratio."""
    s1 = jnp.sum(z, axis=1, keepdims=True)
    s2 = jnp.sum(z * z, axis=1, keepdims=True)
    m = s1 * inv_n
    var = jnp.maximum(s2 * inv_n - m * m, 0.0)
    return (z - m) * lax.rsqrt(var + EPS)


def block_kernel(x_ref, w1_ref, w2_ref, m_ref, o_ref, t_scratch, *,
                 H, W, C_OUT, B_TILE):
    """B_TILE independent samples per grid step (samples unrolled statically)."""
    L = H * W
    inv_n = 1.0 / float(L)
    C3 = 3 * C_OUT

    for b in range(B_TILE):                                  # static unroll
        x = x_ref[b]                                         # (C_IN, L) f32

        # ---- InstanceNorm2d(C_IN) + LeakyReLU(0.2), f32 elementwise ----
        x = _instance_norm_lanes(x, inv_n)
        x = jnp.maximum(x, NEG_SLOPE * x)                    # single VPU max

        # ---- Conv2d 1x1 (no bias): lane-dense MXU matmul, bf16 in / f32 acc ----
        h = jnp.dot(w1_ref[...], x.astype(jnp.bfloat16),
                    preferred_element_type=jnp.float32)      # (C_MID, L)

        # ---- InstanceNorm2d(C_MID) ----
        h = _instance_norm_lanes(h, inv_n)
        h_bf = h.astype(jnp.bfloat16)

        # ---- Conv2d 3x3, dilation=1, padding=1 (no bias) ----
        # Three chunked matmuls (one per ky row of the kernel) into a reused VMEM
        # scratch; rows [kx*C_OUT:(kx+1)*C_OUT] of the chunk are tap (ky, kx).
        acc = None
        for ky in range(3):
            t_scratch[...] = jnp.dot(
                w2_ref[pl.ds(ky * C3, C3), :], h_bf,
                preferred_element_type=jnp.float32)          # (3*C_OUT, L)
            for kx in range(3):
                dy, dx = ky - 1, kx - 1
                t = ky * 3 + kx
                tap = t_scratch[pl.ds(kx * C_OUT, C_OUT), :] # sublane-aligned slice
                shift = dy * W + dx                          # flattened source offset
                if shift != 0:
                    # rolled[:, p] = tap[:, (p + shift) mod L]  (XLU lane rotate)
                    tap = pltpu.roll(tap, shift=(-shift) % L, axis=1)
                if t != 4:                                   # center tap is unmasked
                    r = t if t < 4 else t - 1
                    tap = tap * m_ref[pl.ds(r, 1), :]        # (1,L) resident mask
                acc = tap if acc is None else acc + tap      # no zeros init

        # ---- InstanceNorm2d(C_OUT); Dropout2d(0.0) is the identity ----
        # TODO(synk): Dropout2d with drop_rate > 0 not implemented (module default is 0.0).
        y = _instance_norm_lanes(acc, inv_n)

        o_ref[b] = y.astype(o_ref.dtype)                     # (C_OUT, L) lane-dense store


def _boundary_masks(H, W):
    """Host-side precompute of the 8 combined per-tap zero-padding masks, (8, L) f32.
    Row order: taps t = ky*3+kx skipping the center tap t=4 (row r = t if t<4 else t-1)."""
    L = H * W
    hh = jnp.arange(L, dtype=jnp.int32) // W
    ww = jnp.arange(L, dtype=jnp.int32) % W
    rows = []
    for ky in range(3):
        for kx in range(3):
            dy, dx = ky - 1, kx - 1
            if dy == 0 and dx == 0:
                continue
            m = jnp.ones((L,), jnp.bool_)
            if dy == -1:
                m = m & (hh >= 1)
            elif dy == 1:
                m = m & (hh < H - 1)
            if dx == -1:
                m = m & (ww >= 1)
            elif dx == 1:
                m = m & (ww < W - 1)
            rows.append(m)
    return jnp.stack(rows).astype(jnp.float32)


def _pick_b_tile(N, max_tile=8):
    """Largest divisor of N (capped) that keeps the grid length >= 2 when N >= 2."""
    best = 1
    for t in range(1, min(N, max_tile) + 1):
        if N % t == 0 and (N == 1 or N // t >= 2):
            best = t
    return best


def block_forward(x_nchw, w1_torch, w2_torch):
    """x_nchw: (N, C_IN, H, W); w1_torch: (C_MID, C_IN, 1, 1); w2_torch: (C_OUT, C_MID, 3, 3).
    Returns (N, C_OUT, H, W), matching the torch module."""
    N, C_IN, H, W = x_nchw.shape
    C_MID = w1_torch.shape[0]
    C_OUT = w2_torch.shape[0]
    L = H * W
    B_TILE = _pick_b_tile(N)

    # glue (all free or tiny): NCHW -> (N, C, H*W) reshape; weight repack + bf16 cast
    x_flat = x_nchw.reshape(N, C_IN, L)
    w1p = w1_torch.reshape(C_MID, C_IN).astype(jnp.bfloat16)
    w2p = (jnp.transpose(w2_torch, (2, 3, 0, 1))            # (ky, kx, co, ci)
           .reshape(9 * C_OUT, C_MID).astype(jnp.bfloat16))
    masks = _boundary_masks(H, W)                           # (8, L) f32, VMEM-resident

    kernel = functools.partial(block_kernel, H=H, W=W, C_OUT=C_OUT, B_TILE=B_TILE)

    # explicit VMEM guard (double-buffered x/out blocks + resident weights/masks + scratch)
    live = (2 * B_TILE * C_IN * L * 4 + 2 * B_TILE * C_OUT * L * 4
            + (C_MID * C_IN + 9 * C_OUT * C_MID) * 2 + 8 * L * 4
            + 3 * C_OUT * L * 4)
    vmem_limit = int(min(max(2 * live + (4 << 20), 16 << 20), 64 << 20))

    out_flat = pl.pallas_call(
        kernel,
        out_shape=jax.ShapeDtypeStruct((N, C_OUT, L), x_nchw.dtype),
        grid_spec=pltpu.PrefetchScalarGridSpec(
            num_scalar_prefetch=0,
            grid=(N // B_TILE,),
            in_specs=[
                pl.BlockSpec((B_TILE, C_IN, L), lambda b: (b, 0, 0)),
                pl.BlockSpec((C_MID, C_IN), lambda b: (0, 0)),
                pl.BlockSpec((9 * C_OUT, C_MID), lambda b: (0, 0)),
                pl.BlockSpec((8, L), lambda b: (0, 0)),
            ],
            out_specs=pl.BlockSpec((B_TILE, C_OUT, L), lambda b: (b, 0, 0)),
            scratch_shapes=[pltpu.VMEM((3 * C_OUT, L), jnp.float32)],
        ),
        compiler_params=pltpu.CompilerParams(
            dimension_semantics=("parallel",),               # independent samples
            vmem_limit_bytes=vmem_limit),
    )(x_flat, w1p, w2p, masks)

    # free reshape back to NCHW (no transpose needed)
    return out_flat.reshape(N, C_OUT, H, W)


def ref_forward(x, w1_torch, w2_torch):
    """Pure-JAX f32 reference mirroring the torch module semantics (NCHW)."""
    def inorm(z):
        m = jnp.mean(z, axis=(2, 3), keepdims=True)
        v = jnp.mean((z - m) ** 2, axis=(2, 3), keepdims=True)
        return (z - m) * lax.rsqrt(v + EPS)

    z = inorm(x)
    z = jnp.where(z >= 0, z, NEG_SLOPE * z)
    z = lax.conv_general_dilated(
        z, w1_torch, window_strides=(1, 1), padding='VALID',
        dimension_numbers=('NCHW', 'OIHW', 'NCHW'),
        precision=lax.Precision.HIGHEST)
    z = inorm(z)
    z = lax.conv_general_dilated(
        z, w2_torch, window_strides=(1, 1), padding=((1, 1), (1, 1)),
        dimension_numbers=('NCHW', 'OIHW', 'NCHW'),
        precision=lax.Precision.HIGHEST)
    z = inorm(z)
    return z   # Dropout2d(0.0) == identity


if __name__ == "__main__":
    # Module defaults: nChannels=128, channel_rate=32, lnum=1, drop_rate=0.0
    N, H, W = 2, 16, 16
    nChannels, channel_rate, lnum = 128, 32, 1
    C_IN = nChannels + (lnum - 1) * channel_rate     # 128
    C_MID = 4 * channel_rate                         # 128
    C_OUT = channel_rate                             # 32

    key = jax.random.PRNGKey(0)
    kx_, k1, k2 = jax.random.split(key, 3)
    x = jax.random.normal(kx_, (N, C_IN, H, W), jnp.float32)
    # deterministic synthetic weights in torch layouts
    w1_t = jax.random.normal(k1, (C_MID, C_IN, 1, 1), jnp.float32) * 0.05
    w2_t = jax.random.normal(k2, (C_OUT, C_MID, 3, 3), jnp.float32) * 0.05

    out = jax.block_until_ready(block_forward(x, w1_t, w2_t))
    ref = jax.block_until_ready(ref_forward(x, w1_t, w2_t))

    assert out.shape == (N, C_OUT, H, W), out.shape
    max_err = float(jnp.max(jnp.abs(out - ref)))
    assert max_err < 5e-2, f"max abs err too large: {max_err}"
    print("KERNEL_OK")
</pallas_src>

<mosaic_0001>
module attributes {stable_mosaic.version = 11 : i64} {
  func.func @block_kernel(%arg0: i32, %arg1: memref<1x128x256xf32, #tpu.memory_space<vmem>>, %arg2: memref<128x128xbf16, #tpu.memory_space<vmem>>, %arg3: memref<288x128xbf16, #tpu.memory_space<vmem>>, %arg4: memref<8x256xf32, #tpu.memory_space<vmem>>, %arg5: memref<1x32x256xf32, #tpu.memory_space<vmem>>, %arg6: memref<96x256xf32, #tpu.memory_space<vmem>>) attributes {dimension_semantics = [#tpu.dimension_semantics<parallel>], iteration_bounds = array<i64: 2>, scalar_prefetch = 0 : i64, scratch_operands = 1 : i64, tpu.core_type = #tpu.core_type<tc>, window_params = [{transform_indices = @transform_0, window_bounds = array<i64: 1, 128, 256>}, {pipeline_mode = #tpu.pipeline_mode<synchronous>, transform_indices = @transform_1, window_bounds = array<i64: 128, 128>}, {pipeline_mode = #tpu.pipeline_mode<synchronous>, transform_indices = @transform_2, window_bounds = array<i64: 288, 128>}, {pipeline_mode = #tpu.pipeline_mode<synchronous>, transform_indices = @transform_3, window_bounds = array<i64: 8, 256>}, {transform_indices = @transform_4, window_bounds = array<i64: 1, 32, 256>}]} {
    %c0 = arith.constant 0 : index
    %c0_0 = arith.constant 0 : index
    %c0_1 = arith.constant 0 : index
    %0 = vector.load %arg1[%c0, %c0_0, %c0_1] : memref<1x128x256xf32, #tpu.memory_space<vmem>>, vector<1x128x256xf32>
    %1 = vector.shape_cast %0 : vector<1x128x256xf32> to vector<128x256xf32>
    %cst = arith.constant dense<0.000000e+00> : vector<128xf32>
    %2 = vector.multi_reduction <add>, %1, %cst [1] : vector<128x256xf32> to vector<128xf32>
    %3 = vector.shape_cast %2 : vector<128xf32> to vector<128x1xf32>
    %4 = arith.mulf %1, %1 : vector<128x256xf32>
    %cst_2 = arith.constant dense<0.000000e+00> : vector<128xf32>
    %5 = vector.multi_reduction <add>, %4, %cst_2 [1] : vector<128x256xf32> to vector<128xf32>
    %6 = vector.shape_cast %5 : vector<128xf32> to vector<128x1xf32>
    %cst_3 = arith.constant 3.906250e-03 : f32
    %7 = vector.broadcast %cst_3 : f32 to vector<128x1xf32>
    %8 = arith.mulf %3, %7 : vector<128x1xf32>
    %cst_4 = arith.constant 3.906250e-03 : f32
    %9 = vector.broadcast %cst_4 : f32 to vector<128x1xf32>
    %10 = arith.mulf %6, %9 : vector<128x1xf32>
    %11 = arith.mulf %8, %8 : vector<128x1xf32>
    %12 = arith.subf %10, %11 : vector<128x1xf32>
    %cst_5 = arith.constant 0.000000e+00 : f32
    %13 = vector.broadcast %cst_5 : f32 to vector<128x1xf32>
    %14 = arith.maximumf %12, %13 : vector<128x1xf32>
    %15 = vector.broadcast %8 : vector<128x1xf32> to vector<128x256xf32>
    %16 = arith.subf %1, %15 : vector<128x256xf32>
    %cst_6 = arith.constant 9.99999974E-6 : f32
    %17 = vector.broadcast %cst_6 : f32 to vector<128x1xf32>
    %18 = arith.addf %14, %17 : vector<128x1xf32>
    %19 = math.rsqrt %18 : vector<128x1xf32>
    %20 = vector.broadcast %19 : vector<128x1xf32> to vector<128x256xf32>
    %21 = arith.mulf %16, %20 : vector<128x256xf32>
    %cst_7 = arith.constant 2.000000e-01 : f32
    %22 = vector.broadcast %cst_7 : f32 to vector<128x256xf32>
    %23 = arith.mulf %22, %21 : vector<128x256xf32>
    %24 = arith.maximumf %21, %23 : vector<128x256xf32>
    %c0_8 = arith.constant 0 : index
    %c0_9 = arith.constant 0 : index
    %25 = vector.load %arg2[%c0_8, %c0_9] : memref<128x128xbf16, #tpu.memory_space<vmem>>, vector<128x128xbf16>
    %26 = arith.truncf %24 : vector<128x256xf32> to vector<128x256xbf16>
    %cst_10 = arith.constant dense<0.000000e+00> : vector<128x256xf32>
    %27 = tpu.matmul %25, %26, %cst_10 {dimension_numbers = #tpu.dot_dimension_numbers<[1], [0], [0], [1], [0, 0, 1, 1], [], []>} : vector<128x128xbf16>, vector<128x256xbf16>, vector<128x256xf32> -> vector<128x256xf32>
    %cst_11 = arith.constant dense<0.000000e+00> : vector<128xf32>
    %28 = vector.multi_reduction <add>, %27, %cst_11 [1] : vector<128x256xf32> to vector<128xf32>
    %29 = vector.shape_cast %28 : vector<128xf32> to vector<128x1xf32>
    %30 = arith.mulf %27, %27 : vector<128x256xf32>
    %cst_12 = arith.constant dense<0.000000e+00> : vector<128xf32>
    %31 = vector.multi_reduction <add>, %30, %cst_12 [1] : vector<128x256xf32> to vector<128xf32>
    %32 = vector.shape_cast %31 : vector<128xf32> to vector<128x1xf32>
    %cst_13 = arith.constant 3.906250e-03 : f32
    %33 = vector.broadcast %cst_13 : f32 to vector<128x1xf32>
    %34 = arith.mulf %29, %33 : vector<128x1xf32>
    %cst_14 = arith.constant 3.906250e-03 : f32
    %35 = vector.broadcast %cst_14 : f32 to vector<128x1xf32>
    %36 = arith.mulf %32, %35 : vector<128x1xf32>
    %37 = arith.mulf %34, %34 : vector<128x1xf32>
    %38 = arith.subf %36, %37 : vector<128x1xf32>
    %cst_15 = arith.constant 0.000000e+00 : f32
    %39 = vector.broadcast %cst_15 : f32 to vector<128x1xf32>
    %40 = arith.maximumf %38, %39 : vector<128x1xf32>
    %41 = vector.broadcast %34 : vector<128x1xf32> to vector<128x256xf32>
    %42 = arith.subf %27, %41 : vector<128x256xf32>
    %cst_16 = arith.constant 9.99999974E-6 : f32
    %43 = vector.broadcast %cst_16 : f32 to vector<128x1xf32>
    %44 = arith.addf %40, %43 : vector<128x1xf32>
    %45 = math.rsqrt %44 : vector<128x1xf32>
    %46 = vector.broadcast %45 : vector<128x1xf32> to vector<128x256xf32>
    %47 = arith.mulf %42, %46 : vector<128x256xf32>
    %48 = arith.truncf %47 : vector<128x256xf32> to vector<128x256xbf16>
    %c0_17 = arith.constant 0 : index
    %c0_18 = arith.constant 0 : index
    %49 = vector.load %arg3[%c0_17, %c0_18] : memref<288x128xbf16, #tpu.memory_space<vmem>>, vector<96x128xbf16>
    %cst_19 = arith.constant dense<0.000000e+00> : vector<96x256xf32>
    %50 = tpu.matmul %49, %48, %cst_19 {dimension_numbers = #tpu.dot_dimension_numbers<[1], [0], [0], [1], [0, 0, 1, 1], [], []>} : vector<96x128xbf16>, vector<128x256xbf16>, vector<96x256xf32> -> vector<96x256xf32>
    %c0_20 = arith.constant 0 : index
    %c0_21 = arith.constant 0 : index
    %51 = vector.load %arg6[%c0_20, %c0_21] : memref<96x256xf32, #tpu.memory_space<vmem>>, vector<96x256xf32>
    tpu.vector_store %arg6[%c0_20, %c0_21], %50 {strides = array<i32>} : memref<96x256xf32, #tpu.memory_space<vmem>>, vector<96x256xf32>,
    %c0_22 = arith.constant 0 : index
    %c0_23 = arith.constant 0 : index
    %52 = vector.load %arg6[%c0_22, %c0_23] : memref<96x256xf32, #tpu.memory_space<vmem>>, vector<32x256xf32>
    %c17_i32 = arith.constant 17 : i32
    %53 = tpu.dynamic_rotate %52 by %c17_i32 dim 1 : vector<32x256xf32>, i32 -> vector<32x256xf32>
    %c0_24 = arith.constant 0 : index
    %c0_25 = arith.constant 0 : index
    %54 = vector.load %arg4[%c0_24, %c0_25] : memref<8x256xf32, #tpu.memory_space<vmem>>, vector<1x256xf32>
    %55 = vector.broadcast %54 : vector<1x256xf32> to vector<32x256xf32>
    %56 = arith.mulf %53, %55 : vector<32x256xf32>
    %c32 = arith.constant 32 : index
    %c0_26 = arith.constant 0 : index
    %57 = vector.load %arg6[%c32, %c0_26] : memref<96x256xf32, #tpu.memory_space<vmem>>, vector<32x256xf32>
    %c16_i32 = arith.constant 16 : i32
    %58 = tpu.dynamic_rotate %57 by %c16_i32 dim 1 : vector<32x256xf32>, i32 -> vector<32x256xf32>
    %c1 = arith.constant 1 : index
    %c0_27 = arith.constant 0 : index
    %59 = vector.load %arg4[%c1, %c0_27] : memref<8x256xf32, #tpu.memory_space<vmem>>, vector<1x256xf32>
    %60 = vector.broadcast %59 : vector<1x256xf32> to vector<32x256xf32>
    %61 = arith.mulf %58, %60 : vector<32x256xf32>
    %62 = arith.addf %56, %61 : vector<32x256xf32>
    %c64 = arith.constant 64 : index
    %c0_28 = arith.constant 0 : index
    %63 = vector.load %arg6[%c64, %c0_28] : memref<96x256xf32, #tpu.memory_space<vmem>>, vector<32x256xf32>
    %c15_i32 = arith.constant 15 : i32
    %64 = tpu.dynamic_rotate %63 by %c15_i32 dim 1 : vector<32x256xf32>, i32 -> vector<32x256xf32>
    %c2 = arith.constant 2 : index
    %c0_29 = arith.constant 0 : index
    %65 = vector.load %arg4[%c2, %c0_29] : memref<8x256xf32, #tpu.memory_space<vmem>>, vector<1x256xf32>
    %66 = vector.broadcast %65 : vector<1x256xf32> to vector<32x256xf32>
    %67 = arith.mulf %64, %66 : vector<32x256xf32>
    %68 = arith.addf %62, %67 : vector<32x256xf32>
    %c96 = arith.constant 96 : index
    %c0_30 = arith.constant 0 : index
    %69 = vector.load %arg3[%c96, %c0_30] : memref<288x128xbf16, #tpu.memory_space<vmem>>, vector<96x128xbf16>
    %cst_31 = arith.constant dense<0.000000e+00> : vector<96x256xf32>
    %70 = tpu.matmul %69, %48, %cst_31 {dimension_numbers = #tpu.dot_dimension_numbers<[1], [0], [0], [1], [0, 0, 1, 1], [], []>} : vector<96x128xbf16>, vector<128x256xbf16>, vector<96x256xf32> -> vector<96x256xf32>
    %c0_32 = arith.constant 0 : index
    %c0_33 = arith.constant 0 : index
    %71 = vector.load %arg6[%c0_32, %c0_33] : memref<96x256xf32, #tpu.memory_space<vmem>>, vector<96x256xf32>
    tpu.vector_store %arg6[%c0_32, %c0_33], %70 {strides = array<i32>} : memref<96x256xf32, #tpu.memory_space<vmem>>, vector<96x256xf32>,
    %c0_34 = arith.constant 0 : index
    %c0_35 = arith.constant 0 : index
    %72 = vector.load %arg6[%c0_34, %c0_35] : memref<96x256xf32, #tpu.memory_space<vmem>>, vector<32x256xf32>
    %c1_i32 = arith.constant 1 : i32
    %73 = tpu.dynamic_rotate %72 by %c1_i32 dim 1 : vector<32x256xf32>, i32 -> vector<32x256xf32>
    %c3 = arith.constant 3 : index
    %c0_36 = arith.constant 0 : index
    %74 = vector.load %arg4[%c3, %c0_36] : memref<8x256xf32, #tpu.memory_space<vmem>>, vector<1x256xf32>
    %75 = vector.broadcast %74 : vector<1x256xf32> to vector<32x256xf32>
    %76 = arith.mulf %73, %75 : vector<32x256xf32>
    %77 = arith.addf %68, %76 : vector<32x256xf32>
    %c32_37 = arith.constant 32 : index
    %c0_38 = arith.constant 0 : index
    %78 = vector.load %arg6[%c32_37, %c0_38] : memref<96x256xf32, #tpu.memory_space<vmem>>, vector<32x256xf32>
    %79 = arith.addf %77, %78 : vector<32x256xf32>
    %c64_39 = arith.constant 64 : index
    %c0_40 = arith.constant 0 : index
    %80 = vector.load %arg6[%c64_39, %c0_40] : memref<96x256xf32, #tpu.memory_space<vmem>>, vector<32x256xf32>
    %c255_i32 = arith.constant 255 : i32
    %81 = tpu.dynamic_rotate %80 by %c255_i32 dim 1 : vector<32x256xf32>, i32 -> vector<32x256xf32>
    %c4 = arith.constant 4 : index
    %c0_41 = arith.constant 0 : index
    %82 = vector.load %arg4[%c4, %c0_41] : memref<8x256xf32, #tpu.memory_space<vmem>>, vector<1x256xf32>
    %83 = vector.broadcast %82 : vector<1x256xf32> to vector<32x256xf32>
    %84 = arith.mulf %81, %83 : vector<32x256xf32>
    %85 = arith.addf %79, %84 : vector<32x256xf32>
    %c192 = arith.constant 192 : index
    %c0_42 = arith.constant 0 : index
    %86 = vector.load %arg3[%c192, %c0_42] : memref<288x128xbf16, #tpu.memory_space<vmem>>, vector<96x128xbf16>
    %cst_43 = arith.constant dense<0.000000e+00> : vector<96x256xf32>
    %87 = tpu.matmul %86, %48, %cst_43 {dimension_numbers = #tpu.dot_dimension_numbers<[1], [0], [0], [1], [0, 0, 1, 1], [], []>} : vector<96x128xbf16>, vector<128x256xbf16>, vector<96x256xf32> -> vector<96x256xf32>
    %c0_44 = arith.constant 0 : index
    %c0_45 = arith.constant 0 : index
    %88 = vector.load %arg6[%c0_44, %c0_45] : memref<96x256xf32, #tpu.memory_space<vmem>>, vector<96x256xf32>
    tpu.vector_store %arg6[%c0_44, %c0_45], %87 {strides = array<i32>} : memref<96x256xf32, #tpu.memory_space<vmem>>, vector<96x256xf32>,
    %c0_46 = arith.constant 0 : index
    %c0_47 = arith.constant 0 : index
    %89 = vector.load %arg6[%c0_46, %c0_47] : memref<96x256xf32, #tpu.memory_space<vmem>>, vector<32x256xf32>
    %c241_i32 = arith.constant 241 : i32
    %90 = tpu.dynamic_rotate %89 by %c241_i32 dim 1 : vector<32x256xf32>, i32 -> vector<32x256xf32>
    %c5 = arith.constant 5 : index
    %c0_48 = arith.constant 0 : index
    %91 = vector.load %arg4[%c5, %c0_48] : memref<8x256xf32, #tpu.memory_space<vmem>>, vector<1x256xf32>
    %92 = vector.broadcast %91 : vector<1x256xf32> to vector<32x256xf32>
    %93 = arith.mulf %90, %92 : vector<32x256xf32>
    %94 = arith.addf %85, %93 : vector<32x256xf32>
    %c32_49 = arith.constant 32 : index
    %c0_50 = arith.constant 0 : index
    %95 = vector.load %arg6[%c32_49, %c0_50] : memref<96x256xf32, #tpu.memory_space<vmem>>, vector<32x256xf32>
    %c240_i32 = arith.constant 240 : i32
    %96 = tpu.dynamic_rotate %95 by %c240_i32 dim 1 : vector<32x256xf32>, i32 -> vector<32x256xf32>
    %c6 = arith.constant 6 : index
    %c0_51 = arith.constant 0 : index
    %97 = vector.load %arg4[%c6, %c0_51] : memref<8x256xf32, #tpu.memory_space<vmem>>, vector<1x256xf32>
    %98 = vector.broadcast %97 : vector<1x256xf32> to vector<32x256xf32>
    %99 = arith.mulf %96, %98 : vector<32x256xf32>
    %100 = arith.addf %94, %99 : vector<32x256xf32>
    %c64_52 = arith.constant 64 : index
    %c0_53 = arith.constant 0 : index
    %101 = vector.load %arg6[%c64_52, %c0_53] : memref<96x256xf32, #tpu.memory_space<vmem>>, vector<32x256xf32>
    %c239_i32 = arith.constant 239 : i32
    %102 = tpu.dynamic_rotate %101 by %c239_i32 dim 1 : vector<32x256xf32>, i32 -> vector<32x256xf32>
    %c7 = arith.constant 7 : index
    %c0_54 = arith.constant 0 : index
    %103 = vector.load %arg4[%c7, %c0_54] : memref<8x256xf32, #tpu.memory_space<vmem>>, vector<1x256xf32>
    %104 = vector.broadcast %103 : vector<1x256xf32> to vector<32x256xf32>
    %105 = arith.mulf %102, %104 : vector<32x256xf32>
    %106 = arith.addf %100, %105 : vector<32x256xf32>
    %cst_55 = arith.constant dense<0.000000e+00> : vector<32xf32>
    %107 = vector.multi_reduction <add>, %106, %cst_55 [1] : vector<32x256xf32> to vector<32xf32>
    %108 = vector.shape_cast %107 : vector<32xf32> to vector<32x1xf32>
    %109 = arith.mulf %106, %106 : vector<32x256xf32>
    %cst_56 = arith.constant dense<0.000000e+00> : vector<32xf32>
    %110 = vector.multi_reduction <add>, %109, %cst_56 [1] : vector<32x256xf32> to vector<32xf32>
    %111 = vector.shape_cast %110 : vector<32xf32> to vector<32x1xf32>
    %cst_57 = arith.constant 3.906250e-03 : f32
    %112 = vector.broadcast %cst_57 : f32 to vector<32x1xf32>
    %113 = arith.mulf %108, %112 : vector<32x1xf32>
    %cst_58 = arith.constant 3.906250e-03 : f32
    %114 = vector.broadcast %cst_58 : f32 to vector<32x1xf32>
    %115 = arith.mulf %111, %114 : vector<32x1xf32>
    %116 = arith.mulf %113, %113 : vector<32x1xf32>
    %117 = arith.subf %115, %116 : vector<32x1xf32>
    %cst_59 = arith.constant 0.000000e+00 : f32
    %118 = vector.broadcast %cst_59 : f32 to vector<32x1xf32>
    %119 = arith.maximumf %117, %118 : vector<32x1xf32>
    %120 = vector.broadcast %113 : vector<32x1xf32> to vector<32x256xf32>
    %121 = arith.subf %106, %120 : vector<32x256xf32>
    %cst_60 = arith.constant 9.99999974E-6 : f32
    %122 = vector.broadcast %cst_60 : f32 to vector<32x1xf32>
    %123 = arith.addf %119, %122 : vector<32x1xf32>
    %124 = math.rsqrt %123 : vector<32x1xf32>
    %125 = vector.broadcast %124 : vector<32x1xf32> to vector<32x256xf32>
    %126 = arith.mulf %121, %125 : vector<32x256xf32>
    %c0_61 = arith.constant 0 : index
    %c0_62 = arith.constant 0 : index
    %c0_63 = arith.constant 0 : index
    %127 = vector.load %arg5[%c0_61, %c0_62, %c0_63] : memref<1x32x256xf32, #tpu.memory_space<vmem>>, vector<1x32x256xf32>
    %128 = vector.shape_cast %127 : vector<1x32x256xf32> to vector<32x256xf32>
    %129 = vector.shape_cast %126 : vector<32x256xf32> to vector<1x32x256xf32>
    tpu.vector_store %arg5[%c0_61, %c0_62, %c0_63], %129 {strides = array<i32>} : memref<1x32x256xf32, #tpu.memory_space<vmem>>, vector<1x32x256xf32>,
    return
  }
  func.func @transform_0(%arg0: i32) -> (i32, i32, i32) {
    %c0_i32 = arith.constant 0 : i32
    %c0_i32_0 = arith.constant 0 : i32
    %c0_i32_1 = arith.constant 0 : i32
    return %arg0, %c0_i32, %c0_i32_0 : i32, i32, i32
  }
  func.func @transform_1(%arg0: i32) -> (i32, i32) {
    %c0_i32 = arith.constant 0 : i32
    %c0_i32_0 = arith.constant 0 : i32
    %c0_i32_1 = arith.constant 0 : i32
    return %c0_i32, %c0_i32_0 : i32, i32
  }
  func.func @transform_2(%arg0: i32) -> (i32, i32) {
    %c0_i32 = arith.constant 0 : i32
    %c0_i32_0 = arith.constant 0 : i32
    %c0_i32_1 = arith.constant 0 : i32
    return %c0_i32, %c0_i32_0 : i32, i32
  }
  func.func @transform_3(%arg0: i32) -> (i32, i32) {
    %c0_i32 = arith.constant 0 : i32
    %c0_i32_0 = arith.constant 0 : i32
    %c0_i32_1 = arith.constant 0 : i32
    return %c0_i32, %c0_i32_0 : i32, i32
  }
  func.func @transform_4(%arg0: i32) -> (i32, i32, i32) {
    %c0_i32 = arith.constant 0 : i32
    %c0_i32_0 = arith.constant 0 : i32
    %c0_i32_1 = arith.constant 0 : i32
    return %arg0, %c0_i32, %c0_i32_0 : i32, i32, i32
  }
}

</mosaic_0001>

<bundles_post_ra>
// kernel: tpu_custom_call.1
= control target key start
LH: loop header
LB: loop body
LE: loop exit
PB: predicated region body
PF: predicated region fallthrough
CT: control target
= control target key end

     0   :  { %9 = vsyncpa [#allocation4], 0  ;;  %s5036_s0 = inlined_call_operand.hbm [shape: f32[2,128,256], index: 0, kind: input, shape index: {}]   ;;  %s5037_s1 = inlined_call_operand.hbm [shape: bf16[128,128], index: 1, kind: input, shape index: {}]   ;;  %s5038_s2 = inlined_call_operand.hbm [shape: bf16[288,128], index: 2, kind: input, shape index: {}]   ;;  %s5039_s3 = inlined_call_operand.hbm [shape: f32[8,256], index: 3, kind: input, shape index: {}]   ;;  %s5040_s4 = inlined_call_operand.hbm [shape: f32[2,32,256], index: 4, kind: output, shape index: {}]  }
   0x1   :  { %11 = vsyncpa [#allocation4 + $0x1], 0 }
   0x2   :  { %12 = vsyncpa [#allocation7], 0 }
   0x3   :  { %13 = vsyncpa [#allocation10], 0 }
   0x4   :  { %14 = vsyncpa [#allocation5], 0 }
   0x5   :  { %16 = vsyncpa [#allocation5 + $0x1], 0  ;;  %s3164_s15 = smov 0   ;;  %s3166_s16 = smov 0  }
   0x6   :  { %s3168_s17 = smov 0   ;;  %s3170_s18 = smov 0  }
   0x7 LB: > { %s3185_s19 = sadd.s32 4294967295, %s3121_s18   ;;  %s2597_s20 = sadd.s32 4294967294, %s3121_s18   ;;  %s3121_s18 = sphi %s3170_s18, %s5132_s18   ;;  %s3117_s17 = sphi %s3168_s17, %s5131_s17   ;;  %s3113_s16 = sphi %s3166_s16, %s5130_s16   ;;  %s3109_s15 = sphi %s3164_s15, %s5129_s15  }
   0x8   : > { %p42_p0 = scmp.ne.s32.totalorder %s3113_s16, %s3109_s15  ;;  %p43_p1 = scmp.eq.s32.totalorder %s3185_s19, 0 }
   0x9   : > { %p129_p2 = scmp.eq.s32.totalorder %s3185_s19, 1  ;;  %p135_p3 = scmp.eq.s32.totalorder %s2597_s20, 1 }
   0xa   : > { %p3194_p4 = por %p43_p1, %p42_p0  ;;  %p2598_p5 = scmp.ge.s32.totalorder %s3121_s18, 1 }
   0xb   : > { %p3199_p6 = por %p135_p3, %p42_p0  ;;  %p142_p7 = scmp.lt.s32.totalorder %s3121_s18, 3 }
   0xc   : > { %s153_s25 = sshll.u32 %s5037_s1, 4  ;;  %s3123_s27 = smov [#allocation6]   ;;  %s154_s25 = int_to_ptr.hbm [resolvable:$true] %s153_s25 }
   0xd   : > { %p3207_p8 = pnand %p2598_p5, %p142_p7  ;;  %s155_s28 = sshll.u32 %s3123_s27, 4  ;;  %s156_s28 = int_to_ptr.vmem [resolvable:$true] %s155_s28 }
   0xe   : > { %s167_s6 = sshll.u32 %s5038_s2, 4  ;;  %s3124_s7 = smov 64   ;;  %s168_s6 = int_to_ptr.hbm [resolvable:$true] %s167_s6 }
   0xf   : > { %p2781_p9 = pneg %p3207_p8  ;;  %s3125_s8 = smov 4  }
  0x10   : > { %s3126_s9 = smov [#allocation8]   ;;  %s182_s13 = sshll.u32 %s5039_s3, 4  ;;  %s183_s13 = int_to_ptr.hbm [resolvable:$true] %s182_s13 }
  0x11   : > { %p3215_p10 = pnand %p2781_p9, %p43_p1  ;;  %s169_s10 = sshll.u32 %s3126_s9, 4  ;;  %s170_s10 = int_to_ptr.vmem [resolvable:$true] %s169_s10 }
  0x12   : > { %s3127_s14 = smov [#allocation9]   ;;  %s3231_s23 = sadd.s32 1, %s3121_s18  }
  0x13   : > { %2784 = dma.hbm_to_vmem [thread:$0]  (!%p3215_p10), %s154_s25, 1024, %s156_s28, [#allocation7], %s3124_s7, %s3124_s7, %s3125_s8  }
  0x14   : > { %2787 = dma.hbm_to_vmem [thread:$0]  (!%p3215_p10), %s168_s6, 2304, %s170_s10, [#allocation7], %s3124_s7, %s3124_s7, %s3125_s8  }
  0x15   : > { %s184_s20 = sshll.u32 %s3127_s14, 4  ;;  %s26_s24 = ssub.s32 %s3121_s18, %s3231_s23  ;;  %s185_s20 = int_to_ptr.vmem [resolvable:$true] %s184_s20 }
  0x16   : > { %2790 = dma.hbm_to_vmem [thread:$0]  (!%p3215_p10), %s183_s13, 256, %s185_s20, [#allocation10]  }
  0x17   : > { %s29_s25 = sadd.s32 1, %s3117_s17  ;;  %p27_p12 = scmp.eq.s32.totalorder %s26_s24, 0 }
  0x18   : > { %p36_p13 = scmp.ne.s32.totalorder %s3117_s17, %s3113_s16  ;;  %p37_p0 = scmp.eq.s32.totalorder %s3121_s18, 0 }
  0x19   : > { %p2802_p3 = scmp.lt.s32.totalorder %s3121_s18, 2  ;;  %s195_s30 = sand.u32 1, %s3117_s17  }
  0x1a   : > { %s3243_s27 = scalar_select %p27_p12, %s3117_s17, %s29_s25  }
  0x1b   : > { %p38_p5 = por %p37_p0, %p36_p13  ;;  %p3247_p7 = por %p129_p2, %p36_p13 }
  0x1c   : > { %s2721_s5 = sshll.u32 %s3121_s18, 8  ;;  %s2603_s29 = sshll.u32 %s195_s30, 8 }
  0x1d   : > { %s204_s8 = scalar_lea.hbm %s5036_s0, %s2721_s5  ;;  %s199_s10 = scalar_lea.vmem [#allocation3], %s2603_s29 }
  0x1e   : > { %s205_s9 = sshll.u32 %s204_s8, 4  ;;  %s207_s11 = sshll.u32 %s199_s10, 4  ;;  %s206_s9 = int_to_ptr.hbm [resolvable:$true] %s205_s9  ;;  %s208_s11 = int_to_ptr.vmem [resolvable:$true] %s207_s11 }
  0x1f   : > { %p3258_p9 = pnand %p2802_p3, %p38_p5  ;;  %s196_s13 = scalar_lea.sflag [#allocation4], %s195_s30 }
  0x20   : > { %s3017_s14 = sshra.s32 %s206_s9, 4  ;;  %s3024_s5 = scalar_lea.hbm %s5036_s0, 512  ;;  %s3018_s14 = int_to_ptr.hbm [resolvable:$true] %s3017_s14 }
  0x21   : > { %s3019_s20 = scalar_lea.hbm %s3018_s14, 256  ;;  %p3021_p10 = pneg %p3258_p9 }
  0x22   : > { %p3020_p2 = scmp.ne.s32.totalorder %s3018_s14, %s3019_s20  ;;  %p3025_p0 = scmp.lt.s32.totalorder %s3018_s14, %s5036_s0 }
  0x23   : > { %p3026_p3 = scmp.lt.s32.totalorder %s3024_s5, %s3019_s20 }
  0x24   : > { %p3022_p12 = pnand %p3021_p10, %p3020_p2 }
  0x25   : > { %p3027_p5 = por %p3026_p3, %p3025_p0 }
  0x26   : > { %p3023_p13 = pneg %p3022_p12 }
  0x28   : > { %p3028_p11 = pnand %p3027_p5, %p3023_p13 }
  0x2a   : > { %3031 = shalt.err (!%p3028_p11)
}
  0x2b   : > { %s3128_s30 = smov 256   ;;  %s3129_s7 = smov 16  }
  0x2c   : > { %2794 = dma.hbm_to_vmem [thread:$0]  (!%p3258_p9), %s206_s9, 4096, %s208_s11, %s196_s13, %s3128_s30, %s3128_s30, %s3129_s7  }
  0x2d   : > { %219 = sbr.rel (%p3207_p8) target bundleno = 1350 (0x546), region = 36 }
  0x32   : > { %s3275_s8 = sand.u32 1, %s3113_s16  }
  0x33   : > { %s2607_s10 = sshll.u32 %s3275_s8, 8  ;;  %s222_s14 = scalar_lea.sflag [#allocation4], %s3275_s8 }
  0x34   : > { %s3279_s20 = scalar_lea.vmem [#allocation3], %s2607_s10 }
  0x35   : > { %3092 = dma.done.wait (%p3194_p4), %s222_s14, 4096  }
  0x36   : > { %3094 = vsyncadd (%p3194_p4), %s222_s14, 4294963200 }
  0x37   : > { %3096 = dma.done.wait (%p43_p1), [#allocation7], 3328  }
  0x38   : > { %3098 = vsyncadd (%p43_p1), [#allocation7], 4294963968 }
  0x39   : > { %3100 = dma.done.wait (%p43_p1), [#allocation10], 256  }
  0x3a   : > { %3102 = vsyncadd (%p43_p1), [#allocation10], 4294967040  ;;  %v3294_v0 = vld [vmem:[%s3279_s20 + $0xe0] sm:$0xff]  ;;  %v3297_v1 = vld [vmem:[%s3279_s20 + $0xe8] sm:$0xff]  ;;  %s3130_s21 = smov 113   ;;  %s3131_s26 = smov 17  }
  0x3b   : > { %v3300_v2 = vld [vmem:[%s3279_s20 + $0xc0] sm:$0xff]  ;;  %v340_v3 = vadd.f32 %v3297_v1, %v3294_v0  ;;  %v374_v4 = vmul.f32 %v3294_v0, %v3294_v0  ;;  %v375_v5 = vmul.f32 %v3297_v1, %v3297_v1  ;;  %v3309_v6 = vld [vmem:[%s3279_s20 + $0xc8] sm:$0xff]  ;;  %v3314_v8 = vld [vmem:[%s3279_s20 + $0xf0] sm:$0xff]  ;;  %s3132_s9 = smov 16   ;;  %s3133_s11 = smov 112  }
  0x3c   : > { %v334_v7 = vadd.f32 %v3309_v6, %v3300_v2  ;;  %v3317_v9 = vld [vmem:[%s3279_s20 + $0xf8] sm:$0xff]  ;;  %v376_v11 = vmul.f32 %v3314_v8, %v3314_v8  ;;  %v3324_v13 = vld [vmem:[%s3279_s20 + $0xd0] sm:$0xff]  ;;  %v370_v18 = vmul.f32 %v3300_v2, %v3300_v2  ;;  %v371_v19 = vmul.f32 %v3309_v6, %v3309_v6  ;;  %v3342_v22 = vld [vmem:[%s3279_s20 + $0xa0] sm:$0xff]  ;;  %s3134_s12 = smov 111   ;;  %s3135_s13 = smov 15  }
  0x3d   : > { %341 = vadd.xlane.f32.xlu0 %v340_v3  ;;  %v420_v10 = vadd.f32 %v375_v5, %v374_v4  ;;  %v377_v12 = vmul.f32 %v3317_v9, %v3317_v9  ;;  %v3327_v14 = vld [vmem:[%s3279_s20 + $0xd8] sm:$0xff]  ;;  %v343_v15 = vadd.f32 %v3317_v9, %v3314_v8  ;;  %v372_v20 = vmul.f32 %v3324_v13, %v3324_v13  ;;  %v3345_v23 = vld [vmem:[%s3279_s20 + $0xa8] sm:$0xff]  ;;  %v3350_v27 = vld [vmem:[%s3279_s20 + $0xb0] sm:$0xff]  ;;  %s3136_s24 = smov 1   ;;  %s3137_s25 = smov 127  }
  0x3e   : > { %335 = vadd.xlane.f32.xlu2 %v334_v7  ;;  %v337_v16 = vadd.f32 %v3327_v14, %v3324_v13  ;;  %v373_v21 = vmul.f32 %v3327_v14, %v3327_v14  ;;  %v414_v24 = vadd.f32 %v371_v19, %v370_v18  ;;  %v328_v25 = vadd.f32 %v3345_v23, %v3342_v22  ;;  %v3353_v28 = vld [vmem:[%s3279_s20 + $0xb8] sm:$0xff]  ;;  %v3366_v36 = vld [vmem:[%s3279_s20 + $0x80] sm:$0xff]  ;;  %v3369_v37 = vld [vmem:[%s3279_s20 + $0x88] sm:$0xff]  ;;  %s2611_s5 = sshll.u32 %s3275_s8, 6  ;;  %s2748_s6 = sshll.u32 %s3185_s19, 6 }
  0x3f   : > { %421 = vadd.xlane.f32.xlu1 %v420_v10  ;;  %v423_v17 = vadd.f32 %v377_v12, %v376_v11  ;;  %v368_v29 = vmul.f32 %v3350_v27, %v3350_v27  ;;  %v369_v30 = vmul.f32 %v3353_v28, %v3353_v28  ;;  %v366_v31 = vmul.f32 %v3342_v22, %v3342_v22  ;;  %v3376_v40 = vld [vmem:[%s3279_s20 + $0x90] sm:$0xff]  ;;  %v3379_v41 = vld [vmem:[%s3279_s20 + $0x98] sm:$0xff]  ;;  %v3396_v49 = vld [vmem:[%s3279_s20 + $0x60] sm:$0xff]  ;;  %s4979_s29 = scalar_lea.vmem [#allocation11], %s2611_s5  ;;  %s2491_s19 = scalar_lea.hbm %s5040_s4, %s2748_s6 }
  0x40   : > { %v417_v26 = vadd.f32 %v373_v21, %v372_v20  ;;  %v367_v32 = vmul.f32 %v3345_v23, %v3345_v23  ;;  %v331_v33 = vadd.f32 %v3353_v28, %v3350_v27  ;;  %v362_v38 = vmul.f32 %v3366_v36, %v3366_v36  ;;  %v3390_v47 = vld [vmem:[%s3279_s20 + $0x70] sm:$0xff]  ;;  %v3393_v48 = vld [vmem:[%s3279_s20 + $0x78] sm:$0xff]  ;;  %v3399_v50 = vld [vmem:[%s3279_s20 + $0x68] sm:$0xff]  ;;  %s2492_s10 = sshll.u32 %s4979_s29, 4  ;;  %s2494_s14 = sshll.u32 %s2491_s19, 4  ;;  %s2493_s10 = int_to_ptr.vmem [resolvable:$true] %s2492_s10  ;;  %s2495_s14 = int_to_ptr.hbm [resolvable:$true] %s2494_s14 }
  0x41   : > { %v411_v34 = vadd.f32 %v369_v30, %v368_v29  ;;  %v363_v39 = vmul.f32 %v3369_v37, %v3369_v37  ;;  %v322_v42 = vadd.f32 %v3369_v37, %v3366_v36  ;;  %v325_v44 = vadd.f32 %v3379_v41, %v3376_v40  ;;  %v3414_v58 = vld [vmem:[%s3279_s20 + $0x40] sm:$0xff]  ;;  %v3417_v59 = vld [vmem:[%s3279_s20 + $0x48] sm:$0xff]  ;;  %v3422_v63 = vld [vmem:[%s3279_s20 + $0x50] sm:$0xff] }
  0x42   : > { %v408_v35 = vadd.f32 %v367_v32, %v366_v31  ;;  %v364_v45 = vmul.f32 %v3376_v40, %v3376_v40  ;;  %v365_v46 = vmul.f32 %v3379_v41, %v3379_v41  ;;  %v319_v52 = vadd.f32 %v3393_v48, %v3390_v47  ;;  %v3425_v3 = vld [vmem:[%s3279_s20 + $0x58] sm:$0xff]  ;;  %v3448_v20 = vld [vmem:[%s3279_s20 + $0x30] sm:$0xff] }
  0x43   : > { %v402_v43 = vadd.f32 %v363_v39, %v362_v38  ;;  %v316_v53 = vadd.f32 %v3399_v50, %v3396_v49  ;;  %v358_v54 = vmul.f32 %v3396_v49, %v3396_v49  ;;  %v359_v55 = vmul.f32 %v3399_v50, %v3399_v50  ;;  %v3451_v21 = vld [vmem:[%s3279_s20 + $0x38] sm:$0xff]  ;;  %v3462_v31 = vld [vmem:[%s3279_s20 + $0x10] sm:$0xff] }
  0x44   : > { %v405_v51 = vadd.f32 %v365_v46, %v364_v45  ;;  %v360_v56 = vmul.f32 %v3390_v47, %v3390_v47  ;;  %v361_v57 = vmul.f32 %v3393_v48, %v3393_v48  ;;  %v310_v61 = vadd.f32 %v3417_v59, %v3414_v58  ;;  %5067 = vst [vmem:[#allocation16_spill] sm:$0xff] %v3462_v31  ;;  %v3465_v32 = vld [vmem:[%s3279_s20 + $0x18] sm:$0xff] }
  0x45   : > { %344 = vadd.xlane.f32.xlu0 %v343_v15  ;;  %v396_v60 = vadd.f32 %v359_v55, %v358_v54  ;;  %v356_v4 = vmul.f32 %v3422_v63, %v3422_v63  ;;  %v357_v5 = vmul.f32 %v3425_v3, %v3425_v3  ;;  %v354_v7 = vmul.f32 %v3414_v58, %v3414_v58 }
  0x46   : > { %338 = vadd.xlane.f32.xlu2 %v337_v16  ;;  %v399_v62 = vadd.f32 %v361_v57, %v360_v56  ;;  %v355_v10 = vmul.f32 %v3417_v59, %v3417_v59  ;;  %v313_v11 = vadd.f32 %v3425_v3, %v3422_v63  ;;  %v3438_v16 = vld [vmem:[%s3279_s20 + $0x20] sm:$0xff]  ;;  %v352_v29 = vmul.f32 %v3448_v20, %v3448_v20 }
  0x47   : > { %424 = vadd.xlane.f32.xlu1 %v423_v17  ;;  %v393_v12 = vadd.f32 %v357_v5, %v356_v4  ;;  %v3441_v17 = vld [vmem:[%s3279_s20 + $0x28] sm:$0xff]  ;;  %v350_v18 = vmul.f32 %v3438_v16, %v3438_v16  ;;  %v353_v30 = vmul.f32 %v3451_v21, %v3451_v21  ;;  %5068 = vst [vmem:[#allocation17_spill] sm:$0xff] %v3465_v32 }
  0x48   : > { %v390_v15 = vadd.f32 %v355_v10, %v354_v7  ;;  %v351_v19 = vmul.f32 %v3441_v17, %v3441_v17  ;;  %v301_v38 = vadd.f32 %v3465_v32, %v3462_v31  ;;  %v349_v45 = vmul.f32 %v3465_v32, %v3465_v32 }
  0x4d   : > { %415 = vadd.xlane.f32.xlu0 %v414_v24  ;;  %v304_v24 = vadd.f32 %v3441_v17, %v3438_v16 }
  0x4e   : > { %329 = vadd.xlane.f32.xlu2 %v328_v25  ;;  %v384_v25 = vadd.f32 %v351_v19, %v350_v18 }
  0x4f   : > { %418 = vadd.xlane.f32.xlu1 %v417_v26  ;;  %v307_v26 = vadd.f32 %v3451_v21, %v3448_v20 }
  0x55   : > { %332 = vadd.xlane.f32.xlu0 %v331_v33  ;;  %v3468_v33 = vld [vmem:[%s3279_s20] sm:$0xff] }
  0x56   : > { %412 = vadd.xlane.f32.xlu2 %v411_v34  ;;  %v3471_v34 = vld [vmem:[%s3279_s20 + $0x8] sm:$0xff]  ;;  %s2480_s20 = scalar_lea.sflag [#allocation5], %s3275_s8 }
  0x57   : > { %409 = vadd.xlane.f32.xlu1 %v408_v35  ;;  %5069 = vst [vmem:[#allocation18_spill] sm:$0xff] %v3471_v34  ;;  %v387_v35 = vadd.f32 %v353_v30, %v352_v29  ;;  %v298_v39 = vadd.f32 %v3471_v34, %v3468_v33 }
  0x5d   : > { %323 = vadd.xlane.f32.xlu0 %v322_v42  ;;  %v346_v42 = vmul.f32 %v3468_v33, %v3468_v33 }
  0x5e   : > { %403 = vadd.xlane.f32.xlu2 %v402_v43  ;;  %v347_v43 = vmul.f32 %v3471_v34, %v3471_v34 }
  0x5f   : > { %326 = vadd.xlane.f32.xlu1 %v325_v44  ;;  %v348_v44 = vmul.f32 %v3462_v31, %v3462_v31 }
  0x60   : > { %v378_v46 = vadd.f32 %v347_v43, %v346_v42 }
  0x65   : > { %406 = vadd.xlane.f32.xlu0 %v405_v51  ;;  %v381_v51 = vadd.f32 %v349_v45, %v348_v44 }
  0x66   : > { %320 = vadd.xlane.f32.xlu2 %v319_v52 }
  0x67   : > { %317 = vadd.xlane.f32.xlu1 %v316_v53 }
  0x6d   : > { %397 = vadd.xlane.f32.xlu0 %v396_v60 }
  0x6e   : > { %311 = vadd.xlane.f32.xlu2 %v310_v61 }
  0x6f   : > { %400 = vadd.xlane.f32.xlu1 %v399_v62 }
  0x75   : > { %314 = vadd.xlane.f32.xlu0 %v313_v11 }
  0x76   : > { %394 = vadd.xlane.f32.xlu2 %v393_v12 }
  0x77   : > { %391 = vadd.xlane.f32.xlu1 %v390_v15 }
  0x7d   : > { %305 = vadd.xlane.f32.xlu0 %v304_v24 }
  0x7e   : > { %385 = vadd.xlane.f32.xlu2 %v384_v25 }
  0x7f   : > { %308 = vadd.xlane.f32.xlu1 %v307_v26 }
  0x85   : > { %388 = vadd.xlane.f32.xlu0 %v387_v35 }
  0x86   : > { %302 = vadd.xlane.f32.xlu2 %v301_v38 }
  0x87   : > { %299 = vadd.xlane.f32.xlu1 %v298_v39 }
  0x8d   : > { %379 = vadd.xlane.f32.xlu0 %v378_v46 }
  0x8f   : > { %382 = vadd.xlane.f32.xlu1 %v381_v51 }
  0xb0   : > { %v342_v52 = vpop.xlane.xlu0 %341 }
  0xb1   : > { %v3485_v53 = vmul.f32 0.00390625, %v342_v52  ;;  %v336_v54 = vpop.xlane.xlu2 %335 }
  0xb2   : > { %v422_v55 = vpop.xlane.xlu1 %421  ;;  %v3493_v15 = vmul.f32 0.00390625, %v336_v54 }
  0xb3   : > { %v456_v56 = vmul.f32 0.00390625, %v422_v55  ;;  %v472_v57 = vmul.f32 %v3485_v53, %v3485_v53 }
  0xb4   : > { %v470_v30 = vmul.f32 %v3493_v15, %v3493_v15 }
  0xb5   : > { %v488_v60 = vsub.f32 %v456_v56, %v472_v57 }
  0xb7   : > { %v504_v61 = vmax.f32 %v488_v60, 0.0 }
  0xb8   : > { %v345_v62 = vpop.xlane.xlu0 %344 }
  0xb9   : > { %v552_v4 = vadd.f32 1e-05, %v504_v61  ;;  %v3489_v5 = vmul.f32 0.00390625, %v345_v62  ;;  %v339_v7 = vpop.xlane.xlu2 %338 }
  0xba   : > { %v425_v10 = vpop.xlane.xlu1 %424  ;;  %v3495_v18 = vmul.f32 0.00390625, %v339_v7 }
  0xbb   : > { %2855 = vrsqrt.f32 %v552_v4  ;;  %v457_v11 = vmul.f32 0.00390625, %v425_v10  ;;  %v473_v12 = vmul.f32 %v3489_v5, %v3489_v5  ;;  %vm700_vm1 = vweird.f32 %v552_v4 }
  0xbc   : > { %v471_v35 = vmul.f32 %v3495_v18, %v3495_v18 }
  0xbd   : > { %v489_v19 = vsub.f32 %v457_v11, %v473_v12 }
  0xbf   : > { %v505_v24 = vmax.f32 %v489_v19, 0.0 }
  0xc0   : > { %v416_v25 = vpop.xlane.xlu0 %415 }
  0xc1   : > { %v2856_v26 = vpop.eup %2855  ;;  %v454_v29 = vmul.f32 0.00390625, %v416_v25  ;;  %v330_v38 = vpop.xlane.xlu2 %329  ;;  %v3501_v42 = vadd.f32 1e-05, %v505_v24 }
  0xc2   : > { %v695_v39 = vmul.f32 %v2856_v26, %v552_v4  ;;  %v419_v43 = vpop.xlane.xlu1 %418  ;;  %v3504_v55 = vmul.f32 0.00390625, %v330_v38  ;;  %vm701_vm0 = vweird.f32 %v2856_v26  ;;  %v535_v4 = vsub.f32 %v3297_v1, %v3485_v53 }
  0xc3   : > { %v486_v44 = vsub.f32 %v454_v29, %v470_v30  ;;  %v455_v45 = vmul.f32 0.00390625, %v419_v43  ;;  %2857 = vrsqrt.f32 %v3501_v42  ;;  %vm702_vm2 = vmor %vm700_vm1, %vm701_vm0  ;;  %v536_v1 = vsub.f32 %v3314_v8, %v3489_v5 }
  0xc4   : > { %v696_v46 = vmul.f32 %v2856_v26, %v695_v39  ;;  %v468_v19 = vmul.f32 %v3504_v55, %v3504_v55  ;;  %vm710_vm4 = vweird.f32 %v3501_v42 }
  0xc5   : > { %v502_v51 = vmax.f32 %v486_v44, 0.0  ;;  %v487_v52 = vsub.f32 %v455_v45, %v471_v35  ;;  %v534_v45 = vsub.f32 %v3294_v0, %v3485_v53  ;;  %v537_v53 = vsub.f32 %v3317_v9, %v3489_v5 }
  0xc6   : > { %v697_v54 = vmul.f32 0.5, %v696_v46 }
  0xc7   : > { %v3506_v56 = vadd.f32 1e-05, %v502_v51  ;;  %v503_v57 = vmax.f32 %v487_v52, 0.0 }
  0xc8   : > { %v698_v60 = vsub.f32 1.5, %v697_v54  ;;  %v333_v61 = vpop.xlane.xlu0 %332 }
  0xc9   : > { %2859 = vrsqrt.f32 %v3506_v56  ;;  %v3509_v62 = vadd.f32 1e-05, %v503_v57  ;;  %v3511_v7 = vmul.f32 0.00390625, %v333_v61  ;;  %v413_v10 = vpop.xlane.xlu2 %412  ;;  %v3513_v11 = vpop.eup %2857  ;;  %vm680_vm5 = vweird.f32 %v3506_v56 }
  0xca   : > { %v410_v12 = vpop.xlane.xlu1 %409  ;;  %v453_v24 = vmul.f32 0.00390625, %v413_v10  ;;  %v705_v25 = vmul.f32 %v3513_v11, %v3501_v42  ;;  %v699_v35 = vmul.f32 %v2856_v26, %v698_v60  ;;  %vm711_vm3 = vweird.f32 %v3513_v11 }
  0xcb   : > { %2861 = vrsqrt.f32 %v3509_v62  ;;  %v452_v29 = vmul.f32 0.00390625, %v410_v12  ;;  %v469_v30 = vmul.f32 %v3511_v7, %v3511_v7  ;;  %vm712_vm6 = vmor %vm710_vm4, %vm711_vm3  ;;  %vm690_vm7 = vweird.f32 %v3509_v62 }
  0xcc   : > { %v706_v38 = vmul.f32 %v3513_v11, %v705_v25  ;;  %v703_v60 = vsel %vm702_vm2, %v2856_v26, %v699_v35 }
  0xcd   : > { %v484_v39 = vsub.f32 %v452_v29, %v468_v19  ;;  %v485_v43 = vsub.f32 %v453_v24, %v469_v30 }
  0xce   : > { %v707_v46 = vmul.f32 0.5, %v706_v38  ;;  %v3550_v38 = vmul.f32 %v703_v60, %v534_v45 }
  0xcf   : > { %v3523_v44 = vpop.eup %2859  ;;  %v500_v52 = vmax.f32 %v484_v39, 0.0  ;;  %v501_v54 = vmax.f32 %v485_v43, 0.0 }
  0xd0   : > { %v675_v51 = vmul.f32 %v3523_v44, %v3506_v56  ;;  %v324_v57 = vpop.xlane.xlu0 %323  ;;  %v708_v35 = vsub.f32 1.5, %v707_v46  ;;  %vm681_vm8 = vweird.f32 %v3523_v44 }
  0xd1   : > { %v3529_v61 = vpop.eup %2861  ;;  %v3537_v12 = vmul.f32 0.00390625, %v324_v57  ;;  %v404_v19 = vpop.xlane.xlu2 %403  ;;  %v3542_v26 = vadd.f32 1e-05, %v500_v52  ;;  %v3544_v29 = vadd.f32 1e-05, %v501_v54  ;;  %v3558_v54 = vmul.f32 %v703_v60, %v535_v4  ;;  %vm682_vm9 = vmor %vm680_vm5, %vm681_vm8 }
  0xd2   : > { %v676_v24 = vmul.f32 %v3523_v44, %v675_v51  ;;  %v685_v25 = vmul.f32 %v3529_v61, %v3509_v62  ;;  %v327_v30 = vpop.xlane.xlu1 %326  ;;  %v450_v51 = vmul.f32 0.00390625, %v404_v19  ;;  %v709_v60 = vmul.f32 %v3513_v11, %v708_v35 }
  0xd3   : > { %2863 = vrsqrt.f32 %v3542_v26  ;;  %v3555_v52 = vmul.f32 0.00390625, %v327_v30  ;;  %v466_v5 = vmul.f32 %v3537_v12, %v3537_v12  ;;  %v775_v57 = vmul.f32 0.2, %v3558_v54 }
  0xd4   : > { %v677_v39 = vmul.f32 0.5, %v676_v24  ;;  %v686_v43 = vmul.f32 %v3529_v61, %v685_v25  ;;  %2865 = vrsqrt.f32 %v3544_v29  ;;  %v774_v24 = vmul.f32 0.2, %v3550_v38 }
  0xd5   : > { %v482_v4 = vsub.f32 %v450_v51, %v466_v5  ;;  %v467_v25 = vmul.f32 %v3555_v52, %v3555_v52  ;;  %v713_v46 = vsel %vm712_vm6, %v3513_v11, %v709_v60  ;;  %vm691_vm10 = vweird.f32 %v3529_v61 }
  0xd6   : > { %v678_v45 = vsub.f32 1.5, %v677_v39  ;;  %v687_v42 = vmul.f32 0.5, %v686_v43  ;;  %v744_v0 = vmul.f32 %v713_v46, %v536_v1  ;;  %v806_v1 = vmax.f32 %v3550_v38, %v774_v24  ;;  %vm692_vm11 = vmor %vm690_vm7, %vm691_vm10 }
  0xd7   : > { %v498_v5 = vmax.f32 %v482_v4, 0.0  ;;  %vm660_vm12 = vweird.f32 %v3542_v26  ;;  %vm670_vm13 = vweird.f32 %v3544_v29 }
  0xd8   : > { %v407_v19 = vpop.xlane.xlu0 %406  ;;  %v679_v32 = vmul.f32 %v3523_v44, %v678_v45  ;;  %v688_v11 = vsub.f32 1.5, %v687_v42  ;;  %v776_v42 = vmul.f32 0.2, %v744_v0  ;;  %v5071_v45 = vsub.f32 %v3324_v13, %v3495_v18 }
  0xd9   : > { %v451_v30 = vmul.f32 0.00390625, %v407_v19  ;;  %v321_v39 = vpop.xlane.xlu2 %320  ;;  %v3579_v35 = vpop.eup %2863  ;;  %v745_v19 = vmul.f32 %v713_v46, %v537_v53  ;;  %v3593_v31 = vadd.f32 1e-05, %v498_v5  ;;  %v807_v53 = vmax.f32 %v3558_v54, %v775_v57 }
  0xda   : > { %v318_v9 = vpop.xlane.xlu1 %317  ;;  %v3585_v8 = vpop.eup %2865  ;;  %v655_v60 = vmul.f32 %v3579_v35, %v3542_v26  ;;  %v3595_v51 = vmul.f32 0.00390625, %v321_v39  ;;  %v808_v57 = vmax.f32 %v744_v0, %v776_v42  ;;  %v5073_v13 = vsub.f32 %v3327_v14, %v3495_v18 }
  0xdb   : > { %v483_v10 = vsub.f32 %v451_v30, %v467_v25  ;;  %v665_v43 = vmul.f32 %v3585_v8, %v3544_v29  ;;  %2867 = vrsqrt.f32 %v3593_v31  ;;  %v3602_v46 = vmul.f32 0.00390625, %v318_v9 }
  0xdc   : > { %v683_v30 = vsel %vm682_vm9, %v3523_v44, %v679_v32  ;;  %v656_v38 = vmul.f32 %v3579_v35, %v655_v60  ;;  %v689_v9 = vmul.f32 %v3529_v61, %v688_v11  ;;  %v465_v5 = vmul.f32 %v3595_v51, %v3595_v51 }
  0xdd   : > { %v499_v4 = vmax.f32 %v483_v10, 0.0  ;;  %v777_v10 = vmul.f32 0.2, %v745_v19  ;;  %v666_v54 = vmul.f32 %v3585_v8, %v665_v43  ;;  %v840_v60 = vpack.c.bf16 %v808_v57, %v806_v1 }
  0xde   : > { %v464_v0 = vmul.f32 %v3602_v46, %v3602_v46  ;;  %v693_v42 = vsel %vm692_vm11, %v3529_v61, %v689_v9  ;;  %v657_v1 = vmul.f32 0.5, %v656_v38  ;;  %v525_v14 = vsub.f32 %v3379_v41, %v3555_v52 }
  0xdf   : > { %v3606_v25 = vadd.f32 1e-05, %v499_v4  ;;  %v809_v56 = vmax.f32 %v745_v19, %v777_v10  ;;  %v5070_v10 = vsub.f32 %v3300_v2, %v3493_v15  ;;  %v667_v57 = vmul.f32 0.5, %v666_v54  ;;  %890 = vmatpush.bf16.msra.mxu0 %v840_v60 }
  0xe0   : > { %v398_v24 = vpop.xlane.xlu0 %397  ;;  %v740_v34 = vmul.f32 %v693_v42, %v5071_v45  ;;  %v5072_v2 = vsub.f32 %v3309_v6, %v3493_v15  ;;  %v741_v45 = vmul.f32 %v693_v42, %v5073_v13  ;;  %vm661_vm14 = vweird.f32 %v3579_v35 }
  0xe1   : > { %2869 = vrsqrt.f32 %v3606_v25  ;;  %v312_v32 = vpop.xlane.xlu2 %311  ;;  %v448_v4 = vmul.f32 0.00390625, %v398_v24  ;;  %v841_v11 = vpack.c.bf16 %v809_v56, %v807_v53  ;;  %v738_v39 = vmul.f32 %v683_v30, %v5070_v10  ;;  %v3630_v44 = vpop.eup %2867  ;;  %vm662_vm15 = vmor %vm660_vm12, %vm661_vm14 }
  0xe2   : > { %v401_v43 = vpop.xlane.xlu1 %400  ;;  %v635_v62 = vmul.f32 %v3630_v44, %v3593_v31  ;;  %v739_v9 = vmul.f32 %v683_v30, %v5072_v2  ;;  %v3641_v54 = vmul.f32 0.00390625, %v312_v32  ;;  %v772_v56 = vmul.f32 0.2, %v740_v34 }
  0xe3   : > { %v449_v19 = vmul.f32 0.00390625, %v401_v43  ;;  %v480_v24 = vsub.f32 %v448_v4, %v464_v0  ;;  %939 = vmatpush.bf16.msra.mxu1 %v841_v11  ;;  %v770_v61 = vmul.f32 0.2, %v738_v39  ;;  %v773_v43 = vmul.f32 0.2, %v741_v45 }
  0xe4   : > { %v771_v6 = vmul.f32 0.2, %v739_v9  ;;  %v804_v32 = vmax.f32 %v740_v34, %v772_v56  ;;  %v668_v10 = vsub.f32 1.5, %v667_v57  ;;  %v521_v57 = vsub.f32 %v3393_v48, %v3595_v51 }
  0xe5   : > { %v481_v53 = vsub.f32 %v449_v19, %v465_v5  ;;  %v496_v38 = vmax.f32 %v480_v24, 0.0  ;;  %v636_v5 = vmul.f32 %v3630_v44, %v635_v62  ;;  %v802_v0 = vmax.f32 %v738_v39, %v770_v61 }
  0xe6   : > { %v658_v19 = vsub.f32 1.5, %v657_v1  ;;  %v462_v62 = vmul.f32 %v3641_v54, %v3641_v54  ;;  %v803_v1 = vmax.f32 %v739_v9, %v771_v6  ;;  %v805_v61 = vmax.f32 %v741_v45, %v773_v43 }
  0xe7   : > { %v3646_v60 = vpop.eup %2869  ;;  %v497_v4 = vmax.f32 %v481_v53, 0.0  ;;  %v3652_v30 = vadd.f32 1e-05, %v496_v38  ;;  %v838_v39 = vpack.c.bf16 %v804_v32, %v802_v0  ;;  %v637_v2 = vmul.f32 0.5, %v636_v5 }
  0xe8   : > { %v645_v15 = vmul.f32 %v3646_v60, %v3606_v25  ;;  %v315_v11 = vpop.xlane.xlu0 %314  ;;  %v520_v38 = vsub.f32 %v3390_v47, %v3595_v51  ;;  %v839_v13 = vpack.c.bf16 %v805_v61, %v803_v1  ;;  %v518_v9 = vsub.f32 %v3396_v49, %v3602_v46 }
  0xe9   : > { %v3656_v18 = vadd.f32 1e-05, %v497_v4  ;;  %v3658_v42 = vmul.f32 0.00390625, %v315_v11  ;;  %2871 = vrsqrt.f32 %v3652_v30  ;;  %v395_v53 = vpop.xlane.xlu2 %394  ;;  %891 = vmatpush.bf16.msra.mxu0 %v838_v39  ;;  %v669_v5 = vmul.f32 %v3585_v8, %v668_v10 }
  0xea   : > { %v392_v24 = vpop.xlane.xlu1 %391  ;;  %v646_v34 = vmul.f32 %v3646_v60, %v645_v15  ;;  %v447_v0 = vmul.f32 0.00390625, %v395_v53  ;;  %v659_v15 = vmul.f32 %v3579_v35, %v658_v19  ;;  %v519_v32 = vsub.f32 %v3399_v50, %v3602_v46  ;;  %940 = vmatpush.bf16.msra.mxu1 %v839_v13 }
  0xeb   : > { %2873 = vrsqrt.f32 %v3656_v18  ;;  %v446_v56 = vmul.f32 0.00390625, %v392_v24  ;;  %v463_v4 = vmul.f32 %v3658_v42, %v3658_v42  ;;  %vm671_vm0 = vweird.f32 %v3585_v8 }
  0xec   : > { %v647_v6 = vmul.f32 0.5, %v646_v34  ;;  %v638_v19 = vsub.f32 1.5, %v637_v2  ;;  %vm640_vm1 = vweird.f32 %v3593_v31  ;;  %v663_v24 = vsel %vm662_vm15, %v3579_v35, %v659_v15  ;;  %vm672_vm2 = vmor %vm670_vm13, %vm671_vm0 }
  0xed   : > { %v478_v45 = vsub.f32 %v446_v56, %v462_v62  ;;  %v479_v43 = vsub.f32 %v447_v0, %v463_v4  ;;  %v673_v34 = vsel %vm672_vm2, %v3585_v8, %v669_v5  ;;  %v5074_v1 = vsub.f32 %v3342_v22, %v3504_v55 }
  0xee   : > { %v5075_v29 = vsub.f32 %v3350_v27, %v3511_v7  ;;  %v5076_v13 = vsub.f32 %v3345_v23, %v3504_v55  ;;  %v648_v15 = vsub.f32 1.5, %v647_v6  ;;  %v5077_v22 = vsub.f32 %v3353_v28, %v3511_v7 }
  0xef   : > { %v3681_v11 = vpop.eup %2871  ;;  %v494_v39 = vmax.f32 %v478_v45, 0.0  ;;  %v495_v53 = vmax.f32 %v479_v43, 0.0  ;;  %v734_v61 = vmul.f32 %v663_v24, %v5074_v1  ;;  %vm650_vm3 = vweird.f32 %v3606_v25 }
  0xf0   : > { %v306_v10 = vpop.xlane.xlu0 %305  ;;  %v615_v26 = vmul.f32 %v3681_v11, %v3652_v30  ;;  %v736_v56 = vmul.f32 %v673_v34, %v5075_v29  ;;  %v735_v4 = vmul.f32 %v663_v24, %v5076_v13  ;;  %v737_v5 = vmul.f32 %v673_v34, %v5077_v22 }
  0xf1   : > { %v3687_v62 = vpop.eup %2873  ;;  %v3697_v35 = vadd.f32 1e-05, %v494_v39  ;;  %v3705_v8 = vadd.f32 1e-05, %v495_v53  ;;  %v766_v45 = vmul.f32 0.2, %v734_v61  ;;  %v639_v27 = vmul.f32 %v3630_v44, %v638_v19  ;;  %v386_v6 = vpop.xlane.xlu2 %385 }
  0xf2   : > { %v625_v2 = vmul.f32 %v3687_v62, %v3656_v18  ;;  %v309_v0 = vpop.xlane.xlu1 %308  ;;  %v768_v43 = vmul.f32 0.2, %v736_v56  ;;  %v616_v39 = vmul.f32 %v3681_v11, %v615_v26  ;;  %v767_v53 = vmul.f32 0.2, %v735_v4 }
  0xf3   : > { %2875 = vrsqrt.f32 %v3697_v35  ;;  %v798_v55 = vmax.f32 %v734_v61, %v766_v45  ;;  %v769_v1 = vmul.f32 0.2, %v737_v5  ;;  %vm641_vm4 = vweird.f32 %v3630_v44 }
  0xf4   : > { %v626_v23 = vmul.f32 %v3687_v62, %v625_v2  ;;  %2877 = vrsqrt.f32 %v3705_v8  ;;  %v800_v24 = vmax.f32 %v736_v56, %v768_v43  ;;  %v3717_v28 = vmul.f32 0.00390625, %v306_v10  ;;  %vm642_vm6 = vmor %vm640_vm1, %vm641_vm4 }
  0xf5   : > { %v3719_v7 = vmul.f32 0.00390625, %v309_v0  ;;  %v649_v34 = vmul.f32 %v3646_v60, %v648_v15  ;;  %vm651_vm5 = vweird.f32 %v3646_v60  ;;  %v799_v26 = vmax.f32 %v735_v4, %v767_v53 }
  0xf6   : > { %v836_v19 = vpack.c.bf16 %v800_v24, %v798_v55  ;;  %v801_v2 = vmax.f32 %v737_v5, %v769_v1  ;;  %v444_v29 = vmul.f32 0.00390625, %v386_v6  ;;  %v3723_v61 = vmul.f32 0.5, %v616_v39  ;;  %vm652_vm7 = vmor %vm650_vm3, %vm651_vm5 }
  0xf7   : > { %v3725_v56 = vmul.f32 0.5, %v626_v23  ;;  %v514_v45 = vsub.f32 %v3414_v58, %v3641_v54  ;;  %v515_v10 = vsub.f32 %v3417_v59, %v3641_v54  ;;  %v460_v15 = vmul.f32 %v3717_v28, %v3717_v28 }
  0xf8   : > { %v389_v13 = vpop.xlane.xlu0 %388  ;;  %892 = vmatpush.bf16.msra.mxu0 %v836_v19  ;;  %v837_v4 = vpack.c.bf16 %v801_v2, %v799_v26  ;;  %v461_v22 = vmul.f32 %v3719_v7, %v3719_v7  ;;  %v643_v55 = vsel %vm642_vm6, %v3630_v44, %v639_v27  ;;  %v653_v6 = vsel %vm652_vm7, %v3646_v60, %v649_v34 }
  0xf9   : > { %v3733_v0 = vpop.eup %2875  ;;  %v445_v5 = vmul.f32 0.00390625, %v389_v13  ;;  %v476_v53 = vsub.f32 %v444_v29, %v460_v15  ;;  %v5078_v25 = vsub.f32 %v3366_v36, %v3537_v12  ;;  %v618_v26 = vsub.f32 1.5, %v3723_v61 }
  0xfa   : > { %v300_v43 = vpop.xlane.xlu1 %299  ;;  %v3743_v39 = vpop.eup %2877  ;;  %v595_v23 = vmul.f32 %v3733_v0, %v3697_v35  ;;  %941 = vmatpush.bf16.msra.mxu1 %v837_v4  ;;  %vm620_vm8 = vweird.f32 %v3652_v30  ;;  %v628_v2 = vsub.f32 1.5, %v3725_v56  ;;  %v5079_v60 = vsub.f32 %v3376_v40, %v3555_v52 }
  0xfb   : > { %v605_v24 = vmul.f32 %v3743_v39, %v3705_v8  ;;  %v477_v1 = vsub.f32 %v445_v5, %v461_v22  ;;  %v730_v19 = vmul.f32 %v643_v55, %v5078_v25  ;;  %v492_v29 = vmax.f32 %v476_v53, 0.0 }
  0xfc   : > { %v596_v44 = vmul.f32 %v3733_v0, %v595_v23  ;;  %v732_v27 = vmul.f32 %v653_v6, %v5079_v60  ;;  %vm630_vm9 = vweird.f32 %v3656_v18  ;;  %v5080_v61 = vsub.f32 %v3369_v37, %v3537_v12  ;;  %v303_v60 = vpop.xlane.xlu2 %302 }
  0xfd   : > { %v606_v34 = vmul.f32 %v3743_v39, %v605_v24  ;;  %v493_v13 = vmax.f32 %v477_v1, 0.0  ;;  %v762_v4 = vmul.f32 0.2, %v730_v19  ;;  %v733_v56 = vmul.f32 %v653_v6, %v525_v14 }
  0xfe   : > { %v597_v36 = vmul.f32 0.5, %v596_v44  ;;  %v764_v15 = vmul.f32 0.2, %v732_v27  ;;  %v731_v22 = vmul.f32 %v643_v55, %v5080_v61  ;;  %v3771_v40 = vadd.f32 1e-05, %v492_v29 }
  0xff   : > { %v607_v5 = vmul.f32 0.5, %v606_v34  ;;  %v3773_v23 = vadd.f32 1e-05, %v493_v13  ;;  %v3775_v24 = vmul.f32 0.00390625, %v300_v43  ;;  %v794_v53 = vmax.f32 %v730_v19, %v762_v4 }
 0x100   : > { %v796_v1 = vmax.f32 %v732_v27, %v764_v15  ;;  %v763_v25 = vmul.f32 0.2, %v731_v22  ;;  %v765_v44 = vmul.f32 0.2, %v733_v56  ;;  %v380_v31 = vpop.xlane.xlu0 %379  ;;  %v517_v37 = vsub.f32 %v3425_v3, %v3658_v42 }
 0x101   : > { %v598_v12 = vsub.f32 1.5, %v597_v36  ;;  %v608_v55 = vsub.f32 1.5, %v607_v5  ;;  %2879 = vrsqrt.f32 %v3771_v40  ;;  %v3781_v6 = vmul.f32 0.00390625, %v303_v60 }
 0x102   : > { %v383_v41 = vpop.xlane.xlu1 %382  ;;  %2881 = vrsqrt.f32 %v3773_v23  ;;  %v834_v52 = vpack.c.bf16 %v796_v1, %v794_v53  ;;  %v795_v14 = vmax.f32 %v731_v22, %v763_v25  ;;  %v797_v43 = vmax.f32 %v733_v56, %v765_v44 }
 0x103   : > { %v442_v19 = vmul.f32 0.00390625, %v380_v31  ;;  %v458_v27 = vmul.f32 %v3775_v24, %v3775_v24  ;;  %v443_v34 = vmul.f32 0.00390625, %v383_v41  ;;  %vm600_vm10 = vweird.f32 %v3697_v35 }
 0x104   : > { %893 = vmatpush.bf16.msra.mxu0 %v834_v52  ;;  %v835_v29 = vpack.c.bf16 %v797_v43, %v795_v14  ;;  %v619_v13 = vmul.f32 %v3681_v11, %v618_v26  ;;  %vm621_vm11 = vweird.f32 %v3681_v11  ;;  %v629_v4 = vmul.f32 %v3687_v62, %v628_v2 }
 0x105   : > { %vm610_vm12 = vweird.f32 %v3705_v8  ;;  %v510_v36 = vsub.f32 %v3438_v16, %v3717_v28  ;;  %v511_v31 = vsub.f32 %v3441_v17, %v3717_v28  ;;  %v474_v15 = vsub.f32 %v442_v19, %v458_v27  ;;  %vm622_vm13 = vmor %vm620_vm8, %vm621_vm11  ;;  %v5082_v17 = vld [vmem:[#allocation18_spill] sm:$0xff] }
 0x106   : > { %v459_v61 = vmul.f32 %v3781_v6, %v3781_v6  ;;  %v512_v26 = vsub.f32 %v3448_v20, %v3719_v7  ;;  %942 = vmatpush.bf16.msra.mxu1 %v835_v29  ;;  %v623_v2 = vsel %vm622_vm13, %v3681_v11, %v619_v13  ;;  %vm631_vm14 = vweird.f32 %v3687_v62 }
 0x107   : > { %v599_v22 = vmul.f32 %v3733_v0, %v598_v12  ;;  %v2880_v56 = vpop.eup %2879  ;;  %v490_v5 = vmax.f32 %v474_v15, 0.0  ;;  %vm632_vm15 = vmor %vm630_vm9, %vm631_vm14  ;;  %v726_v30 = vmul.f32 %v623_v2, %v518_v9  ;;  %v727_v1 = vmul.f32 %v623_v2, %v519_v32 }
 0x108   : > { %v475_v53 = vsub.f32 %v443_v34, %v459_v61  ;;  %v3811_v25 = vpop.eup %2881  ;;  %v575_v11 = vmul.f32 %v2880_v56, %v3771_v40  ;;  %v633_v44 = vsel %vm632_vm15, %v3687_v62, %v629_v4  ;;  %vm601_vm0 = vweird.f32 %v3733_v0 }
 0x109   : > { %v609_v60 = vmul.f32 %v3743_v39, %v608_v55  ;;  %vm580_vm1 = vweird.f32 %v3771_v40  ;;  %v585_v49 = vmul.f32 %v3811_v25, %v3773_v23  ;;  %v3820_v18 = vadd.f32 1e-05, %v490_v5  ;;  %vm602_vm4 = vmor %vm600_vm10, %vm601_vm0 }
 0x10a   : > { %v491_v9 = vmax.f32 %v475_v53, 0.0  ;;  %v728_v50 = vmul.f32 %v633_v44, %v520_v38  ;;  %v576_v46 = vmul.f32 %v2880_v56, %v575_v11  ;;  %v758_v32 = vmul.f32 0.2, %v726_v30 }
 0x10b   : > { %v729_v62 = vmul.f32 %v633_v44, %v521_v57  ;;  %v759_v12 = vmul.f32 0.2, %v727_v1  ;;  %v586_v55 = vmul.f32 %v3811_v25, %v585_v49  ;;  %2883 = vrsqrt.f32 %v3820_v18 }
 0x10c   : > { %v3830_v41 = vadd.f32 1e-05, %v491_v9  ;;  %vm611_vm2 = vweird.f32 %v3743_v39  ;;  %v577_v52 = vmul.f32 0.5, %v576_v46  ;;  %vm590_vm3 = vweird.f32 %v3773_v23 }
 0x10d   : > { %v760_v47 = vmul.f32 0.2, %v728_v50  ;;  %v761_v38 = vmul.f32 0.2, %v729_v62  ;;  %v587_v14 = vmul.f32 0.5, %v586_v55  ;;  %v790_v43 = vmax.f32 %v726_v30, %v758_v32  ;;  %vm612_vm5 = vmor %vm610_vm12, %vm611_vm2 }
 0x10e   : > { %2885 = vrsqrt.f32 %v3830_v41  ;;  %v791_v48 = vmax.f32 %v727_v1, %v759_v12  ;;  %v578_v51 = vsub.f32 1.5, %v577_v52  ;;  %v603_v27 = vsel %vm602_vm4, %v3733_v0, %v599_v22 }
 0x10f   : > { %v792_v57 = vmax.f32 %v728_v50, %v760_v47  ;;  %v793_v19 = vmax.f32 %v729_v62, %v761_v38  ;;  %v588_v34 = vsub.f32 1.5, %v587_v14  ;;  %v613_v29 = vsel %vm612_vm5, %v3743_v39, %v609_v60  ;;  %v5084_v38 = vld [vmem:[#allocation17_spill] sm:$0xff] }
 0x110   : > { %v722_v13 = vmul.f32 %v603_v27, %v514_v45  ;;  %v723_v35 = vmul.f32 %v603_v27, %v515_v10  ;;  %v5081_v61 = vsub.f32 %v3422_v63, %v3658_v42  ;;  %v725_v8 = vmul.f32 %v613_v29, %v517_v37 }
 0x111   : > { %v832_v4 = vpack.c.bf16 %v792_v57, %v790_v43  ;;  %v833_v15 = vpack.c.bf16 %v793_v19, %v791_v48  ;;  %v2884_v2 = vpop.eup %2883  ;;  %v579_v5 = vmul.f32 %v2880_v56, %v578_v51  ;;  %vm581_vm6 = vweird.f32 %v2880_v56 }
 0x112   : > { %v724_v0 = vmul.f32 %v613_v29, %v5081_v61  ;;  %v754_v39 = vmul.f32 0.2, %v722_v13  ;;  %v755_v22 = vmul.f32 0.2, %v723_v35  ;;  %v555_v58 = vmul.f32 %v2884_v2, %v3820_v18  ;;  %vm582_vm7 = vmor %vm580_vm1, %vm581_vm6 }
 0x113   : > { %894 = vmatpush.bf16.msra.mxu0 %v832_v4  ;;  %943 = vmatpush.bf16.msra.mxu1 %v833_v15  ;;  %v757_v54 = vmul.f32 0.2, %v725_v8  ;;  %v589_v63 = vmul.f32 %v3811_v25, %v588_v34  ;;  %v583_v42 = vsel %vm582_vm7, %v2880_v56, %v579_v5  ;;  %vm591_vm8 = vweird.f32 %v3811_v25  ;;  %v2725_v5 = vld [vmem:[#allocation6 + $0x18] sm:$0xff] }
 0x114   : > { %v756_v59 = vmul.f32 0.2, %v724_v0  ;;  %v2886_v45 = vpop.eup %2885  ;;  %v786_v10 = vmax.f32 %v722_v13, %v754_v39  ;;  %v787_v3 = vmax.f32 %v723_v35, %v755_v22  ;;  %v556_v37 = vmul.f32 %v2884_v2, %v555_v58  ;;  %vm592_vm9 = vmor %vm590_vm3, %vm591_vm8  ;;  %v2723_v39 = vld [vmem:[#allocation6 + $0x8] sm:$0xff]  ;;  %v2724_v22 = vld [vmem:[#allocation6 + $0x10] sm:$0xff] }
 0x115   : > { %v565_v53 = vmul.f32 %v2886_v45, %v3830_v41  ;;  %v789_v1 = vmax.f32 %v725_v8, %v757_v54  ;;  %v513_v40 = vsub.f32 %v3451_v21, %v3719_v7  ;;  %v593_v11 = vsel %vm592_vm9, %v3811_v25, %v589_v63  ;;  %v2726_v58 = vld [vmem:[#allocation6 + $0x20] sm:$0xff]  ;;  %v2728_v54 = vld [vmem:[#allocation6 + $0x30] sm:$0xff]  ;;  %v2729_v63 = vld [vmem:[#allocation6 + $0x38] sm:$0xff] }
 0x116   : > { %v788_v30 = vmax.f32 %v724_v0, %v756_v59  ;;  %v718_v44 = vmul.f32 %v583_v42, %v510_v36  ;;  %v719_v56 = vmul.f32 %v583_v42, %v511_v31  ;;  %v557_v60 = vmul.f32 0.5, %v556_v37  ;;  %v5083_v31 = vld [vmem:[#allocation16_spill] sm:$0xff]  ;;  %v2727_v59 = vld [vmem:[#allocation6 + $0x28] sm:$0xff] }
 0x117   : > { %v566_v49 = vmul.f32 %v2886_v45, %v565_v53  ;;  %v831_v50 = vpack.c.bf16 %v789_v1, %v787_v3  ;;  %v720_v23 = vmul.f32 %v593_v11, %v512_v26  ;;  %v721_v21 = vmul.f32 %v593_v11, %v513_v40 }
 0x118   : > { %v830_v9 = vpack.c.bf16 %v788_v30, %v786_v10  ;;  %v750_v46 = vmul.f32 0.2, %v718_v44  ;;  %v751_v32 = vmul.f32 0.2, %v719_v56  ;;  %v506_v25 = vsub.f32 %v3468_v33, %v3775_v24 }
 0x119   : > { %v558_v16 = vsub.f32 1.5, %v557_v60  ;;  %v567_v36 = vmul.f32 0.5, %v566_v49  ;;  %944 = vmatpush.bf16.msra.mxu1 %v831_v50  ;;  %vm561_vm10 = vweird.f32 %v2884_v2  ;;  %v507_v28 = vsub.f32 %v5082_v17, %v3775_v24 }
 0x11a   : > { %895 = vmatpush.bf16.msra.mxu0 %v830_v9  ;;  %v508_v62 = vsub.f32 %v5083_v31, %v3781_v6  ;;  %v752_v12 = vmul.f32 0.2, %v720_v23  ;;  %v753_v20 = vmul.f32 0.2, %v721_v21  ;;  %vm560_vm11 = vweird.f32 %v3820_v18 }
 0x11b   : > { %v568_v7 = vsub.f32 1.5, %v567_v36  ;;  %v559_v26 = vmul.f32 %v2884_v2, %v558_v16  ;;  %vm571_vm12 = vweird.f32 %v2886_v45  ;;  %v782_v55 = vmax.f32 %v718_v44, %v750_v46  ;;  %vm562_vm13 = vmor %vm560_vm11, %vm561_vm10 }
 0x11c   : > { %v784_v33 = vmax.f32 %v720_v23, %v752_v12  ;;  %v783_v52 = vmax.f32 %v719_v56, %v751_v32  ;;  %v785_v47 = vmax.f32 %v721_v21, %v753_v20  ;;  %v509_v14 = vsub.f32 %v5084_v38, %v3781_v6 }
 0x11d   : > { %vm570_vm14 = vweird.f32 %v3830_v41  ;;  %v563_v24 = vsel %vm562_vm13, %v2884_v2, %v559_v26  ;;  %v569_v43 = vmul.f32 %v2886_v45, %v568_v7  ;;  %v2722_v2 = vld [vmem:[#allocation6] sm:$0xff] }
 0x11e   : > { %v828_v48 = vpack.c.bf16 %v784_v33, %v782_v55  ;;  %v829_v51 = vpack.c.bf16 %v785_v47, %v783_v52  ;;  %vm572_vm15 = vmor %vm570_vm14, %vm571_vm12  ;;  %v714_v57 = vmul.f32 %v563_v24, %v506_v25  ;;  %v715_v18 = vmul.f32 %v563_v24, %v507_v28 }
 0x11f   : > { %v573_v19 = vsel %vm572_vm15, %v2886_v45, %v569_v43 }
 0x120   : > { %896 = vmatpush.bf16.msra.mxu0 %v828_v48  ;;  %945 = vmatpush.bf16.msra.mxu1 %v829_v51  ;;  %v716_v27 = vmul.f32 %v573_v19, %v508_v62  ;;  %v746_v34 = vmul.f32 0.2, %v714_v57  ;;  %v717_v29 = vmul.f32 %v573_v19, %v509_v14  ;;  %v747_v13 = vmul.f32 0.2, %v715_v18 }
 0x122   : > { %v748_v35 = vmul.f32 0.2, %v716_v27  ;;  %v749_v4 = vmul.f32 0.2, %v717_v29  ;;  %v778_v15 = vmax.f32 %v714_v57, %v746_v34  ;;  %v779_v61 = vmax.f32 %v715_v18, %v747_v13 }
 0x124   : > { %v780_v6 = vmax.f32 %v716_v27, %v748_v35  ;;  %v781_v41 = vmax.f32 %v717_v29, %v749_v4 }
 0x126   : > { %v826_v0 = vpack.c.bf16 %v780_v6, %v778_v15  ;;  %v827_v8 = vpack.c.bf16 %v781_v41, %v779_v61 }
 0x128   : > { %897 = vmatpush.bf16.msra.mxu0 %v826_v0  ;;  %946 = vmatpush.bf16.msra.mxu1 %v827_v8 }
 0x12b   : > { %898 = vmatmul.bf16.vlgmr.msra.gmra.mxu0 %v2722_v2  ;;  %947 = vmatmul.bf16.vlgmr.msra.gmra.mxu1 %v2722_v2 }
 0x13b   : > { %903 = vmatmul.bf16.gmra.mxu0 %v2723_v39  ;;  %952 = vmatmul.bf16.gmra.mxu1 %v2723_v39 }
 0x14b   : > { %908 = vmatmul.bf16.gmra.mxu0 %v2724_v22  ;;  %957 = vmatmul.bf16.gmra.mxu1 %v2724_v22 }
 0x15b   : > { %913 = vmatmul.bf16.gmra.mxu0 %v2725_v5  ;;  %962 = vmatmul.bf16.gmra.mxu1 %v2725_v5 }
 0x16b   : > { %918 = vmatmul.bf16.gmra.mxu0 %v2726_v58  ;;  %967 = vmatmul.bf16.gmra.mxu1 %v2726_v58 }
 0x17b   : > { %923 = vmatmul.bf16.gmra.mxu0 %v2727_v59  ;;  %972 = vmatmul.bf16.gmra.mxu1 %v2727_v59 }
 0x18b   : > { %928 = vmatmul.bf16.gmra.mxu0 %v2728_v54  ;;  %977 = vmatmul.bf16.gmra.mxu1 %v2728_v54 }
 0x19b   : > { %933 = vmatmul.bf16.gmra.mxu0 %v2729_v63  ;;  %982 = vmatmul.bf16.gmra.mxu1 %v2729_v63 }
 0x1a8   : > { %v3885_v45 = vpop.f32.mrf.mxu0  ;;  %v3887_v10 = vpop.f32.mrf.mxu1 }
 0x1a9   : > { %5085 = vst [vmem:[#allocation18_spill] sm:$0xff] %v3885_v45 }
 0x1aa   : > { %5086 = vst [vmem:[#allocation16_spill] sm:$0xff] %v3887_v10 }
 0x1b0   : > { %v3889_v3 = vpop.f32.mrf.mxu0  ;;  %v3891_v42 = vpop.f32.mrf.mxu1 }
 0x1b1   : > { %5087 = vst [vmem:[#allocation17_spill] sm:$0xff] %v3889_v3 }
 0x1b2   : > { %5088 = vst [vmem:[#allocation19_spill] sm:$0xff] %v3891_v42 }
 0x1b8   : > { %v3893_v37 = vpop.f32.mrf.mxu0  ;;  %v3895_v53 = vpop.f32.mrf.mxu1 }
 0x1b9   : > { %5089 = vst [vmem:[#allocation20_spill] sm:$0xff] %v3893_v37 }
 0x1ba   : > { %5090 = vst [vmem:[#allocation21_spill] sm:$0xff] %v3895_v53 }
 0x1c0   : > { %v3897_v30 = vpop.f32.mrf.mxu0  ;;  %v3899_v1 = vpop.f32.mrf.mxu1 }
 0x1c1   : > { %5091 = vst [vmem:[#allocation22_spill] sm:$0xff] %v3897_v30 }
 0x1c2   : > { %5092 = vst [vmem:[#allocation23_spill] sm:$0xff] %v3899_v1 }
 0x1c8   : > { %v3901_v40 = vpop.f32.mrf.mxu0  ;;  %v3903_v11 = vpop.f32.mrf.mxu1 }
 0x1c9   : > { %5093 = vst [vmem:[#allocation24_spill] sm:$0xff] %v3901_v40 }
 0x1ca   : > { %5094 = vst [vmem:[#allocation25_spill] sm:$0xff] %v3903_v11 }
 0x1d0   : > { %v3905_v44 = vpop.f32.mrf.mxu0  ;;  %v3907_v56 = vpop.f32.mrf.mxu1 }
 0x1d8   : > { %v3909_v60 = vpop.f32.mrf.mxu0  ;;  %v3911_v49 = vpop.f32.mrf.mxu1 }
 0x1d9   : > { %v1006_v9 = vadd.f32 %v3911_v49, %v3909_v60  ;;  %v1048_v50 = vmul.f32 %v3909_v60, %v3909_v60  ;;  %v1049_v23 = vmul.f32 %v3911_v49, %v3911_v49 }
 0x1db   : > { %1007 = vadd.xlane.f32.xlu0 %v1006_v9  ;;  %v1086_v46 = vadd.f32 %v1049_v23, %v1048_v50 }
 0x1dd   : > { %1087 = vadd.xlane.f32.xlu2 %v1086_v46 }
 0x1e0   : > { %v3919_v21 = vpop.f32.mrf.mxu0  ;;  %v3921_v32 = vpop.f32.mrf.mxu1 }
 0x1e1   : > { %v1009_v25 = vadd.f32 %v3921_v32, %v3919_v21  ;;  %v1050_v16 = vmul.f32 %v3919_v21, %v3919_v21  ;;  %v1051_v36 = vmul.f32 %v3921_v32, %v3921_v32 }
 0x1e3   : > { %1010 = vadd.xlane.f32.xlu1 %v1009_v25  ;;  %v1089_v17 = vadd.f32 %v1051_v36, %v1050_v16 }
 0x1e5   : > { %1090 = vadd.xlane.f32.xlu0 %v1089_v17  ;;  %v1000_v17 = vadd.f32 %v3903_v11, %v3901_v40 }
 0x1e8   : > { %v3929_v28 = vpop.f32.mrf.mxu0  ;;  %v3931_v31 = vpop.f32.mrf.mxu1 }
 0x1e9   : > { %v1012_v62 = vadd.f32 %v3931_v31, %v3929_v28  ;;  %v1052_v12 = vmul.f32 %v3929_v28, %v3929_v28  ;;  %v1053_v20 = vmul.f32 %v3931_v31, %v3931_v31 }
 0x1eb   : > { %1013 = vadd.xlane.f32.xlu2 %v1012_v62  ;;  %v1092_v7 = vadd.f32 %v1053_v20, %v1052_v12  ;;  %v1044_v12 = vmul.f32 %v3901_v40, %v3901_v40  ;;  %v1045_v20 = vmul.f32 %v3903_v11, %v3903_v11 }
 0x1ed   : > { %1093 = vadd.xlane.f32.xlu1 %v1092_v7  ;;  %v1046_v7 = vmul.f32 %v3905_v44, %v3905_v44 }
 0x1f0   : > { %v3939_v26 = vpop.f32.mrf.mxu0  ;;  %v3941_v55 = vpop.f32.mrf.mxu1 }
 0x1f1   : > { %v1015_v33 = vadd.f32 %v3941_v55, %v3939_v26  ;;  %v1054_v52 = vmul.f32 %v3939_v26, %v3939_v26  ;;  %v1055_v47 = vmul.f32 %v3941_v55, %v3941_v55 }
 0x1f3   : > { %1016 = vadd.xlane.f32.xlu0 %v1015_v33  ;;  %v1095_v38 = vadd.f32 %v1055_v47, %v1054_v52  ;;  %v1047_v33 = vmul.f32 %v3907_v56, %v3907_v56  ;;  %v1080_v52 = vadd.f32 %v1045_v20, %v1044_v12 }
 0x1f5   : > { %1096 = vadd.xlane.f32.xlu2 %v1095_v38  ;;  %v1083_v47 = vadd.f32 %v1047_v33, %v1046_v7  ;;  %v1003_v38 = vadd.f32 %v3907_v56, %v3905_v44 }
 0x1f8   : > { %v3949_v14 = vpop.f32.mrf.mxu0  ;;  %v3951_v24 = vpop.f32.mrf.mxu1 }
 0x1f9   : > { %v1018_v43 = vadd.f32 %v3951_v24, %v3949_v14  ;;  %v1056_v48 = vmul.f32 %v3949_v14, %v3949_v14  ;;  %v1057_v51 = vmul.f32 %v3951_v24, %v3951_v24 }
 0x1fb   : > { %1019 = vadd.xlane.f32.xlu1 %v1018_v43  ;;  %v1098_v57 = vadd.f32 %v1057_v51, %v1056_v48  ;;  %v1040_v43 = vmul.f32 %v3893_v37, %v3893_v37  ;;  %v1041_v48 = vmul.f32 %v3895_v53, %v3895_v53  ;;  %v997_v51 = vadd.f32 %v3899_v1, %v3897_v30 }
 0x1fd   : > { %1099 = vadd.xlane.f32.xlu0 %v1098_v57  ;;  %v1074_v57 = vadd.f32 %v1041_v48, %v1040_v43 }
 0x200   : > { %v3959_v18 = vpop.f32.mrf.mxu0  ;;  %v3961_v19 = vpop.f32.mrf.mxu1 }
 0x201   : > { %v1021_v27 = vadd.f32 %v3961_v19, %v3959_v18  ;;  %v1058_v34 = vmul.f32 %v3959_v18, %v3959_v18  ;;  %v1059_v29 = vmul.f32 %v3961_v19, %v3961_v19 }
 0x203   : > { %1022 = vadd.xlane.f32.xlu2 %v1021_v27  ;;  %v1101_v13 = vadd.f32 %v1059_v29, %v1058_v34  ;;  %v994_v27 = vadd.f32 %v3895_v53, %v3893_v37  ;;  %v1042_v34 = vmul.f32 %v3897_v30, %v3897_v30  ;;  %v1043_v29 = vmul.f32 %v3899_v1, %v3899_v1 }
 0x205   : > { %1102 = vadd.xlane.f32.xlu1 %v1101_v13  ;;  %v988_v13 = vadd.f32 %v3887_v10, %v3885_v45 }
 0x208   : > { %v3969_v35 = vpop.f32.mrf.mxu0  ;;  %v3971_v4 = vpop.f32.mrf.mxu1 }
 0x209   : > { %v1024_v15 = vadd.f32 %v3971_v4, %v3969_v35  ;;  %v1060_v6 = vmul.f32 %v3969_v35, %v3969_v35  ;;  %v1061_v61 = vmul.f32 %v3971_v4, %v3971_v4 }
 0x20b   : > { %1025 = vadd.xlane.f32.xlu0 %v1024_v15  ;;  %v1104_v41 = vadd.f32 %v1061_v61, %v1060_v6  ;;  %v991_v15 = vadd.f32 %v3891_v42, %v3889_v3  ;;  %v1077_v6 = vadd.f32 %v1043_v29, %v1042_v34  ;;  %v1038_v61 = vmul.f32 %v3889_v3, %v3889_v3 }
 0x20d   : > { %1105 = vadd.xlane.f32.xlu2 %v1104_v41  ;;  %v1039_v41 = vmul.f32 %v3891_v42, %v3891_v42 }
 0x210   : > { %v3979_v0 = vpop.f32.mrf.mxu0  ;;  %v3981_v8 = vpop.f32.mrf.mxu1 }
 0x211   : > { %v1027_v2 = vadd.f32 %v3981_v8, %v3979_v0  ;;  %v1062_v39 = vmul.f32 %v3979_v0, %v3979_v0  ;;  %v1063_v22 = vmul.f32 %v3981_v8, %v3981_v8 }
 0x213   : > { %1028 = vadd.xlane.f32.xlu1 %v1027_v2  ;;  %v1107_v5 = vadd.f32 %v1063_v22, %v1062_v39  ;;  %v1036_v2 = vmul.f32 %v3885_v45, %v3885_v45  ;;  %v1037_v39 = vmul.f32 %v3887_v10, %v3887_v10  ;;  %v1071_v22 = vadd.f32 %v1039_v41, %v1038_v61 }
 0x215   : > { %1108 = vadd.xlane.f32.xlu0 %v1107_v5  ;;  %v1068_v5 = vadd.f32 %v1037_v39, %v1036_v2 }
 0x218   : > { %v3989_v58 = vpop.f32.mrf.mxu0  ;;  %v3991_v59 = vpop.f32.mrf.mxu1 }
 0x219   : > { %v1030_v54 = vadd.f32 %v3991_v59, %v3989_v58  ;;  %v1064_v63 = vmul.f32 %v3989_v58, %v3989_v58  ;;  %v1065_v9 = vmul.f32 %v3991_v59, %v3991_v59 }
 0x21b   : > { %1031 = vadd.xlane.f32.xlu2 %v1030_v54  ;;  %v1110_v50 = vadd.f32 %v1065_v9, %v1064_v63 }
 0x21d   : > { %1111 = vadd.xlane.f32.xlu1 %v1110_v50 }
 0x220   : > { %v3999_v23 = vpop.f32.mrf.mxu0  ;;  %v4001_v46 = vpop.f32.mrf.mxu1 }
 0x221   : > { %v1033_v25 = vadd.f32 %v4001_v46, %v3999_v23  ;;  %v1066_v16 = vmul.f32 %v3999_v23, %v3999_v23  ;;  %v1067_v36 = vmul.f32 %v4001_v46, %v4001_v46 }
 0x223   : > { %1034 = vadd.xlane.f32.xlu0 %v1033_v25  ;;  %v1113_v62 = vadd.f32 %v1067_v36, %v1066_v16 }
 0x225   : > { %1001 = vadd.xlane.f32.xlu1 %v1000_v17  ;;  %1114 = vadd.xlane.f32.xlu2 %v1113_v62 }
 0x22b   : > { %1081 = vadd.xlane.f32.xlu0 %v1080_v52 }
 0x22d   : > { %1084 = vadd.xlane.f32.xlu1 %v1083_v47  ;;  %1004 = vadd.xlane.f32.xlu2 %v1003_v38 }
 0x233   : > { %998 = vadd.xlane.f32.xlu0 %v997_v51 }
 0x235   : > { %1075 = vadd.xlane.f32.xlu1 %v1074_v57  ;;  %995 = vadd.xlane.f32.xlu2 %v994_v27 }
 0x23b   : > { %989 = vadd.xlane.f32.xlu0 %v988_v13 }
 0x23d   : > { %992 = vadd.xlane.f32.xlu1 %v991_v15  ;;  %1078 = vadd.xlane.f32.xlu2 %v1077_v6 }
 0x243   : > { %1072 = vadd.xlane.f32.xlu0 %v1071_v22 }
 0x245   : > { %1069 = vadd.xlane.f32.xlu2 %v1068_v5 }
 0x24e   : > { %v1008_v54 = vpop.xlane.xlu0 %1007 }
 0x24f   : > { %v1122_v63 = vmul.f32 0.00390625, %v1008_v54 }
 0x250   : > { %v1088_v9 = vpop.xlane.xlu2 %1087 }
 0x251   : > { %v1138_v50 = vmul.f32 0.00390625, %v1088_v9  ;;  %v1154_v25 = vmul.f32 %v1122_v63, %v1122_v63  ;;  %v1208_v48 = vsub.f32 %v3909_v60, %v1122_v63  ;;  %v1209_v51 = vsub.f32 %v3911_v49, %v1122_v63 }
 0x253   : > { %v1170_v16 = vsub.f32 %v1138_v50, %v1154_v25 }
 0x255   : > { %v1186_v36 = vmax.f32 %v1170_v16, 0.0 }
 0x256   : > { %v1011_v7 = vpop.xlane.xlu1 %1010 }
 0x257   : > { %v1234_v17 = vadd.f32 1e-05, %v1186_v36  ;;  %v4045_v43 = vmul.f32 0.00390625, %v1011_v7 }
 0x258   : > { %v1091_v47 = vpop.xlane.xlu0 %1090 }
 0x259   : > { %2887 = vrsqrt.f32 %v1234_v17  ;;  %vm1310_vm1 = vweird.f32 %v1234_v17  ;;  %v1139_v15 = vmul.f32 0.00390625, %v1091_v47  ;;  %v1155_v6 = vmul.f32 %v4045_v43, %v4045_v43 }
 0x25b   : > { %v1171_v2 = vsub.f32 %v1139_v15, %v1155_v6 }
 0x25d   : > { %v1187_v54 = vmax.f32 %v1171_v2, 0.0 }
 0x25e   : > { %v1014_v27 = vpop.xlane.xlu2 %1013 }
 0x25f   : > { %v2888_v62 = vpop.eup %2887  ;;  %v4055_v41 = vmul.f32 0.00390625, %v1014_v27  ;;  %v4065_v36 = vadd.f32 1e-05, %v1187_v54 }
 0x260   : > { %v1305_v12 = vmul.f32 %v2888_v62, %v1234_v17  ;;  %vm1311_vm0 = vweird.f32 %v2888_v62  ;;  %v1094_v57 = vpop.xlane.xlu1 %1093 }
 0x261   : > { %vm1312_vm2 = vmor %vm1310_vm1, %vm1311_vm0  ;;  %v1140_v22 = vmul.f32 0.00390625, %v1094_v57  ;;  %v1156_v49 = vmul.f32 %v4055_v41, %v4055_v41  ;;  %2889 = vrsqrt.f32 %v4065_v36  ;;  %vm1320_vm4 = vweird.f32 %v4065_v36 }
 0x262   : > { %v1306_v20 = vmul.f32 %v2888_v62, %v1305_v12 }
 0x263   : > { %v1172_v50 = vsub.f32 %v1140_v22, %v1156_v49 }
 0x264   : > { %v1307_v33 = vmul.f32 0.5, %v1306_v20 }
 0x265   : > { %v1188_v20 = vmax.f32 %v1172_v50, 0.0 }
 0x266   : > { %v1308_v52 = vsub.f32 1.5, %v1307_v33  ;;  %v1017_v61 = vpop.xlane.xlu0 %1016 }
 0x267   : > { %v4059_v5 = vmul.f32 0.00390625, %v1017_v61  ;;  %v4076_v15 = vpop.eup %2889 }
 0x268   : > { %v1309_v38 = vmul.f32 %v2888_v62, %v1308_v52  ;;  %v1097_v60 = vpop.xlane.xlu2 %1096  ;;  %vm1321_vm3 = vweird.f32 %v4076_v15 }
 0x269   : > { %v1141_v25 = vmul.f32 0.00390625, %v1097_v60  ;;  %v1157_v16 = vmul.f32 %v4059_v5, %v4059_v5  ;;  %v1315_v60 = vmul.f32 %v4076_v15, %v4065_v36  ;;  %vm1322_vm5 = vmor %vm1320_vm4, %vm1321_vm3 }
 0x26a   : > { %v1313_v34 = vsel %vm1312_vm2, %v2888_v62, %v1309_v38  ;;  %v4072_v38 = vadd.f32 1e-05, %v1188_v20 }
 0x26b   : > { %v4049_v29 = vmul.f32 %v1313_v34, %v1208_v48  ;;  %v4051_v13 = vmul.f32 %v1313_v34, %v1209_v51  ;;  %v1173_v7 = vsub.f32 %v1141_v25, %v1157_v16 }
 0x26c   : > { %2891 = vrsqrt.f32 %v4072_v38  ;;  %vm1330_vm6 = vweird.f32 %v4072_v38 }
 0x26d   : > { %v1189_v48 = vmax.f32 %v1173_v7, 0.0 }
 0x26e   : > { %v1020_v39 = vpop.xlane.xlu1 %1019 }
 0x26f   : > { %v4061_v63 = vmul.f32 0.00390625, %v1020_v39  ;;  %v4081_v61 = vadd.f32 1e-05, %v1189_v48 }
 0x270   : > { %v1100_v9 = vpop.xlane.xlu0 %1099 }
 0x271   : > { %v1142_v17 = vmul.f32 0.00390625, %v1100_v9  ;;  %v1158_v62 = vmul.f32 %v4061_v63, %v4061_v63  ;;  %2893 = vrsqrt.f32 %v4081_v61  ;;  %vm1340_vm8 = vweird.f32 %v4081_v61 }
 0x272   : > { %v4093_v16 = vpop.eup %2891 }
 0x273   : > { %v1174_v33 = vsub.f32 %v1142_v17, %v1158_v62  ;;  %v1316_v17 = vmul.f32 %v4076_v15, %v1315_v60  ;;  %vm1331_vm7 = vweird.f32 %v4093_v16 }
 0x274   : > { %vm1332_vm9 = vmor %vm1330_vm6, %vm1331_vm7 }
 0x275   : > { %v1190_v57 = vmax.f32 %v1174_v33, 0.0 }
 0x276   : > { %v1023_v12 = vpop.xlane.xlu2 %1022 }
 0x277   : > { %v4070_v52 = vmul.f32 0.00390625, %v1023_v12  ;;  %v4083_v39 = vadd.f32 1e-05, %v1190_v57  ;;  %v4100_v48 = vpop.eup %2893 }
 0x278   : > { %v1103_v47 = vpop.xlane.xlu1 %1102  ;;  %vm1341_vm10 = vweird.f32 %v4100_v48 }
 0x279   : > { %v1143_v27 = vmul.f32 0.00390625, %v1103_v47  ;;  %v1159_v34 = vmul.f32 %v4070_v52, %v4070_v52  ;;  %2895 = vrsqrt.f32 %v4083_v39  ;;  %v1325_v47 = vmul.f32 %v4093_v16, %v4072_v38  ;;  %vm1342_vm15 = vmor %vm1340_vm8, %vm1341_vm10 }
 0x27a   : > { %vm1350_vm12 = vweird.f32 %v4083_v39 }
 0x27b   : > { %v1175_v22 = vsub.f32 %v1143_v27, %v1159_v34 }
 0x27d   : > { %v1191_v62 = vmax.f32 %v1175_v22, 0.0 }
 0x27e   : > { %v1026_v51 = vpop.xlane.xlu0 %1025 }
 0x27f   : > { %v4078_v6 = vmul.f32 0.00390625, %v1026_v51  ;;  %v1317_v51 = vmul.f32 0.5, %v1316_v17  ;;  %v4102_v57 = vadd.f32 1e-05, %v1191_v62 }
 0x280   : > { %v1106_v2 = vpop.xlane.xlu2 %1105 }
 0x281   : > { %v1144_v54 = vmul.f32 0.00390625, %v1106_v2  ;;  %v1160_v9 = vmul.f32 %v4078_v6, %v4078_v6  ;;  %v4104_v2 = vpop.eup %2895  ;;  %2897 = vrsqrt.f32 %v4102_v57  ;;  %vm1360_vm14 = vweird.f32 %v4102_v57 }
 0x282   : > { %v1345_v17 = vmul.f32 %v4104_v2, %v4083_v39  ;;  %vm1351_vm11 = vweird.f32 %v4104_v2 }
 0x283   : > { %v1176_v7 = vsub.f32 %v1144_v54, %v1160_v9  ;;  %v1326_v54 = vmul.f32 %v4093_v16, %v1325_v47  ;;  %vm1352_vm13 = vmor %vm1350_vm12, %vm1351_vm11 }
 0x285   : > { %v1192_v60 = vmax.f32 %v1176_v7, 0.0 }
 0x286   : > { %v1029_v49 = vpop.xlane.xlu1 %1028 }
 0x287   : > { %v4089_v50 = vmul.f32 0.00390625, %v1029_v49  ;;  %v4116_v62 = vadd.f32 1e-05, %v1192_v60  ;;  %v4128_v10 = vpop.eup %2897 }
 0x288   : > { %v1109_v25 = vpop.xlane.xlu0 %1108  ;;  %vm1361_vm0 = vweird.f32 %v4128_v10 }
 0x289   : > { %v1145_v12 = vmul.f32 0.00390625, %v1109_v25  ;;  %v1161_v20 = vmul.f32 %v4089_v50, %v4089_v50  ;;  %vm1370_vm1 = vweird.f32 %v4116_v62  ;;  %vm1362_vm4 = vmor %vm1360_vm14, %vm1361_vm0 }
 0x28b   : > { %v1177_v33 = vsub.f32 %v1145_v12, %v1161_v20  ;;  %v1318_v12 = vsub.f32 1.5, %v1317_v51  ;;  %v1335_v20 = vmul.f32 %v4100_v48, %v4081_v61 }
 0x28d   : > { %v1193_v27 = vmax.f32 %v1177_v33, 0.0  ;;  %v1327_v33 = vmul.f32 0.5, %v1326_v54  ;;  %v1319_v47 = vmul.f32 %v4076_v15, %v1318_v12  ;;  %v1336_v51 = vmul.f32 %v4100_v48, %v1335_v20 }
 0x28e   : > { %v1032_v34 = vpop.xlane.xlu2 %1031  ;;  %v1210_v54 = vsub.f32 %v3919_v21, %v4045_v43  ;;  %v1355_v12 = vmul.f32 %v4128_v10, %v4102_v57 }
 0x28f   : > { %v4106_v22 = vmul.f32 0.00390625, %v1032_v34  ;;  %v4108_v49 = vadd.f32 1e-05, %v1193_v27  ;;  %v1346_v34 = vmul.f32 %v4104_v2, %v1345_v17  ;;  %v1337_v45 = vmul.f32 0.5, %v1336_v51 }
 0x290   : > { %v1112_v25 = vpop.xlane.xlu1 %1111  ;;  %v1323_v36 = vsel %vm1322_vm5, %v4076_v15, %v1319_v47  ;;  %v1356_v15 = vmul.f32 %v4128_v10, %v1355_v12 }
 0x291   : > { %v1146_v9 = vmul.f32 0.00390625, %v1112_v25  ;;  %v1162_v7 = vmul.f32 %v4106_v22, %v4106_v22  ;;  %2899 = vrsqrt.f32 %v4108_v49  ;;  %v1338_v53 = vsub.f32 1.5, %v1337_v45 }
 0x292   : > { %2901 = vrsqrt.f32 %v4116_v62  ;;  %v4167_v51 = vmul.f32 %v1323_v36, %v1210_v54  ;;  %v1357_v40 = vmul.f32 0.5, %v1356_v15  ;;  %vm1380_vm6 = vweird.f32 %v4108_v49 }
 0x293   : > { %v1178_v27 = vsub.f32 %v1146_v9, %v1162_v7  ;;  %v1211_v9 = vsub.f32 %v3921_v32, %v4045_v43  ;;  %v1347_v32 = vmul.f32 0.5, %v1346_v34 }
 0x295   : > { %v1194_v60 = vmax.f32 %v1178_v27, 0.0  ;;  %v1328_v27 = vsub.f32 1.5, %v1327_v33  ;;  %v4169_v1 = vmul.f32 %v1323_v36, %v1211_v9 }
 0x296   : > { %v1035_v25 = vpop.xlane.xlu0 %1034 }
 0x297   : > { %v4126_v42 = vmul.f32 0.00390625, %v1035_v25  ;;  %v4140_v25 = vadd.f32 1e-05, %v1194_v60  ;;  %v4142_v21 = vpop.eup %2899  ;;  %v1329_v34 = vmul.f32 %v4093_v16, %v1328_v27  ;;  %v1348_v60 = vsub.f32 1.5, %v1347_v32 }
 0x298   : > { %v1002_v20 = vpop.xlane.xlu1 %1001  ;;  %v1115_v17 = vpop.xlane.xlu2 %1114  ;;  %vm1381_vm3 = vweird.f32 %v4142_v21 }
 0x299   : > { %v1147_v43 = vmul.f32 0.00390625, %v1115_v17  ;;  %2903 = vrsqrt.f32 %v4140_v25  ;;  %v4148_v3 = vmul.f32 0.00390625, %v1002_v20  ;;  %v1163_v33 = vmul.f32 %v4126_v42, %v4126_v42  ;;  %v4159_v47 = vpop.eup %2901  ;;  %vm1382_vm7 = vmor %vm1380_vm6, %vm1381_vm3 }
 0x29a   : > { %v1375_v17 = vmul.f32 %v4142_v21, %v4108_v49  ;;  %v1365_v9 = vmul.f32 %v4159_v47, %v4116_v62  ;;  %v4191_v36 = vsel %vm1332_vm9, %v4093_v16, %v1329_v34  ;;  %v1349_v11 = vmul.f32 %v4104_v2, %v1348_v60 }
 0x29b   : > { %5095 = vst [vmem:[#allocation26_spill] sm:$0xff] %v4148_v3  ;;  %v1179_v7 = vsub.f32 %v1147_v43, %v1163_v33  ;;  %v1152_v27 = vmul.f32 %v4148_v3, %v4148_v3  ;;  %v1339_v33 = vmul.f32 %v4100_v48, %v1338_v53  ;;  %v5096_v60 = vsub.f32 %v3929_v28, %v4055_v41 }
 0x29c   : > { %v1358_v28 = vsub.f32 1.5, %v1357_v40  ;;  %v1222_v40 = vsub.f32 %v3979_v0, %v4089_v50  ;;  %vm1371_vm2 = vweird.f32 %v4159_v47  ;;  %vm1390_vm8 = vweird.f32 %v4140_v25 }
 0x29d   : > { %v1195_v30 = vmax.f32 %v1179_v7, 0.0  ;;  %v4212_v15 = vmul.f32 %v4191_v36, %v5096_v60  ;;  %vm1372_vm11 = vmor %vm1370_vm1, %vm1371_vm2 }
 0x29e   : > { %v1082_v37 = vpop.xlane.xlu0 %1081  ;;  %v1359_v0 = vmul.f32 %v4128_v10, %v1358_v28 }
 0x29f   : > { %v1136_v20 = vmul.f32 0.00390625, %v1082_v37  ;;  %v4185_v32 = vpop.eup %2903  ;;  %v1376_v37 = vmul.f32 %v4142_v21, %v1375_v17  ;;  %v4188_v43 = vadd.f32 1e-05, %v1195_v30 }
 0x2a0   : > { %v1085_v12 = vpop.xlane.xlu1 %1084  ;;  %v1005_v7 = vpop.xlane.xlu2 %1004  ;;  %v1385_v54 = vmul.f32 %v4185_v32, %v4140_v25  ;;  %vm1391_vm5 = vweird.f32 %v4185_v32 }
 0x2a1   : > { %v1168_v38 = vsub.f32 %v1136_v20, %v1152_v27  ;;  %v4197_v45 = vmul.f32 0.00390625, %v1005_v7  ;;  %2905 = vrsqrt.f32 %v4188_v43  ;;  %v1366_v20 = vmul.f32 %v4159_v47, %v1365_v9  ;;  %vm1392_vm9 = vmor %vm1390_vm8, %vm1391_vm5 }
 0x2a2   : > { %v1386_v16 = vmul.f32 %v4185_v32, %v1385_v54  ;;  %v1137_v34 = vmul.f32 0.00390625, %v1085_v12  ;;  %v1377_v17 = vmul.f32 0.5, %v1376_v37  ;;  %v4227_v37 = vsel %vm1352_vm13, %v4104_v2, %v1349_v11 }
 0x2a3   : > { %v1184_v30 = vmax.f32 %v1168_v38, 0.0  ;;  %v1153_v53 = vmul.f32 %v4197_v45, %v4197_v45  ;;  %v1367_v38 = vmul.f32 0.5, %v1366_v20  ;;  %vm1400_vm12 = vweird.f32 %v4188_v43 }
 0x2a4   : > { %v1387_v9 = vmul.f32 0.5, %v1386_v16  ;;  %v1378_v7 = vsub.f32 1.5, %v1377_v17  ;;  %v1224_v17 = vsub.f32 %v3989_v58, %v4106_v22 }
 0x2a5   : > { %v4206_v27 = vadd.f32 1e-05, %v1184_v30  ;;  %v1169_v12 = vsub.f32 %v1137_v34, %v1153_v53  ;;  %v4231_v53 = vsel %vm1342_vm15, %v4100_v48, %v1339_v33  ;;  %v5098_v48 = vsub.f32 %v3949_v14, %v4061_v63 }
 0x2a6   : > { %v999_v39 = vpop.xlane.xlu0 %998  ;;  %v1388_v2 = vsub.f32 1.5, %v1387_v9  ;;  %v1368_v54 = vsub.f32 1.5, %v1367_v38  ;;  %v1379_v28 = vmul.f32 %v4142_v21, %v1378_v7  ;;  %v1226_v7 = vsub.f32 %v3999_v23, %v4126_v42 }
 0x2a7   : > { %2907 = vrsqrt.f32 %v4206_v27  ;;  %v1185_v30 = vmax.f32 %v1169_v12, 0.0  ;;  %v4233_v61 = vpop.eup %2905  ;;  %v4250_v33 = vmul.f32 %v4227_v37, %v5098_v48  ;;  %v4272_v38 = vmul.f32 0.00390625, %v999_v39 }
 0x2a8   : > { %v1076_v16 = vpop.xlane.xlu1 %1075  ;;  %v996_v34 = vpop.xlane.xlu2 %995  ;;  %v1395_v20 = vmul.f32 %v4233_v61, %v4188_v43  ;;  %v1363_v48 = vsel %vm1362_vm4, %v4128_v10, %v1359_v0  ;;  %v1227_v23 = vsub.f32 %v4001_v46, %v4126_v42  ;;  %vm1401_vm10 = vweird.f32 %v4233_v61 }
 0x2a9   : > { %v4239_v11 = vmul.f32 0.00390625, %v996_v34  ;;  %v4244_v12 = vadd.f32 1e-05, %v1185_v30  ;;  %v1134_v34 = vmul.f32 0.00390625, %v1076_v16  ;;  %v1225_v30 = vsub.f32 %v3991_v59, %v4106_v22  ;;  %5099 = vst [vmem:[#allocation28_spill] sm:$0xff] %v4272_v38  ;;  %vm1402_vm13 = vmor %vm1400_vm12, %vm1401_vm10 }
 0x2aa   : > { %v1396_v60 = vmul.f32 %v4233_v61, %v1395_v20  ;;  %v1389_v59 = vmul.f32 %v4185_v32, %v1388_v2  ;;  %v1383_v49 = vsel %vm1382_vm7, %v4142_v21, %v1379_v28  ;;  %vm1290_vm1 = vweird.f32 %v4206_v27 }
 0x2ab   : > { %5097 = vst [vmem:[#allocation27_spill] sm:$0xff] %v4239_v11  ;;  %v1150_v9 = vmul.f32 %v4239_v11, %v4239_v11  ;;  %2909 = vrsqrt.f32 %v4244_v12  ;;  %vm1300_vm0 = vweird.f32 %v4244_v12 }
 0x2ac   : > { %v1397_v22 = vmul.f32 0.5, %v1396_v60 }
 0x2ad   : > { %v4261_v14 = vpop.eup %2907  ;;  %v1166_v58 = vsub.f32 %v1134_v34, %v1150_v9  ;;  %v1369_v34 = vmul.f32 %v4159_v47, %v1368_v54  ;;  %v1151_v9 = vmul.f32 %v4272_v38, %v4272_v38 }
 0x2ae   : > { %v990_v16 = vpop.xlane.xlu0 %989  ;;  %v1398_v57 = vsub.f32 1.5, %v1397_v22  ;;  %v1285_v60 = vmul.f32 %v4261_v14, %v4206_v27  ;;  %vm1291_vm15 = vweird.f32 %v4261_v14 }
 0x2af   : > { %v1182_v20 = vmax.f32 %v1166_v58, 0.0  ;;  %v1393_v58 = vsel %vm1392_vm9, %v4185_v32, %v1389_v59  ;;  %v1373_v32 = vsel %vm1372_vm11, %v4159_v47, %v1369_v34  ;;  %v1430_v59 = vmul.f32 %v1383_v49, %v1222_v40  ;;  %vm1292_vm3 = vmor %vm1290_vm1, %vm1291_vm15 }
 0x2b0   : > { %v993_v39 = vpop.xlane.xlu1 %992  ;;  %v1079_v2 = vpop.xlane.xlu2 %1078  ;;  %v1399_v25 = vmul.f32 %v4233_v61, %v1398_v57  ;;  %v1286_v21 = vmul.f32 %v4261_v14, %v1285_v60  ;;  %v4309_v62 = vmul.f32 0.00390625, %v990_v16  ;;  %v1433_v38 = vmul.f32 %v1393_v58, %v1225_v30 }
 0x2b1   : > { %v4287_v10 = vadd.f32 1e-05, %v1182_v20  ;;  %v4290_v54 = vpop.eup %2909  ;;  %v1135_v0 = vmul.f32 0.00390625, %v1079_v2  ;;  %v4304_v46 = vmul.f32 0.00390625, %v993_v39  ;;  %v1432_v20 = vmul.f32 %v1393_v58, %v1224_v17 }
 0x2b2   : > { %v1295_v42 = vmul.f32 %v4290_v54, %v4244_v12  ;;  %v1403_v43 = vsel %vm1402_vm13, %v4233_v61, %v1399_v25  ;;  %v5100_v47 = vsub.f32 %v3981_v8, %v4089_v50  ;;  %v1287_v34 = vmul.f32 0.5, %v1286_v21 }
 0x2b3   : > { %2911 = vrsqrt.f32 %v4287_v10  ;;  %v1167_v28 = vsub.f32 %v1135_v0, %v1151_v9  ;;  %v1434_v11 = vmul.f32 %v1403_v43, %v1226_v7  ;;  %v1435_v39 = vmul.f32 %v1403_v43, %v1227_v23 }
 0x2b4   : > { %v1296_v22 = vmul.f32 %v4290_v54, %v1295_v42  ;;  %v1149_v60 = vmul.f32 %v4304_v46, %v4304_v46  ;;  %v1431_v40 = vmul.f32 %v1383_v49, %v5100_v47  ;;  %v1148_v25 = vmul.f32 %v4309_v62, %v4309_v62 }
 0x2b5   : > { %v1183_v57 = vmax.f32 %v1167_v28, 0.0  ;;  %v4319_v9 = vpack.c.bf16 %v1434_v11, %v1432_v20  ;;  %v4321_v61 = vpack.c.bf16 %v1435_v39, %v1433_v38  ;;  %v5101_v58 = vsub.f32 %v3959_v18, %v4070_v52 }
 0x2b6   : > { %v1073_v2 = vpop.xlane.xlu0 %1072  ;;  %v1297_v3 = vmul.f32 0.5, %v1296_v22  ;;  %v5102_v11 = vsub.f32 %v3969_v35, %v4078_v6  ;;  %v5103_v49 = vsub.f32 %v3971_v4, %v4078_v6  ;;  %v5104_v22 = vsub.f32 %v3961_v19, %v4070_v52 }
 0x2b7   : > { %v1133_v0 = vmul.f32 0.00390625, %v1073_v2  ;;  %v4317_v16 = vadd.f32 1e-05, %v1183_v57  ;;  %v1426_v8 = vmul.f32 %v1363_v48, %v5101_v58  ;;  %1500 = vmatpush.bf16.msra.mxu2 %v4319_v9  ;;  %1539 = vmatpush.bf16.msra.mxu3 %v4321_v61  ;;  %v1288_v20 = vsub.f32 1.5, %v1287_v34 }
 0x2b8   : > { %v1070_v17 = vpop.xlane.xlu2 %1069  ;;  %v1428_v38 = vmul.f32 %v1373_v32, %v5102_v11  ;;  %v1429_v42 = vmul.f32 %v1373_v32, %v5103_v49  ;;  %v1298_v21 = vsub.f32 1.5, %v1297_v3  ;;  %2089 = vmatpush.bf16.msrb.mxu0 %v4319_v9  ;;  %2128 = vmatpush.bf16.msrb.mxu1 %v4321_v61  ;;  %v1427_v43 = vmul.f32 %v1363_v48, %v5104_v22  ;;  %v5116_v22 = vld [vmem:[#allocation20_spill] sm:$0xff] }
 0x2b9   : > { %v4323_v7 = vpop.eup %2911  ;;  %v1165_v30 = vsub.f32 %v1133_v0, %v1149_v60  ;;  %v1132_v23 = vmul.f32 0.00390625, %v1070_v17  ;;  %2913 = vrsqrt.f32 %v4317_v16  ;;  %v5105_v6 = vsub.f32 %v3939_v26, %v4059_v5 }
 0x2ba   : > { %v1265_v50 = vmul.f32 %v4323_v7, %v4287_v10  ;;  %v4347_v35 = vpack.c.bf16 %v1430_v59, %v1428_v38  ;;  %v4349_v2 = vpack.c.bf16 %v1431_v40, %v1429_v42  ;;  %v5106_v39 = vsub.f32 %v3931_v31, %v4055_v41  ;;  %v5109_v40 = vld [vmem:[#allocation26_spill] sm:$0xff] }
 0x2bb   : > { %v1181_v18 = vmax.f32 %v1165_v30, 0.0  ;;  %v1164_v28 = vsub.f32 %v1132_v23, %v1148_v25  ;;  %v1422_v32 = vmul.f32 %v4231_v53, %v5105_v6  ;;  %v4364_v48 = vpack.c.bf16 %v1426_v8, %v4250_v33  ;;  %v5112_v30 = vld [vmem:[#allocation28_spill] sm:$0xff]  ;;  %v5113_v23 = vld [vmem:[#allocation22_spill] sm:$0xff] }
 0x2bc   : > { %v1266_v57 = vmul.f32 %v4323_v7, %v1265_v50  ;;  %v1421_v19 = vmul.f32 %v4191_v36, %v5106_v39  ;;  %1501 = vmatpush.bf16.msra.mxu2 %v4347_v35  ;;  %1540 = vmatpush.bf16.msra.mxu3 %v4349_v2  ;;  %v5107_v59 = vsub.f32 %v3951_v24, %v4061_v63  ;;  %vm1301_vm14 = vweird.f32 %v4290_v54 }
 0x2bd   : > { %v4351_v4 = vadd.f32 1e-05, %v1181_v18  ;;  %v1180_v3 = vmax.f32 %v1164_v28, 0.0  ;;  %v5108_v60 = vsub.f32 %v3941_v55, %v4059_v5  ;;  %v1299_v41 = vmul.f32 %v4290_v54, %v1298_v21  ;;  %2090 = vmatpush.bf16.msrb.mxu0 %v4347_v35  ;;  %2129 = vmatpush.bf16.msrb.mxu1 %v4349_v2  ;;  %vm1302_vm2 = vmor %vm1300_vm0, %vm1301_vm14  ;;  %v5115_v28 = vld [vmem:[#allocation27_spill] sm:$0xff] }
 0x2be   : > { %v1267_v52 = vmul.f32 0.5, %v1266_v57  ;;  %v1425_v26 = vmul.f32 %v4227_v37, %v5107_v59  ;;  %v1289_v63 = vmul.f32 %v4261_v14, %v1288_v20  ;;  %v4401_v12 = vpack.c.bf16 %v1422_v32, %v4212_v15  ;;  %v5117_v20 = vld [vmem:[#allocation21_spill] sm:$0xff] }
 0x2bf   : > { %v1423_v31 = vmul.f32 %v4231_v53, %v5108_v60  ;;  %2915 = vrsqrt.f32 %v4351_v4  ;;  %v4377_v36 = vadd.f32 1e-05, %v1180_v3  ;;  %v4381_v24 = vpop.eup %2913  ;;  %v4393_v53 = vpack.c.bf16 %v4167_v51, %v4049_v29 }
 0x2c0   : > { %v1268_v55 = vsub.f32 1.5, %v1267_v52  ;;  %v4385_v5 = vpack.c.bf16 %v1427_v43, %v1425_v26  ;;  %v1275_v37 = vmul.f32 %v4381_v24, %v4317_v16  ;;  %1502 = vmatpush.bf16.msra.mxu2 %v4364_v48  ;;  %v4407_v0 = vpack.c.bf16 %v4169_v1, %v4051_v13 }
 0x2c1   : > { %2917 = vrsqrt.f32 %v4377_v36  ;;  %v4403_v33 = vpack.c.bf16 %v1423_v31, %v1421_v19  ;;  %v1206_v29 = vsub.f32 %v3905_v44, %v4197_v45  ;;  %v1303_v51 = vsel %vm1302_vm2, %v4290_v54, %v1299_v41  ;;  %2091 = vmatpush.bf16.msrb.mxu0 %v4364_v48  ;;  %v5110_v44 = vld [vmem:[#allocation24_spill] sm:$0xff]  ;;  %v5111_v54 = vld [vmem:[#allocation25_spill] sm:$0xff] }
 0x2c2   : > { %1541 = vmatpush.bf16.msra.mxu3 %v4385_v5  ;;  %v1276_v27 = vmul.f32 %v4381_v24, %v1275_v37  ;;  %2130 = vmatpush.bf16.msrb.mxu1 %v4385_v5  ;;  %v1207_v15 = vsub.f32 %v3907_v56, %v4197_v45  ;;  %v1269_v47 = vmul.f32 %v4323_v7, %v1268_v55  ;;  %vm1271_vm4 = vweird.f32 %v4323_v7 }
 0x2c3   : > { %v1293_v1 = vsel %vm1292_vm3, %v4261_v14, %v1289_v63  ;;  %v1204_v34 = vsub.f32 %v5110_v44, %v5109_v40  ;;  %v1205_v17 = vsub.f32 %v5111_v54, %v5109_v40  ;;  %v1202_v25 = vsub.f32 %v5113_v23, %v5112_v30  ;;  %v5114_v14 = vld [vmem:[#allocation23_spill] sm:$0xff]  ;;  %v2730_v23 = vld [vmem:[#allocation8] sm:$0xff] }
 0x2c4   : > { %v1277_v58 = vmul.f32 0.5, %v1276_v27  ;;  %v1414_v8 = vmul.f32 %v1303_v51, %v1206_v29  ;;  %v1415_v50 = vmul.f32 %v1303_v51, %v1207_v15  ;;  %vm1270_vm5 = vweird.f32 %v4287_v10  ;;  %1503 = vmatpush.bf16.msra.mxu2 %v4401_v12  ;;  %v5119_v27 = vld [vmem:[#allocation18_spill] sm:$0xff]  ;;  %v5121_v40 = vld [vmem:[#allocation19_spill] sm:$0xff] }
 0x2c5   : > { %v2916_v13 = vpop.eup %2915  ;;  %v1203_v11 = vsub.f32 %v5114_v14, %v5112_v30  ;;  %vm1272_vm6 = vmor %vm1270_vm5, %vm1271_vm4  ;;  %vm1281_vm7 = vweird.f32 %v4381_v24  ;;  %2092 = vmatpush.bf16.msrb.mxu0 %v4401_v12  ;;  %v1412_v10 = vmul.f32 %v1293_v1, %v1204_v34  ;;  %v1413_v18 = vmul.f32 %v1293_v1, %v1205_v17 }
 0x2c6   : > { %v1255_v56 = vmul.f32 %v2916_v13, %v4351_v4  ;;  %1542 = vmatpush.bf16.msra.mxu3 %v4403_v33  ;;  %v1278_v38 = vsub.f32 1.5, %v1277_v58  ;;  %2131 = vmatpush.bf16.msrb.mxu1 %v4403_v33  ;;  %v1273_v49 = vsel %vm1272_vm6, %v4323_v7, %v1269_v47  ;;  %v1200_v43 = vsub.f32 %v5116_v22, %v5115_v28  ;;  %v5120_v47 = vld [vmem:[#allocation16_spill] sm:$0xff]  ;;  %v2743_v58 = vld [vmem:[#allocation8 + $0x68] sm:$0xff] }
 0x2c7   : > { %v2918_v45 = vpop.eup %2917  ;;  %v1201_v57 = vsub.f32 %v5117_v20, %v5115_v28  ;;  %vm1280_vm8 = vweird.f32 %v4317_v16  ;;  %v4447_v7 = vpack.c.bf16 %v1414_v8, %v1412_v10  ;;  %v4449_v39 = vpack.c.bf16 %v1415_v50, %v1413_v18  ;;  %v2732_v8 = vld [vmem:[#allocation8 + $0x10] sm:$0xff] }
 0x2c8   : > { %v1256_v42 = vmul.f32 %v2916_v13, %v1255_v56  ;;  %v1245_v21 = vmul.f32 %v2918_v45, %v4377_v36  ;;  %v1279_v3 = vmul.f32 %v4381_v24, %v1278_v38  ;;  %vm1282_vm9 = vmor %vm1280_vm8, %vm1281_vm7  ;;  %1504 = vmatpush.bf16.msra.mxu2 %v4393_v53  ;;  %v1408_v19 = vmul.f32 %v1273_v49, %v1200_v43  ;;  %v2744_v50 = vld [vmem:[#allocation8 + $0x70] sm:$0xff] }
 0x2c9   : > { %v1409_v52 = vmul.f32 %v1273_v49, %v1201_v57  ;;  %vm1261_vm10 = vweird.f32 %v2916_v13  ;;  %2093 = vmatpush.bf16.msrb.mxu0 %v4393_v53  ;;  %vm1260_vm11 = vweird.f32 %v4351_v4  ;;  %vm1251_vm12 = vweird.f32 %v2918_v45  ;;  %v2739_v49 = vld [vmem:[#allocation8 + $0x48] sm:$0xff] }
 0x2ca   : > { %v1257_v6 = vmul.f32 0.5, %v1256_v42  ;;  %v1246_v32 = vmul.f32 %v2918_v45, %v1245_v21  ;;  %1543 = vmatpush.bf16.msra.mxu3 %v4407_v0  ;;  %2132 = vmatpush.bf16.msrb.mxu1 %v4407_v0  ;;  %v1283_v16 = vsel %vm1282_vm9, %v4381_v24, %v1279_v3  ;;  %vm1262_vm13 = vmor %vm1260_vm11, %vm1261_vm10  ;;  %v5118_v24 = vld [vmem:[#allocation17_spill] sm:$0xff]  ;;  %vm1250_vm14 = vweird.f32 %v4377_v36  ;;  %v2740_v3 = vld [vmem:[#allocation8 + $0x50] sm:$0xff] }
 0x2cb   : > { %v1410_v60 = vmul.f32 %v1283_v16, %v1202_v25  ;;  %v1411_v31 = vmul.f32 %v1283_v16, %v1203_v11  ;;  %v1198_v4 = vsub.f32 %v5118_v24, %v4304_v46  ;;  %v1196_v15 = vsub.f32 %v5119_v27, %v4309_v62  ;;  %vm1252_vm15 = vmor %vm1250_vm14, %vm1251_vm12  ;;  %v2731_v25 = vld [vmem:[#allocation8 + $0x8] sm:$0xff] }
 0x2cc   : > { %v1258_v59 = vsub.f32 1.5, %v1257_v6  ;;  %v1247_v26 = vmul.f32 0.5, %v1246_v32  ;;  %1505 = vmatpush.bf16.msra.mxu2 %v4447_v7  ;;  %v1197_v1 = vsub.f32 %v5120_v47, %v4309_v62  ;;  %v1199_v44 = vsub.f32 %v5121_v40, %v4304_v46  ;;  %v2742_v46 = vld [vmem:[#allocation8 + $0x60] sm:$0xff] }
 0x2cd   : > { %v4457_v55 = vpack.c.bf16 %v1410_v60, %v1408_v19  ;;  %v4459_v37 = vpack.c.bf16 %v1411_v31, %v1409_v52  ;;  %2094 = vmatpush.bf16.msrb.mxu0 %v4447_v7 }
 0x2ce   : > { %v1259_v41 = vmul.f32 %v2916_v13, %v1258_v59  ;;  %v1248_v63 = vsub.f32 1.5, %v1247_v26  ;;  %1544 = vmatpush.bf16.msra.mxu3 %v4449_v39  ;;  %2133 = vmatpush.bf16.msrb.mxu1 %v4449_v39  ;;  %v2741_v26 = vld [vmem:[#allocation8 + $0x58] sm:$0xff] }
 0x2d0   : > { %v1249_v29 = vmul.f32 %v2918_v45, %v1248_v63  ;;  %v1263_v51 = vsel %vm1262_vm13, %v2916_v13, %v1259_v41  ;;  %1506 = vmatpush.bf16.msra.mxu2 %v4457_v55 }
 0x2d1   : > { %v1406_v54 = vmul.f32 %v1263_v51, %v1198_v4  ;;  %2095 = vmatpush.bf16.msrb.mxu0 %v4457_v55  ;;  %v1407_v17 = vmul.f32 %v1263_v51, %v1199_v44 }
 0x2d2   : > { %1545 = vmatpush.bf16.msra.mxu3 %v4459_v37  ;;  %v1253_v34 = vsel %vm1252_vm15, %v2918_v45, %v1249_v29  ;;  %2134 = vmatpush.bf16.msrb.mxu1 %v4459_v37 }
 0x2d3   : > { %v1404_v36 = vmul.f32 %v1253_v34, %v1196_v15  ;;  %v1405_v13 = vmul.f32 %v1253_v34, %v1197_v1 }
 0x2d5   : > { %v1436_v30 = vpack.c.bf16 %v1406_v54, %v1404_v36  ;;  %v1437_v62 = vpack.c.bf16 %v1407_v17, %v1405_v13 }
 0x2d7   : > { %1507 = vmatpush.bf16.msra.mxu2 %v1436_v30  ;;  %1546 = vmatpush.bf16.msra.mxu3 %v1437_v62 }
 0x2d8   : > { %2096 = vmatpush.bf16.msrb.mxu0 %v1436_v30  ;;  %2135 = vmatpush.bf16.msrb.mxu1 %v1437_v62 }
 0x2da   : > { %1508 = vmatmul.bf16.vlgmr.msra.gmra.mxu2 %v2730_v23  ;;  %1547 = vmatmul.bf16.vlgmr.msra.gmra.mxu3 %v2730_v23 }
 0x2db   : > { %1811 = vmatpush.bf16.msrb.mxu2 %v4319_v9  ;;  %1850 = vmatpush.bf16.msrb.mxu3 %v4321_v61 }
 0x2dc   : > { %2097 = vmatmul.bf16.vlgmr.msrb.gmra.mxu0 %v2742_v46  ;;  %2136 = vmatmul.bf16.vlgmr.msrb.gmra.mxu1 %v2742_v46  ;;  %v1626_v46 = vlaneseq }
 0x2df   : > { %1812 = vmatpush.bf16.msrb.mxu2 %v4347_v35  ;;  %1851 = vmatpush.bf16.msrb.mxu3 %v4349_v2 }
 0x2e3   : > { %1813 = vmatpush.bf16.msrb.mxu2 %v4364_v48  ;;  %1852 = vmatpush.bf16.msrb.mxu3 %v4385_v5 }
 0x2e7   : > { %1814 = vmatpush.bf16.msrb.mxu2 %v4401_v12  ;;  %1853 = vmatpush.bf16.msrb.mxu3 %v4403_v33 }
 0x2ea   : > { %1513 = vmatmul.bf16.gmra.mxu2 %v2731_v25  ;;  %1552 = vmatmul.bf16.gmra.mxu3 %v2731_v25 }
 0x2eb   : > { %1815 = vmatpush.bf16.msrb.mxu2 %v4393_v53  ;;  %1854 = vmatpush.bf16.msrb.mxu3 %v4407_v0 }
 0x2ec   : > { %2102 = vmatmul.bf16.gmra.mxu0 %v2743_v58  ;;  %2141 = vmatmul.bf16.gmra.mxu1 %v2743_v58 }
 0x2ef   : > { %1816 = vmatpush.bf16.msrb.mxu2 %v4447_v7  ;;  %1855 = vmatpush.bf16.msrb.mxu3 %v4449_v39 }
 0x2f3   : > { %1817 = vmatpush.bf16.msrb.mxu2 %v4457_v55  ;;  %1856 = vmatpush.bf16.msrb.mxu3 %v4459_v37 }
 0x2f7   : > { %1818 = vmatpush.bf16.msrb.mxu2 %v1436_v30  ;;  %1857 = vmatpush.bf16.msrb.mxu3 %v1437_v62 }
 0x2fa   : > { %1518 = vmatmul.bf16.gmra.mxu2 %v2732_v8  ;;  %1557 = vmatmul.bf16.gmra.mxu3 %v2732_v8  ;;  %v4549_v8 = vand.u32 127, %v1626_v46 }
 0x2fb   : > { %2749 = vmatpush.bf16.msra.mxu2 %v4319_v9  ;;  %2757 = vmatpush.bf16.msra.mxu3 %v4321_v61  ;;  %v2733_v9 = vld [vmem:[#allocation8 + $0x18] sm:$0xff] }
 0x2fc   : > { %2107 = vmatmul.bf16.gmra.mxu0 %v2744_v50  ;;  %2146 = vmatmul.bf16.gmra.mxu1 %v2744_v50  ;;  %v2745_v61 = vld [vmem:[#allocation8 + $0x78] sm:$0xff]  ;;  %vm2215_vm0 = vcmp.lt.s32.totalorder %v4549_v8, 113  ;;  %vm1628_vm1 = vcmp.lt.s32.totalorder %v4549_v8, 17  ;;  %vm1675_vm2 = vcmp.lt.s32.totalorder %v4549_v8, 16  ;;  %vm2271_vm3 = vcmp.lt.s32.totalorder %v4549_v8, 112 }
 0x2fd   : > { %vm1731_vm4 = vcmp.lt.s32.totalorder %v4549_v8, 15  ;;  %vm1937_vm5 = vcmp.lt.s32.totalorder %v4549_v8, 1  ;;  %vm2009_vm6 = vcmp.lt.s32.totalorder %v4549_v8, 127  ;;  %vm2327_vm7 = vcmp.lt.s32.totalorder %v4549_v8, 111 }
 0x2ff   : > { %2750 = vmatpush.bf16.msra.mxu2 %v4347_v35  ;;  %2758 = vmatpush.bf16.msra.mxu3 %v4349_v2  ;;  %v2734_v35 = vld [vmem:[#allocation8 + $0x20] sm:$0xff] }
 0x300   : > { %v2746_v2 = vld [vmem:[#allocation8 + $0x80] sm:$0xff] }
 0x303   : > { %2751 = vmatpush.bf16.msra.mxu2 %v4364_v48  ;;  %2759 = vmatpush.bf16.msra.mxu3 %v4385_v5  ;;  %v2735_v48 = vld [vmem:[#allocation8 + $0x28] sm:$0xff]  ;;  %v2736_v5 = vld [vmem:[#allocation8 + $0x30] sm:$0xff] }
 0x307   : > { %2752 = vmatpush.bf16.msra.mxu2 %v4401_v12  ;;  %2760 = vmatpush.bf16.msra.mxu3 %v4403_v33  ;;  %v2738_v12 = vld [vmem:[#allocation8 + $0x40] sm:$0xff] }
 0x30a   : > { %1523 = vmatmul.bf16.gmra.mxu2 %v2733_v9  ;;  %1562 = vmatmul.bf16.gmra.mxu3 %v2733_v9 }
 0x30b   : > { %2753 = vmatpush.bf16.msra.mxu2 %v4393_v53  ;;  %2761 = vmatpush.bf16.msra.mxu3 %v4407_v0  ;;  %v2737_v53 = vld [vmem:[#allocation8 + $0x38] sm:$0xff] }
 0x30c   : > { %2112 = vmatmul.bf16.gmra.mxu0 %v2745_v61  ;;  %2151 = vmatmul.bf16.gmra.mxu1 %v2745_v61 }
 0x30f   : > { %2754 = vmatpush.bf16.msra.mxu2 %v4447_v7  ;;  %2762 = vmatpush.bf16.msra.mxu3 %v4449_v39 }
 0x313   : > { %2755 = vmatpush.bf16.msra.mxu2 %v4457_v55  ;;  %2763 = vmatpush.bf16.msra.mxu3 %v4459_v37  ;;  %v2747_v37 = vld [vmem:[#allocation8 + $0x88] sm:$0xff] }
 0x317   : > { %2756 = vmatpush.bf16.msra.mxu2 %v1436_v30  ;;  %2764 = vmatpush.bf16.msra.mxu3 %v1437_v62 }
 0x31a   : > { %1528 = vmatmul.bf16.gmra.mxu2 %v2734_v35  ;;  %1567 = vmatmul.bf16.gmra.mxu3 %v2734_v35 }
 0x31c   : > { %2117 = vmatmul.bf16.gmra.mxu0 %v2746_v2  ;;  %2156 = vmatmul.bf16.gmra.mxu1 %v2746_v2 }
 0x32a   : > { %1533 = vmatmul.bf16.gmra.mxu2 %v2735_v48  ;;  %1572 = vmatmul.bf16.gmra.mxu3 %v2735_v48 }
 0x33a   : > { %1819 = vmatmul.bf16.vlgmr.msrb.gmra.mxu2 %v2736_v5  ;;  %1858 = vmatmul.bf16.vlgmr.msrb.gmra.mxu3 %v2736_v5 }
 0x34a   : > { %1824 = vmatmul.bf16.gmra.mxu2 %v2737_v53  ;;  %1863 = vmatmul.bf16.gmra.mxu3 %v2737_v53 }
 0x359   : > { %v2098_v33 = vpop.f32.mrf.mxu0  ;;  %v2137_v0 = vpop.f32.mrf.mxu1 }
 0x35a   : > { %2207 = vrot.lane.b32.xlu0 %v2137_v0, %s3130_s21  ;;  %2199 = vrot.lane.b32.xlu1 %v2098_v33, %s3130_s21 }
 0x35b   : > { %1829 = vmatmul.bf16.gmra.mxu2 %v2738_v12  ;;  %1868 = vmatmul.bf16.gmra.mxu3 %v2738_v12 }
 0x35d   : > { %v1509_v56 = vpop.f32.mrf.mxu2  ;;  %v1548_v45 = vpop.f32.mrf.mxu3 }
 0x361   : > { %v2100_v14 = vpop.f32.mrf.mxu0  ;;  %v2139_v11 = vpop.f32.mrf.mxu1 }
 0x362   : > { %2209 = vrot.lane.b32.xlu2 %v2139_v11, %s3130_s21  ;;  %2201 = vrot.lane.b32.xlu0 %v2100_v14, %s3130_s21 }
 0x363   : > { %1610 = vrot.lane.b32.xlu1 %v1509_v56, %s3131_s26 }
 0x365   : > { %v1511_v38 = vpop.f32.mrf.mxu2  ;;  %v1550_v10 = vpop.f32.mrf.mxu3 }
 0x369   : > { %v2103_v42 = vpop.f32.mrf.mxu0  ;;  %v2142_v21 = vpop.f32.mrf.mxu1 }
 0x36a   : > { %1620 = vrot.lane.b32.xlu0 %v1550_v10, %s3131_s26  ;;  %1612 = vrot.lane.b32.xlu2 %v1511_v38, %s3131_s26 }
 0x36b   : > { %1618 = vrot.lane.b32.xlu1 %v1548_v45, %s3131_s26  ;;  %1834 = vmatmul.bf16.gmra.mxu2 %v2739_v49 }
 0x36c   : > { %1873 = vmatmul.bf16.gmra.mxu3 %v2739_v49 }
 0x36d   : > { %v1514_v18 = vpop.f32.mrf.mxu2  ;;  %v1553_v28 = vpop.f32.mrf.mxu3 }
 0x371   : > { %v2105_v22 = vpop.f32.mrf.mxu0  ;;  %v2144_v43 = vpop.f32.mrf.mxu1 }
 0x372   : > { %2203 = vrot.lane.b32.xlu2 %v2103_v42, %s3130_s21  ;;  %1614 = vrot.lane.b32.xlu0 %v1514_v18, %s3131_s26 }
 0x373   : > { %2211 = vrot.lane.b32.xlu1 %v2142_v21, %s3130_s21 }
 0x375   : > { %v1516_v20 = vpop.f32.mrf.mxu2  ;;  %v1555_v57 = vpop.f32.mrf.mxu3 }
 0x379   : > { %v2108_v6 = vpop.f32.mrf.mxu0  ;;  %v2147_v32 = vpop.f32.mrf.mxu1 }
 0x37a   : > { %1622 = vrot.lane.b32.xlu2 %v1553_v28, %s3131_s26  ;;  %2213 = vrot.lane.b32.xlu0 %v2144_v43, %s3130_s21 }
 0x37b   : > { %2205 = vrot.lane.b32.xlu1 %v2105_v22, %s3130_s21  ;;  %1839 = vmatmul.bf16.gmra.mxu2 %v2740_v3  ;;  %s3061_s21 = sshra.s32 %s2495_s14, 4  ;;  %s3062_s21 = int_to_ptr.hbm [resolvable:$true] %s3061_s21 }
 0x37c   : > { %1878 = vmatmul.bf16.gmra.mxu3 %v2740_v3  ;;  %p3068_p11 = scmp.lt.s32.totalorder %s3062_s21, %s5040_s4 }
 0x37d   : > { %v1519_v7 = vpop.f32.mrf.mxu2  ;;  %v1558_v39 = vpop.f32.mrf.mxu3 }
 0x381   : > { %v2110_v19 = vpop.f32.mrf.mxu0  ;;  %v2149_v52 = vpop.f32.mrf.mxu1 }
 0x382   : > { %1616 = vrot.lane.b32.xlu2 %v1516_v20, %s3131_s26  ;;  %1659 = vrot.lane.b32.xlu0 %v1519_v7, %s3132_s9 }
 0x383   : > { %1624 = vrot.lane.b32.xlu1 %v1555_v57, %s3131_s26  ;;  %s3063_s26 = scalar_lea.hbm %s3062_s21, 64 }
 0x384   : > { %p3064_p1 = scmp.ne.s32.totalorder %s3062_s21, %s3063_s26 }
 0x385   : > { %v1521_v16 = vpop.f32.mrf.mxu2  ;;  %v1560_v59 = vpop.f32.mrf.mxu3 }
 0x386   : > { %p3065_p4 = pnand %p3064_p1, %p3247_p7 }
 0x388   : > { %p3066_p8 = pneg %p3065_p4 }
 0x389   : > { %v2113_v60 = vpop.f32.mrf.mxu0  ;;  %v2152_v4 = vpop.f32.mrf.mxu1 }
 0x38a   : > { %2255 = vrot.lane.b32.xlu2 %v2108_v6, %s3133_s11  ;;  %2265 = vrot.lane.b32.xlu0 %v2149_v52, %s3133_s11 }
 0x38b   : > { %2263 = vrot.lane.b32.xlu1 %v2147_v32, %s3133_s11  ;;  %1844 = vmatmul.bf16.gmra.mxu2 %v2741_v26 }
 0x38c   : > { %1883 = vmatmul.bf16.gmra.mxu3 %v2741_v26  ;;  %v1637_v26 = vld [vmem:[#allocation9] ss:$8 sm:$0x3] }
 0x38d   : > { %v1524_v31 = vpop.f32.mrf.mxu2  ;;  %v1563_v41 = vpop.f32.mrf.mxu3 }
 0x391   : > { %v2115_v24 = vpop.f32.mrf.mxu0  ;;  %v2154_v1 = vpop.f32.mrf.mxu1 }
 0x392   : > { %1667 = vrot.lane.b32.xlu2 %v1558_v39, %s3132_s9  ;;  %2259 = vrot.lane.b32.xlu0 %v2113_v60, %s3133_s11 }
 0x393   : > { %2257 = vrot.lane.b32.xlu1 %v2110_v19, %s3133_s11 }
 0x395   : > { %v1526_v63 = vpop.f32.mrf.mxu2  ;;  %v1565_v55 = vpop.f32.mrf.mxu3 }
 0x399   : > { %v2118_v27 = vpop.f32.mrf.mxu0  ;;  %v2157_v34 = vpop.f32.mrf.mxu1 }
 0x39a   : > { %1671 = vrot.lane.b32.xlu0 %v1563_v41, %s3132_s9  ;;  %1661 = vrot.lane.b32.xlu2 %v1521_v16, %s3132_s9 }
 0x39b   : > { %1669 = vrot.lane.b32.xlu1 %v1560_v59, %s3132_s9  ;;  %2122 = vmatmul.bf16.vlgmr.msra.gmra.mxu2 %v2747_v37 }
 0x39c   : > { %2161 = vmatmul.bf16.vlgmr.msra.gmra.mxu3 %v2747_v37  ;;  %v4625_v37 = vperm.slane %v1637_v26, 0 }
 0x39d   : > { %v1529_v29 = vpop.f32.mrf.mxu2  ;;  %v1568_v51 = vpop.f32.mrf.mxu3 }
 0x3a1   : > { %v2120_v17 = vpop.f32.mrf.mxu0 }
 0x3a2   : > { %2267 = vrot.lane.b32.xlu2 %v2152_v4, %s3133_s11  ;;  %1665 = vrot.lane.b32.xlu0 %v1526_v63, %s3132_s9 }
 0x3a3   : > { %1663 = vrot.lane.b32.xlu1 %v1524_v31, %s3132_s9 }
 0x3a5   : > { %v1531_v15 = vpop.f32.mrf.mxu2  ;;  %v1570_v47 = vpop.f32.mrf.mxu3 }
 0x3aa   : > { %2261 = vrot.lane.b32.xlu2 %v2115_v24, %s3133_s11  ;;  %2311 = vrot.lane.b32.xlu0 %v2118_v27, %s3134_s12  ;;  %v4627_v24 = vperm.slane %v1637_v26, 1 }
 0x3ab   : > { %2269 = vrot.lane.b32.xlu1 %v2154_v1, %s3133_s11 }
 0x3ad   : > { %v1534_v40 = vpop.f32.mrf.mxu2  ;;  %v1573_v44 = vpop.f32.mrf.mxu3 }
 0x3b2   : > { %1673 = vrot.lane.b32.xlu2 %v1565_v55, %s3132_s9  ;;  %1723 = vrot.lane.b32.xlu0 %v1568_v51, %s3135_s13  ;;  %v1685_v55 = vld [vmem:[#allocation9 + $0x1] ss:$8 sm:$0x3] }
 0x3b3   : > { %1715 = vrot.lane.b32.xlu1 %v1529_v29, %s3135_s13  ;;  %v4630_v4 = vperm.slane %v1685_v55, 0  ;;  %v4632_v29 = vperm.slane %v1685_v55, 1 }
 0x3b5   : > { %v1536_v54 = vpop.f32.mrf.mxu2  ;;  %v1575_v36 = vpop.f32.mrf.mxu3 }
 0x3ba   : > { %2319 = vrot.lane.b32.xlu2 %v2157_v34, %s3134_s12  ;;  %1717 = vrot.lane.b32.xlu0 %v1531_v15, %s3135_s13 }
 0x3bb   : > { %1727 = vrot.lane.b32.xlu1 %v1573_v44, %s3135_s13 }
 0x3bc   : > { %v2210_v13 = vpop.permute.xlu2 %2209 }
 0x3bd   : > { %v1820_v30 = vpop.f32.mrf.mxu2  ;;  %v1859_v62 = vpop.f32.mrf.mxu3 }
 0x3c2   : > { %2313 = vrot.lane.b32.xlu2 %v2120_v17, %s3134_s12  ;;  %1729 = vrot.lane.b32.xlu0 %v1575_v36, %s3135_s13 }
 0x3c3   : > { %1721 = vrot.lane.b32.xlu1 %v1536_v54, %s3135_s13 }
 0x3c4   : > { %v1613_v23 = vpop.permute.xlu2 %1612 }
 0x3c5   : > { %v1822_v25 = vpop.f32.mrf.mxu2  ;;  %v1861_v58 = vpop.f32.mrf.mxu3 }
 0x3ca   : > { %1725 = vrot.lane.b32.xlu2 %v1570_v47, %s3135_s13  ;;  %1931 = vrot.lane.b32.xlu0 %v1861_v58, %s3136_s24 }
 0x3cb   : > { %1929 = vrot.lane.b32.xlu1 %v1859_v62, %s3136_s24 }
 0x3cc   : > { %v2208_v50 = vpop.permute.xlu0 %2207  ;;  %v2200_v9 = vpop.permute.xlu1 %2199 }
 0x3cd   : > { %v4555_v61 = vsel %vm2215_vm0, %v2200_v9, %v2208_v50  ;;  %v4559_v35 = vsel %vm2215_vm0, %v2208_v50, %v2200_v9  ;;  %v2204_v2 = vpop.permute.xlu2 %2203  ;;  %v1825_v48 = vpop.f32.mrf.mxu2 }
 0x3ce   : > { %v1864_v5 = vpop.f32.mrf.mxu3 }
 0x3d2   : > { %1719 = vrot.lane.b32.xlu2 %v1534_v40, %s3135_s13  ;;  %1925 = vrot.lane.b32.xlu0 %v1825_v48, %s3136_s24  ;;  %s3067_s13 = scalar_lea.hbm %s5040_s4, 128 }
 0x3d3   : > { %1923 = vrot.lane.b32.xlu1 %v1822_v25, %s3136_s24  ;;  %p3069_p9 = scmp.lt.s32.totalorder %s3067_s13, %s3063_s26 }
 0x3d4   : > { %v2202_v53 = vpop.permute.xlu0 %2201 }
 0x3d5   : > { %v4566_v12 = vsel %vm2215_vm0, %v2202_v53, %v2210_v13  ;;  %v4570_v33 = vsel %vm2215_vm0, %v2210_v13, %v2202_v53  ;;  %v1611_v0 = vpop.permute.xlu1 %1610  ;;  %v1623_v56 = vpop.permute.xlu2 %1622  ;;  %p3070_p2 = por %p3069_p9, %p3068_p11 }
 0x3d6   : > { %v1827_v45 = vpop.f32.mrf.mxu2  ;;  %v1866_v14 = vpop.f32.mrf.mxu3 }
 0x3d7   : > { %p3071_p10 = pnand %p3070_p2, %p3066_p8 }
 0x3da   : > { %1921 = vrot.lane.b32.xlu2 %v1820_v30, %s3136_s24 }
 0x3db   : > { %1935 = vrot.lane.b32.xlu1 %v1866_v14, %s3136_s24 }
 0x3dc   : > { %v1621_v11 = vpop.permute.xlu0 %1620 }
 0x3dd   : > { %v4577_v38 = vsel %vm1628_vm1, %v1613_v23, %v1621_v11  ;;  %v4581_v10 = vsel %vm1628_vm1, %v1621_v11, %v1613_v23  ;;  %v1619_v49 = vpop.permute.xlu1 %1618  ;;  %v1617_v42 = vpop.permute.xlu2 %1616 }
 0x3de   : > { %v1629_v21 = vsel %vm1628_vm1, %v1611_v0, %v1619_v49  ;;  %v1633_v18 = vsel %vm1628_vm1, %v1619_v49, %v1611_v0  ;;  %v4587_v28 = vpop.f32.mrf.mxu2  ;;  %v4589_v22 = vpop.f32.mrf.mxu3 }
 0x3df   : > { %v1643_v27 = vmul.f32 %v4625_v37, %v1633_v18  ;;  %v1644_v15 = vmul.f32 %v4627_v24, %v1629_v21 }
 0x3e2   : > { %1933 = vrot.lane.b32.xlu2 %v1864_v5, %s3136_s24 }
 0x3e4   : > { %v1615_v43 = vpop.permute.xlu0 %1614 }
 0x3e5   : > { %v2212_v20 = vpop.permute.xlu1 %2211  ;;  %v4594_v57 = vsel %vm1628_vm1, %v1615_v43, %v1623_v56  ;;  %v4598_v3 = vsel %vm1628_vm1, %v1623_v56, %v1615_v43  ;;  %v2256_v6 = vpop.permute.xlu2 %2255 }
 0x3e6   : > { %v4602_v32 = vsel %vm2215_vm0, %v2204_v2, %v2212_v20  ;;  %v4606_v7 = vsel %vm2215_vm0, %v2212_v20, %v2204_v2  ;;  %v4608_v39 = vpop.f32.mrf.mxu2  ;;  %v4610_v19 = vpop.f32.mrf.mxu3 }
 0x3ea   : > { %1927 = vrot.lane.b32.xlu2 %v1827_v45, %s3136_s24 }
 0x3ec   : > { %v2214_v52 = vpop.permute.xlu0 %2213 }
 0x3ed   : > { %v2206_v16 = vpop.permute.xlu1 %2205  ;;  %v1668_v59 = vpop.permute.xlu2 %1667 }
 0x3ee   : > { %v4615_v60 = vsel %vm2215_vm0, %v2206_v16, %v2214_v52  ;;  %v4619_v31 = vsel %vm2215_vm0, %v2214_v52, %v2206_v16  ;;  %v4621_v41 = vpop.f32.mrf.mxu2  ;;  %v1645_v52 = vmul.f32 %v4625_v37, %v4581_v10  ;;  %v1646_v16 = vmul.f32 %v4627_v24, %v4577_v38 }
 0x3ef   : > { %v4623_v63 = vpop.f32.mrf.mxu3 }
 0x3f4   : > { %v1660_v51 = vpop.permute.xlu0 %1659 }
 0x3f5   : > { %v1625_v47 = vpop.permute.xlu1 %1624  ;;  %v1676_v1 = vsel %vm1675_vm2, %v1660_v51, %v1668_v59  ;;  %v1680_v40 = vsel %vm1675_vm2, %v1668_v59, %v1660_v51  ;;  %v1662_v44 = vpop.permute.xlu2 %1661 }
 0x3f6   : > { %v1632_v34 = vsel %vm1628_vm1, %v1617_v42, %v1625_v47  ;;  %v1636_v54 = vsel %vm1628_vm1, %v1625_v47, %v1617_v42  ;;  %v1691_v36 = vmul.f32 %v4630_v4, %v1680_v40  ;;  %v1692_v13 = vmul.f32 %v4632_v29, %v1676_v1  ;;  %v4646_v17 = vpop.f32.mrf.mxu2 }
 0x3f7   : > { %v4648_v30 = vpop.f32.mrf.mxu3  ;;  %v1649_v1 = vmul.f32 %v4625_v37, %v1636_v54  ;;  %v1650_v10 = vmul.f32 %v4627_v24, %v1632_v34  ;;  %v1647_v34 = vmul.f32 %v4625_v37, %v4598_v3 }
 0x3f8   : > { %v4650_v62 = vadd.f32 %v1691_v36, %v1643_v27  ;;  %v4652_v23 = vadd.f32 %v1692_v13, %v1644_v15 }
 0x3fc   : > { %v2266_v46 = vpop.permute.xlu0 %2265 }
 0x3fd   : > { %v2264_v25 = vpop.permute.xlu1 %2263  ;;  %v2268_v58 = vpop.permute.xlu2 %2267 }
 0x3fe   : > { %v4657_v50 = vsel %vm2271_vm3, %v2256_v6, %v2264_v25  ;;  %v4661_v9 = vsel %vm2271_vm3, %v2264_v25, %v2256_v6  ;;  %v1840_v2 = vpop.f32.mrf.mxu2 }
 0x3ff   : > { %v1879_v48 = vpop.f32.mrf.mxu3  ;;  %1993 = vrot.lane.b32.xlu0 %v1840_v2, %s3137_s25 }
 0x400   : > { %2001 = vrot.lane.b32.xlu2 %v1879_v48, %s3137_s25 }
 0x404   : > { %v2260_v5 = vpop.permute.xlu0 %2259 }
 0x405   : > { %v2258_v53 = vpop.permute.xlu1 %2257  ;;  %v4667_v0 = vsel %vm2271_vm3, %v2260_v5, %v2268_v58  ;;  %v4671_v56 = vsel %vm2271_vm3, %v2268_v58, %v2260_v5  ;;  %v2262_v45 = vpop.permute.xlu2 %2261  ;;  %v1648_v58 = vmul.f32 %v4627_v24, %v4594_v57 }
 0x406   : > { %v4675_v14 = vsel %vm2271_vm3, %v2258_v53, %v2266_v46  ;;  %v4679_v11 = vsel %vm2271_vm3, %v2266_v46, %v2258_v53  ;;  %v1842_v49 = vpop.f32.mrf.mxu2 }
 0x407   : > { %v1881_v42 = vpop.f32.mrf.mxu3 }
 0x408   : > { %2003 = vrot.lane.b32.xlu1 %v1881_v42, %s3137_s25  ;;  %1995 = vrot.lane.b32.xlu2 %v1842_v49, %s3137_s25 }
 0x40c   : > { %v1672_v21 = vpop.permute.xlu0 %1671 }
 0x40d   : > { %v1670_v18 = vpop.permute.xlu1 %1669  ;;  %v1674_v43 = vpop.permute.xlu2 %1673 }
 0x40e   : > { %v1677_v20 = vsel %vm1675_vm2, %v1662_v44, %v1670_v18  ;;  %v1681_v6 = vsel %vm1675_vm2, %v1670_v18, %v1662_v44  ;;  %v1845_v55 = vpop.f32.mrf.mxu2 }
 0x40f   : > { %v1693_v59 = vmul.f32 %v4630_v4, %v1681_v6  ;;  %v1694_v26 = vmul.f32 %v4632_v29, %v1677_v20  ;;  %v1884_v51 = vpop.f32.mrf.mxu3 }
 0x410   : > { %2005 = vrot.lane.b32.xlu0 %v1884_v51, %s3137_s25  ;;  %1997 = vrot.lane.b32.xlu1 %v1845_v55, %s3137_s25  ;;  %v1741_v55 = vld [vmem:[#allocation9 + $0x2] ss:$8 sm:$0x3] }
 0x411   : > { %v1701_v27 = vadd.f32 %v1693_v59, %v1645_v52  ;;  %v1702_v15 = vadd.f32 %v1694_v26, %v1646_v16  ;;  %v2159_v16 = vpop.f32.mrf.mxu1  ;;  %v4740_v51 = vperm.slane %v1741_v55, 1 }
 0x414   : > { %v1666_v47 = vpop.permute.xlu0 %1665 }
 0x415   : > { %v4697_v40 = vpop.permute.xlu2 %2319  ;;  %v1664_v38 = vpop.permute.xlu1 %1663  ;;  %v1679_v44 = vsel %vm1675_vm2, %v1666_v47, %v1674_v43  ;;  %v1683_v36 = vsel %vm1675_vm2, %v1674_v43, %v1666_v47 }
 0x416   : > { %v1678_v13 = vsel %vm1675_vm2, %v1664_v38, %v1672_v21  ;;  %v1682_v46 = vsel %vm1675_vm2, %v1672_v21, %v1664_v38  ;;  %v1697_v25 = vmul.f32 %v4630_v4, %v1683_v36  ;;  %v1698_v54 = vmul.f32 %v4632_v29, %v1679_v44  ;;  %v1847_v5 = vpop.f32.mrf.mxu2 }
 0x417   : > { %v1695_v2 = vmul.f32 %v4630_v4, %v1682_v46  ;;  %v1696_v48 = vmul.f32 %v4632_v29, %v1678_v13  ;;  %v1886_v53 = vpop.f32.mrf.mxu3 }
 0x418   : > { %v4715_v49 = vadd.f32 %v1697_v25, %v1649_v1  ;;  %v4717_v42 = vadd.f32 %v1698_v54, %v1650_v10  ;;  %1999 = vrot.lane.b32.xlu0 %v1847_v5, %s3137_s25  ;;  %2007 = vrot.lane.b32.xlu2 %v1886_v53, %s3137_s25 }
 0x419   : > { %v1703_v21 = vadd.f32 %v1695_v2, %v1647_v34  ;;  %v1704_v18 = vadd.f32 %v1696_v48, %v1648_v58 }
 0x41c   : > { %v4721_v3 = vpop.permute.xlu0 %2311 }
 0x41d   : > { %v4723_v37 = vpop.permute.xlu2 %2313  ;;  %v2270_v57 = vpop.permute.xlu1 %2269 }
 0x41e   : > { %5122 = vst [vmem:[#allocation26_spill] sm:$0xff] %v4723_v37  ;;  %v4727_v24 = vsel %vm2271_vm3, %v2262_v45, %v2270_v57  ;;  %v4731_v4 = vsel %vm2271_vm3, %v2270_v57, %v2262_v45  ;;  %v2123_v29 = vpop.f32.mrf.mxu2  ;;  %v4738_v45 = vperm.slane %v1741_v55, 0 }
 0x41f   : > { %5123 = vst [vmem:[#allocation24_spill] sm:$0xff] %v4727_v24  ;;  %v2162_v43 = vpop.f32.mrf.mxu3  ;;  %2315 = vrot.lane.b32.xlu1 %v2123_v29, %s3134_s12 }
 0x420   : > { %5124 = vst [vmem:[#allocation25_spill] sm:$0xff] %v4731_v4 }
 0x424   : > { %v1724_v20 = vpop.permute.xlu0 %1723 }
 0x425   : > { %v1726_v6 = vpop.permute.xlu2 %1725  ;;  %v1716_v52 = vpop.permute.xlu1 %1715 }
 0x426   : > { %v2125_v59 = vpop.f32.mrf.mxu2 }
 0x427   : > { %v2164_v26 = vpop.f32.mrf.mxu3  ;;  %2321 = vrot.lane.b32.xlu1 %v2159_v16, %s3134_s12  ;;  %2317 = vrot.lane.b32.xlu0 %v2125_v59, %s3134_s12 }
 0x428   : > { %2325 = vrot.lane.b32.xlu2 %v2164_v26, %s3134_s12  ;;  %v1947_v26 = vld [vmem:[#allocation9 + $0x3] ss:$8 sm:$0x3] }
 0x42c   : > { %v1718_v47 = vpop.permute.xlu0 %1717 }
 0x42d   : > { %v1728_v1 = vpop.permute.xlu1 %1727  ;;  %v1733_v10 = vsel %vm1731_vm4, %v1718_v47, %v1726_v6  ;;  %v1737_v38 = vsel %vm1731_vm4, %v1726_v6, %v1718_v47  ;;  %v1720_v44 = vpop.permute.xlu2 %1719 }
 0x42e   : > { %v1749_v36 = vmul.f32 %v4738_v45, %v1737_v38  ;;  %v1750_v13 = vmul.f32 %v4740_v51, %v1733_v10  ;;  %v1734_v46 = vsel %vm1731_vm4, %v1720_v44, %v1728_v1  ;;  %v1738_v25 = vsel %vm1731_vm4, %v1728_v1, %v1720_v44 }
 0x42f   : > { %v1751_v54 = vmul.f32 %v4738_v45, %v1738_v25  ;;  %v1752_v34 = vmul.f32 %v4740_v51, %v1734_v46  ;;  %2323 = vrot.lane.b32.xlu0 %v2162_v43, %s3134_s12 }
 0x430   : > { %v4754_v58 = vadd.f32 %v1749_v36, %v1701_v27  ;;  %v4756_v2 = vadd.f32 %v1750_v13, %v1702_v15  ;;  %v1732_v27 = vsel %vm1731_vm4, %v1716_v52, %v1724_v20  ;;  %v1736_v15 = vsel %vm1731_vm4, %v1724_v20, %v1716_v52  ;;  %v2019_v36 = vld [vmem:[#allocation9 + $0x4] ss:$8 sm:$0x3]  ;;  %v2225_v13 = vld [vmem:[#allocation9 + $0x5] ss:$8 sm:$0x3] }
 0x431   : > { %v4759_v48 = vadd.f32 %v1751_v54, %v1703_v21  ;;  %v4761_v5 = vadd.f32 %v1752_v34, %v1704_v18  ;;  %v4772_v21 = vperm.slane %v1947_v26, 0  ;;  %v4774_v18 = vperm.slane %v1947_v26, 1  ;;  %v2281_v54 = vld [vmem:[#allocation9 + $0x6] ss:$8 sm:$0x3] }
 0x432   : > { %v1747_v10 = vmul.f32 %v4738_v45, %v1736_v15  ;;  %v1748_v38 = vmul.f32 %v4740_v51, %v1732_v27  ;;  %v4789_v34 = vperm.slane %v2019_v36, 0 }
 0x434   : > { %v4765_v29 = vpop.permute.xlu0 %1729  ;;  %v1755_v46 = vadd.f32 %v1747_v10, %v4650_v62  ;;  %v1756_v25 = vadd.f32 %v1748_v38, %v4652_v23  ;;  %v4799_v62 = vperm.slane %v2225_v13, 1  ;;  %v4801_v23 = vperm.slane %v2281_v54, 0  ;;  %v2337_v38 = vld [vmem:[#allocation9 + $0x7] ss:$8 sm:$0x3] }
 0x435   : > { %v4763_v53 = vpop.permute.xlu1 %1721  ;;  %v1922_v57 = vpop.permute.xlu2 %1921  ;;  %v4803_v10 = vperm.slane %v2281_v54, 1  ;;  %v4822_v24 = vperm.slane %v2337_v38, 1 }
 0x43c   : > { %v1932_v59 = vpop.permute.xlu0 %1931 }
 0x43d   : > { %v1930_v6 = vpop.permute.xlu1 %1929  ;;  %v1934_v16 = vpop.permute.xlu2 %1933 }
 0x43e   : > { %v1938_v47 = vsel %vm1937_vm5, %v1922_v57, %v1930_v6  ;;  %v1942_v1 = vsel %vm1937_vm5, %v1930_v6, %v1922_v57  ;;  %v4791_v57 = vperm.slane %v2019_v36, 1 }
 0x43f   : > { %v1953_v20 = vmul.f32 %v4772_v21, %v1942_v1  ;;  %v1954_v52 = vmul.f32 %v4774_v18, %v1938_v47  ;;  %v4797_v1 = vperm.slane %v2225_v13, 0 }
 0x441   : > { %v1961_v6 = vadd.f32 %v1953_v20, %v1755_v46  ;;  %v1962_v26 = vadd.f32 %v1954_v52, %v1756_v25  ;;  %v2231_v4 = vmul.f32 %v4797_v1, %v4555_v61 }
 0x443   : > { %v1977_v13 = vadd.f32 %v1961_v6, %v4587_v28  ;;  %v1978_v25 = vadd.f32 %v1962_v26, %v4589_v22  ;;  %v2328_v28 = vsel %vm2327_vm7, %v4721_v3, %v4697_v40  ;;  %v2332_v22 = vsel %vm2327_vm7, %v4697_v40, %v4721_v3 }
 0x444   : > { %v1926_v44 = vpop.permute.xlu0 %1925 }
 0x445   : > { %v1924_v43 = vpop.permute.xlu1 %1923  ;;  %v4776_v55 = vpop.permute.xlu2 %1927 }
 0x446   : > { %v1939_v27 = vsel %vm1937_vm5, %v1924_v43, %v1932_v59  ;;  %v1943_v15 = vsel %vm1937_vm5, %v1932_v59, %v1924_v43 }
 0x447   : > { %v1955_v36 = vmul.f32 %v4772_v21, %v1943_v15  ;;  %v1956_v46 = vmul.f32 %v4774_v18, %v1939_v27  ;;  %v2232_v27 = vmul.f32 %v4799_v62, %v4559_v35  ;;  %v4820_v15 = vperm.slane %v2337_v38, 0 }
 0x448   : > { %v1944_v38 = vsel %vm1937_vm5, %v1934_v16, %v1926_v44 }
 0x449   : > { %v1963_v61 = vadd.f32 %v1955_v36, %v4754_v58  ;;  %v1964_v35 = vadd.f32 %v1956_v46, %v4756_v2  ;;  %v2343_v3 = vmul.f32 %v4820_v15, %v2328_v28  ;;  %v1957_v58 = vmul.f32 %v4772_v21, %v1944_v38 }
 0x44d   : > { %v1936_v20 = vpop.permute.xlu1 %1935 }
 0x45a   : > { %v2002_v47 = vpop.permute.xlu2 %2001 }
 0x462   : > { %v1996_v46 = vpop.permute.xlu2 %1995 }
 0x471   : > { %v1994_v52 = vpop.permute.xlu0 %1993 }
 0x472   : > { %v2010_v59 = vsel %vm2009_vm6, %v1994_v52, %v2002_v47  ;;  %v2014_v43 = vsel %vm2009_vm6, %v2002_v47, %v1994_v52  ;;  %v1940_v47 = vsel %vm1937_vm5, %v1926_v44, %v1934_v16  ;;  %v2287_v52 = vmul.f32 %v4801_v23, %v4657_v50 }
 0x473   : > { %v2025_v54 = vmul.f32 %v4789_v34, %v2010_v59  ;;  %v2026_v37 = vmul.f32 %v4791_v57, %v2014_v43  ;;  %v2288_v59 = vmul.f32 %v4803_v10, %v4661_v9  ;;  %v1958_v2 = vmul.f32 %v4774_v18, %v1940_v47 }
 0x474   : > { %v1979_v44 = vadd.f32 %v1963_v61, %v4608_v39  ;;  %v1980_v50 = vadd.f32 %v1964_v35, %v4610_v19  ;;  %v2234_v39 = vmul.f32 %v4799_v62, %v4570_v33  ;;  %v1735_v19 = vsel %vm1731_vm4, %v4763_v53, %v4765_v29 }
 0x475   : > { %v2033_v6 = vadd.f32 %v2025_v54, %v1977_v13  ;;  %v2034_v26 = vadd.f32 %v2026_v37, %v1978_v25  ;;  %v2344_v37 = vmul.f32 %v4822_v24, %v2332_v22  ;;  %v2233_v22 = vmul.f32 %v4797_v1, %v4566_v12 }
 0x476   : > { %v1739_v12 = vsel %vm1731_vm4, %v4765_v29, %v4763_v53  ;;  %v1965_v33 = vadd.f32 %v1957_v58, %v4759_v48  ;;  %v1966_v47 = vadd.f32 %v1958_v2, %v4761_v5  ;;  %v1941_v53 = vsel %vm1937_vm5, %v4776_v55, %v1936_v20 }
 0x477   : > { %v2239_v43 = vadd.f32 %v2231_v4, %v2033_v6  ;;  %v2240_v40 = vadd.f32 %v2232_v27, %v2034_v26  ;;  %v1945_v48 = vsel %vm1937_vm5, %v1936_v20, %v4776_v55  ;;  %v1753_v29 = vmul.f32 %v4738_v45, %v1739_v12 }
 0x478   : > { %v1981_v2 = vadd.f32 %v1965_v33, %v4621_v41  ;;  %v1959_v55 = vmul.f32 %v4772_v21, %v1945_v48  ;;  %v1960_v45 = vmul.f32 %v4774_v18, %v1941_v53  ;;  %v2235_v41 = vmul.f32 %v4797_v1, %v4602_v32  ;;  %v2008_v32 = vpop.permute.xlu2 %2007 }
 0x479   : > { %v2295_v13 = vadd.f32 %v2287_v52, %v2239_v43  ;;  %v2296_v16 = vadd.f32 %v2288_v59, %v2240_v40  ;;  %v2289_v52 = vmul.f32 %v4801_v23, %v4675_v14  ;;  %v2290_v59 = vmul.f32 %v4803_v10, %v4679_v11 }
 0x47a   : > { %v2004_v36 = vpop.permute.xlu1 %2003  ;;  %v2291_v21 = vmul.f32 %v4801_v23, %v4667_v0  ;;  %v2292_v18 = vmul.f32 %v4803_v10, %v4671_v56 }
 0x47b   : > { %v2011_v9 = vsel %vm2009_vm6, %v1996_v46, %v2004_v36  ;;  %v2015_v4 = vsel %vm2009_vm6, %v2004_v36, %v1996_v46  ;;  %v4854_v27 = vadd.f32 %v2343_v3, %v2295_v13  ;;  %v4856_v28 = vadd.f32 %v2344_v37, %v2296_v16 }
 0x47c   : > { %v2027_v25 = vmul.f32 %v4789_v34, %v2011_v9  ;;  %v2028_v54 = vmul.f32 %v4791_v57, %v2015_v4  ;;  %v1754_v3 = vmul.f32 %v4740_v51, %v1735_v19  ;;  %v1982_v36 = vadd.f32 %v1966_v47, %v4623_v63  ;;  %v5125_v47 = vld [vmem:[#allocation24_spill] sm:$0xff] }
 0x47d   : > { %v2359_v61 = vadd.f32 %v4856_v28, %v4854_v27  ;;  %v2371_v35 = vmul.f32 %v4854_v27, %v4854_v27  ;;  %v2372_v38 = vmul.f32 %v4856_v28, %v4856_v28  ;;  %v2236_v63 = vmul.f32 %v4799_v62, %v4606_v7 }
 0x47e   : > { %v2035_v6 = vadd.f32 %v2027_v25, %v1979_v44  ;;  %v2036_v26 = vadd.f32 %v2028_v54, %v1980_v50  ;;  %v1761_v16 = vadd.f32 %v1753_v29, %v4715_v49  ;;  %v1762_v44 = vadd.f32 %v1754_v3, %v4717_v42 }
 0x47f   : > { %2360 = vadd.xlane.f32.xlu1 %v2359_v61  ;;  %v2379_v5 = vadd.f32 %v2372_v38, %v2371_v35  ;;  %v2237_v61 = vmul.f32 %v4797_v1, %v4615_v60  ;;  %v2238_v35 = vmul.f32 %v4799_v62, %v4619_v31  ;;  %v2293_v38 = vmul.f32 %v4801_v23, %v5125_v47  ;;  %v5127_v60 = vld [vmem:[#allocation26_spill] sm:$0xff] }
 0x480   : > { %v2241_v43 = vadd.f32 %v2233_v22, %v2035_v6  ;;  %v2242_v40 = vadd.f32 %v2234_v39, %v2036_v26  ;;  %v1967_v4 = vadd.f32 %v1959_v55, %v1761_v16  ;;  %v1968_v25 = vadd.f32 %v1960_v45, %v1762_v44 }
 0x481   : > { %2380 = vadd.xlane.f32.xlu0 %v2379_v5 }
 0x482   : > { %v2006_v14 = vpop.permute.xlu0 %2005  ;;  %v1998_v37 = vpop.permute.xlu1 %1997  ;;  %v2297_v58 = vadd.f32 %v2289_v52, %v2241_v43  ;;  %v2298_v11 = vadd.f32 %v2290_v59, %v2242_v40  ;;  %v1983_v6 = vadd.f32 %v1967_v4, %v4646_v17  ;;  %v1984_v0 = vadd.f32 %v1968_v25, %v4648_v30  ;;  %v5126_v52 = vld [vmem:[#allocation25_spill] sm:$0xff] }
 0x483   : > { %v2012_v46 = vsel %vm2009_vm6, %v1998_v37, %v2006_v14  ;;  %v2016_v13 = vsel %vm2009_vm6, %v2006_v14, %v1998_v37  ;;  %v2294_v17 = vmul.f32 %v4803_v10, %v5126_v52 }
 0x484   : > { %v2029_v51 = vmul.f32 %v4789_v34, %v2012_v46  ;;  %v2030_v20 = vmul.f32 %v4791_v57, %v2016_v13 }
 0x486   : > { %v2037_v50 = vadd.f32 %v2029_v51, %v1981_v2  ;;  %v2038_v9 = vadd.f32 %v2030_v20, %v1982_v36 }
 0x488   : > { %v2243_v54 = vadd.f32 %v2235_v41, %v2037_v50  ;;  %v2244_v22 = vadd.f32 %v2236_v63, %v2038_v9 }
 0x48a   : > { %v2000_v39 = vpop.permute.xlu0 %1999  ;;  %v2299_v19 = vadd.f32 %v2291_v21, %v2243_v54  ;;  %v2300_v7 = vadd.f32 %v2292_v18, %v2244_v22 }
 0x48b   : > { %v2013_v49 = vsel %vm2009_vm6, %v2000_v39, %v2008_v32  ;;  %v2017_v42 = vsel %vm2009_vm6, %v2008_v32, %v2000_v39 }
 0x48c   : > { %v2031_v56 = vmul.f32 %v4789_v34, %v2013_v49  ;;  %v2032_v26 = vmul.f32 %v4791_v57, %v2017_v42  ;;  %v2326_v57 = vpop.permute.xlu2 %2325 }
 0x48e   : > { %v2039_v12 = vadd.f32 %v2031_v56, %v1983_v6  ;;  %v2040_v33 = vadd.f32 %v2032_v26, %v1984_v0 }
 0x490   : > { %v2245_v59 = vadd.f32 %v2237_v61, %v2039_v12  ;;  %v2246_v30 = vadd.f32 %v2238_v35, %v2040_v33 }
 0x491   : > { %v2316_v43 = vpop.permute.xlu1 %2315 }
 0x492   : > { %v2301_v34 = vadd.f32 %v2293_v38, %v2245_v59  ;;  %v2302_v40 = vadd.f32 %v2294_v17, %v2246_v30 }
 0x499   : > { %v2322_v53 = vpop.permute.xlu1 %2321  ;;  %v2318_v48 = vpop.permute.xlu0 %2317 }
 0x49a   : > { %v2329_v31 = vsel %vm2327_vm7, %v5127_v60, %v2322_v53  ;;  %v2333_v1 = vsel %vm2327_vm7, %v2322_v53, %v5127_v60  ;;  %v2331_v62 = vsel %vm2327_vm7, %v2318_v48, %v2326_v57  ;;  %v2335_v23 = vsel %vm2327_vm7, %v2326_v57, %v2318_v48 }
 0x49b   : > { %v2345_v10 = vmul.f32 %v4820_v15, %v2329_v31  ;;  %v2346_v5 = vmul.f32 %v4822_v24, %v2333_v1  ;;  %v2349_v29 = vmul.f32 %v4820_v15, %v2331_v62  ;;  %v2350_v3 = vmul.f32 %v4822_v24, %v2335_v23 }
 0x49d   : > { %v4940_v14 = vadd.f32 %v2345_v10, %v2297_v58  ;;  %v4942_v37 = vadd.f32 %v2346_v5, %v2298_v11  ;;  %v4944_v2 = vadd.f32 %v2349_v29, %v2301_v34  ;;  %v4946_v36 = vadd.f32 %v2350_v3, %v2302_v40 }
 0x49f   : > { %v2362_v46 = vadd.f32 %v4942_v37, %v4940_v14  ;;  %v2368_v13 = vadd.f32 %v4946_v36, %v4944_v2  ;;  %v2377_v20 = vmul.f32 %v4944_v2, %v4944_v2  ;;  %v2378_v41 = vmul.f32 %v4946_v36, %v4946_v36 }
 0x4a0   : > { %v2373_v9 = vmul.f32 %v4940_v14, %v4940_v14  ;;  %v2374_v21 = vmul.f32 %v4942_v37, %v4942_v37 }
 0x4a1   : > { %2363 = vadd.xlane.f32.xlu0 %v2362_v46  ;;  %2369 = vadd.xlane.f32.xlu1 %v2368_v13  ;;  %v2324_v55 = vpop.permute.xlu0 %2323  ;;  %v2388_v44 = vadd.f32 %v2378_v41, %v2377_v20 }
 0x4a2   : > { %v2330_v45 = vsel %vm2327_vm7, %v2316_v43, %v2324_v55  ;;  %v2334_v58 = vsel %vm2327_vm7, %v2324_v55, %v2316_v43  ;;  %v2382_v18 = vadd.f32 %v2374_v21, %v2373_v9 }
 0x4a3   : > { %v2347_v11 = vmul.f32 %v4820_v15, %v2330_v45  ;;  %v2348_v51 = vmul.f32 %v4822_v24, %v2334_v58 }
 0x4a5   : > { %v4962_v63 = vadd.f32 %v2347_v11, %v2299_v19  ;;  %v4964_v16 = vadd.f32 %v2348_v51, %v2300_v7 }
 0x4a7   : > { %v2365_v50 = vadd.f32 %v4964_v16, %v4962_v63  ;;  %v2375_v8 = vmul.f32 %v4962_v63, %v4962_v63  ;;  %v2376_v24 = vmul.f32 %v4964_v16, %v4964_v16 }
 0x4a9   : > { %2389 = vadd.xlane.f32.xlu0 %v2388_v44  ;;  %2366 = vadd.xlane.f32.xlu2 %v2365_v50  ;;  %v2385_v15 = vadd.f32 %v2376_v24, %v2375_v8 }
 0x4ab   : > { %2386 = vadd.xlane.f32.xlu1 %v2385_v15 }
 0x4b1   : > { %2383 = vadd.xlane.f32.xlu2 %v2382_v18 }
 0x4f2   : > { %v2361_v4 = vpop.xlane.xlu1 %2360 }
 0x4f3   : > { %v2391_v25 = vmul.f32 0.00390625, %v2361_v4 }
 0x4f4   : > { %v2381_v22 = vpop.xlane.xlu0 %2380 }
 0x4f5   : > { %v2399_v54 = vmul.f32 %v2391_v25, %v2391_v25  ;;  %v2395_v32 = vmul.f32 0.00390625, %v2381_v22  ;;  %v2411_v61 = vsub.f32 %v4854_v27, %v2391_v25  ;;  %v2412_v35 = vsub.f32 %v4856_v28, %v2391_v25 }
 0x4f7   : > { %v2403_v39 = vsub.f32 %v2395_v32, %v2399_v54 }
 0x4f9   : > { %v2407_v19 = vmax.f32 %v2403_v39, 0.0 }
 0x4fb   : > { %v2419_v7 = vadd.f32 1e-05, %v2407_v19 }
 0x4fd   : > { %2919 = vrsqrt.f32 %v2419_v7  ;;  %vm2429_vm9 = vweird.f32 %v2419_v7 }
 0x503   : > { %v2920_v49 = vpop.eup %2919 }
 0x504   : > { %v2424_v42 = vmul.f32 %v2920_v49, %v2419_v7  ;;  %vm2430_vm8 = vweird.f32 %v2920_v49 }
 0x505   : > { %vm2431_vm10 = vmor %vm2429_vm9, %vm2430_vm8 }
 0x506   : > { %v2425_v6 = vmul.f32 %v2920_v49, %v2424_v42 }
 0x508   : > { %v2426_v0 = vmul.f32 0.5, %v2425_v6 }
 0x50a   : > { %v2427_v56 = vsub.f32 1.5, %v2426_v0 }
 0x50c   : > { %v2428_v26 = vmul.f32 %v2920_v49, %v2427_v56 }
 0x50e   : > { %v2432_v12 = vsel %vm2431_vm10, %v2920_v49, %v2428_v26 }
 0x50f   : > { %v2463_v33 = vmul.f32 %v2432_v12, %v2411_v61  ;;  %v2464_v47 = vmul.f32 %v2432_v12, %v2412_v35 }
 0x511   : > { %2471 = vst [vmem:[%s4979_s29] sm:$0xff] %v2463_v33 }
 0x512   : > { %2472 = vst [vmem:[%s4979_s29 + $0x8] sm:$0xff] %v2464_v47 }
 0x514   : > { %v2364_v38 = vpop.xlane.xlu0 %2363  ;;  %v2370_v52 = vpop.xlane.xlu1 %2369 }
 0x515   : > { %v2394_v17 = vmul.f32 0.00390625, %v2370_v52  ;;  %v4983_v48 = vmul.f32 0.00390625, %v2364_v38 }
 0x517   : > { %v2402_v34 = vmul.f32 %v2394_v17, %v2394_v17  ;;  %v2400_v5 = vmul.f32 %v4983_v48, %v4983_v48  ;;  %v2417_v9 = vsub.f32 %v4944_v2, %v2394_v17  ;;  %v2418_v21 = vsub.f32 %v4946_v36, %v2394_v17 }
 0x518   : > { %v2414_v6 = vsub.f32 %v4942_v37, %v4983_v48 }
 0x51c   : > { %v2367_v59 = vpop.xlane.xlu2 %2366  ;;  %v2390_v30 = vpop.xlane.xlu0 %2389 }
 0x51d   : > { %v2393_v43 = vmul.f32 0.00390625, %v2367_v59  ;;  %v2398_v27 = vmul.f32 0.00390625, %v2390_v30 }
 0x51e   : > { %v2387_v40 = vpop.xlane.xlu1 %2386 }
 0x51f   : > { %v2406_v28 = vsub.f32 %v2398_v27, %v2402_v34  ;;  %v2397_v57 = vmul.f32 0.00390625, %v2387_v40  ;;  %v2401_v53 = vmul.f32 %v2393_v43, %v2393_v43  ;;  %v2415_v39 = vsub.f32 %v4962_v63, %v2393_v43 }
 0x520   : > { %v2416_v2 = vsub.f32 %v4964_v16, %v2393_v43  ;;  %v2413_v16 = vsub.f32 %v4940_v14, %v4983_v48 }
 0x521   : > { %v2410_v60 = vmax.f32 %v2406_v28, 0.0  ;;  %v2405_v31 = vsub.f32 %v2397_v57, %v2401_v53 }
 0x523   : > { %v2422_v1 = vadd.f32 1e-05, %v2410_v60  ;;  %v2409_v62 = vmax.f32 %v2405_v31, 0.0 }
 0x524   : > { %v2384_v23 = vpop.xlane.xlu2 %2383 }
 0x525   : > { %2921 = vrsqrt.f32 %v2422_v1  ;;  %v2396_v10 = vmul.f32 0.00390625, %v2384_v23  ;;  %v2421_v29 = vadd.f32 1e-05, %v2409_v62  ;;  %vm2459_vm12 = vweird.f32 %v2422_v1 }
 0x527   : > { %v2404_v3 = vsub.f32 %v2396_v10, %v2400_v5  ;;  %2923 = vrsqrt.f32 %v2421_v29  ;;  %vm2449_vm15 = vweird.f32 %v2421_v29 }
 0x529   : > { %v2408_v46 = vmax.f32 %v2404_v3, 0.0 }
 0x52b   : > { %v2922_v13 = vpop.eup %2921  ;;  %v2420_v55 = vadd.f32 1e-05, %v2408_v46 }
 0x52c   : > { %v2454_v45 = vmul.f32 %v2922_v13, %v2422_v1  ;;  %vm2460_vm11 = vweird.f32 %v2922_v13 }
 0x52d   : > { %2925 = vrsqrt.f32 %v2420_v55  ;;  %v2924_v58 = vpop.eup %2923  ;;  %vm2461_vm13 = vmor %vm2459_vm12, %vm2460_vm11  ;;  %vm2439_vm2 = vweird.f32 %v2420_v55 }
 0x52e   : > { %v2455_v11 = vmul.f32 %v2922_v13, %v2454_v45  ;;  %v2444_v51 = vmul.f32 %v2924_v58, %v2421_v29  ;;  %vm2450_vm14 = vweird.f32 %v2924_v58 }
 0x52f   : > { %vm2451_vm0 = vmor %vm2449_vm15, %vm2450_vm14 }
 0x530   : > { %v2456_v20 = vmul.f32 0.5, %v2455_v11  ;;  %v2445_v41 = vmul.f32 %v2924_v58, %v2444_v51 }
 0x532   : > { %v2457_v44 = vsub.f32 1.5, %v2456_v20  ;;  %v2446_v8 = vmul.f32 0.5, %v2445_v41 }
 0x533   : > { %v2926_v50 = vpop.eup %2925 }
 0x534   : > { %v2458_v24 = vmul.f32 %v2922_v13, %v2457_v44  ;;  %v2434_v15 = vmul.f32 %v2926_v50, %v2420_v55  ;;  %v2447_v18 = vsub.f32 1.5, %v2446_v8  ;;  %vm2440_vm1 = vweird.f32 %v2926_v50 }
 0x535   : > { %vm2441_vm3 = vmor %vm2439_vm2, %vm2440_vm1 }
 0x536   : > { %v2462_v4 = vsel %vm2461_vm13, %v2922_v13, %v2458_v24  ;;  %v2435_v25 = vmul.f32 %v2926_v50, %v2434_v15  ;;  %v2448_v32 = vmul.f32 %v2924_v58, %v2447_v18 }
 0x537   : > { %v2469_v54 = vmul.f32 %v2462_v4, %v2417_v9  ;;  %v2470_v22 = vmul.f32 %v2462_v4, %v2418_v21 }
 0x538   : > { %v2436_v36 = vmul.f32 0.5, %v2435_v25  ;;  %v2452_v19 = vsel %vm2451_vm0, %v2924_v58, %v2448_v32 }
 0x539   : > { %2477 = vst [vmem:[%s4979_s29 + $0x30] sm:$0xff] %v2469_v54  ;;  %v2467_v7 = vmul.f32 %v2452_v19, %v2415_v39  ;;  %v2468_v49 = vmul.f32 %v2452_v19, %v2416_v2 }
 0x53a   : > { %2478 = vst [vmem:[%s4979_s29 + $0x38] sm:$0xff] %v2470_v22  ;;  %v2437_v42 = vsub.f32 1.5, %v2436_v36 }
 0x53b   : > { %2475 = vst [vmem:[%s4979_s29 + $0x20] sm:$0xff] %v2467_v7 }
 0x53c   : > { %v2438_v63 = vmul.f32 %v2926_v50, %v2437_v42  ;;  %2476 = vst [vmem:[%s4979_s29 + $0x28] sm:$0xff] %v2468_v49 }
 0x53e   : > { %v2442_v0 = vsel %vm2441_vm3, %v2926_v50, %v2438_v63 }
 0x53f   : > { %v2465_v56 = vmul.f32 %v2442_v0, %v2413_v16  ;;  %v2466_v26 = vmul.f32 %v2442_v0, %v2414_v6 }
 0x541   : > { %2473 = vst [vmem:[%s4979_s29 + $0x10] sm:$0xff] %v2465_v56 }
 0x542   : > { %2474 = vst [vmem:[%s4979_s29 + $0x18] sm:$0xff] %v2466_v26 }
 0x543   : > { %3074 = shalt.err (!%p3071_p10)
}
 0x544   : > { %s3138_s8 = smov 256  }
 0x545   : > { %2779 = dma.vmem_to_hbm [thread:$0]  (%p3247_p7), %s2493_s10, 1024, %s2495_s14, %s2480_s20, %s3138_s8, %s3138_s8, %s3132_s9  }
 0x546 PF: > { %s2509_s5 = sand.u32 1, %s3109_s15   ;;  %p5128_p12 = scmp.ge.s32.totalorder %s3121_s18, 2 }
 0x547   : > { %s2510_s29 = scalar_lea.sflag [#allocation5], %s2509_s5 }
 0x548   : > { %p2796_p13 = pnand %p5128_p12, %p3199_p6 }
 0x54a   : > { %p2797_p0 = pneg %p2796_p13 }
 0x54c   : > { %3104 = dma.done.wait (%p2797_p0), %s2510_s29, 1024  }
 0x54d   : > { %3106 = vsyncadd (%p2797_p0), %s2510_s29, 4294966272  ;;  %p19_p3 = scmp.ge.s32.totalorder %s3231_s23, 4   ;;  %s5129_s15 = smov %s3113_s16 }
 0x54e   : > { %s5130_s16 = smov %s3117_s17  ;;  %s5131_s17 = smov %s3243_s27 }
 0x54f   : > { %s5132_s18 = smov %s3231_s23  ;;  %21 = sbr.rel (!%p19_p3) target bundleno = 7 (0x7), region = 100 }
 0x554   :  { %2516 = vsyncpa [#allocation4], 1 }
 0x555   :  { %2518 = vsyncpa [#allocation4 + $0x1], 1 }
 0x556   :  { %2519 = vsyncpa [#allocation7], 1 }
 0x557   :  { %2520 = vsyncpa [#allocation10], 1 }
 0x558   :  { %2521 = vsyncpa [#allocation5], 1 }
 0x559   :  { %2523 = vsyncpa [#allocation5 + $0x1], 1 }

</bundles_post_ra>
